<compile_context>
chip_gen: v6e
topology: v6e:2x2x1
jax: 0.10.0
libtpu: 0.0.40
codegen_flags: <defaults>
</compile_context>

<pallas_src>
import functools

import jax
import jax.numpy as jnp
from jax import lax
from jax.experimental import pallas as pl
from jax.experimental.pallas import tpu as pltpu

INITRANGE = 0.04

# A fixed DARTS-style genotype: list of (activation_name, predecessor_state_idx).
RECURRENT = [
    ("tanh", 0),
    ("relu", 1),
    ("sigmoid", 1),
    ("identity", 2),
    ("tanh", 3),
    ("relu", 4),
    ("sigmoid", 2),
    ("identity", 5),
]
CONCAT = tuple(range(1, 9))  # average states 1..8
STEPS = len(RECURRENT)


def _round_up(x, m):
    return (x + m - 1) // m * m


def _sigmoid(x):
    # Single EUP tanh push instead of exp + divide (mathematically identical).
    return 0.5 * (jnp.tanh(0.5 * x) + 1.0)


def _activation(name, x):
    if name == "tanh":
        return jnp.tanh(x)
    if name == "relu":
        return jnp.maximum(x, 0.0)
    if name == "sigmoid":
        return _sigmoid(x)
    if name == "identity":
        return x
    raise NotImplementedError(name)


def _build_schedule(recurrent):
    """Group DAG edges by predecessor state -> one fused MXU dot per group.

    Returns a tuple of (pred_state, ((produced_state, act_name), ...)) entries,
    ordered so every predecessor is computed before it is consumed.
    """
    by_pred = {}
    for i, (name, pred) in enumerate(recurrent):
        by_pred.setdefault(pred, []).append((i + 1, name))
    computed = {0}
    remaining = dict(by_pred)
    schedule = []
    while remaining:
        for pred in sorted(remaining):
            if pred in computed:
                group = tuple(remaining.pop(pred))
                schedule.append((pred, group))
                computed.update(s for s, _ in group)
                break
        else:
            raise ValueError("genotype DAG is not well ordered")
    return tuple(schedule)


SCHEDULE = _build_schedule(RECURRENT)


def _darts_cell_kernel(xw_ref, h0_ref, w0h_ref, wsp_ref, out_ref, h_scratch,
                       *, nhid_p, time_block, schedule, concat, compute_dtype):
    """One grid step == `time_block` time steps; hidden carried in VMEM scratch."""
    two_n = 2 * nhid_p
    n_states = 1 + sum(len(g) for _, g in schedule)

    # Initialize the carried hidden state from the provided initial hidden.
    @pl.when(pl.program_id(0) == 0)
    def _():
        h_scratch[...] = h0_ref[...]

    def one_step(t, carry):
        h_prev = h_scratch[...]                      # (B_p, nhid_p) f32
        # Input projection was hoisted to the wrapper; only h_prev @ W0_h is
        # on the serial critical path (no concat, K = nhid_p only).
        ch0 = xw_ref[t] + jnp.dot(h_prev.astype(compute_dtype), w0h_ref[...],
                                  preferred_element_type=jnp.float32)
        c0 = _sigmoid(ch0[:, :nhid_p])
        g0 = jnp.tanh(ch0[:, nhid_p:])
        s0 = h_prev + c0 * (g0 - h_prev)

        states = [None] * n_states
        states[0] = s0
        off = 0
        for pred, group in schedule:
            s_prev = states[pred]
            width = two_n * len(group)               # fused wide-N matmul
            ch = jnp.dot(s_prev.astype(compute_dtype),
                         wsp_ref[:, off:off + width],
                         preferred_element_type=jnp.float32)
            for j, (s_idx, name) in enumerate(group):
                base = j * two_n
                c = _sigmoid(ch[:, base:base + nhid_p])
                h = _activation(name, ch[:, base + nhid_p:base + two_n])
                states[s_idx] = s_prev + c * (h - s_prev)
            off += width

        acc = states[concat[0]]
        for idx in concat[1:]:
            acc = acc + states[idx]
        out = acc * (1.0 / float(len(concat)))

        h_scratch[...] = out
        out_ref[t] = out.astype(out_ref.dtype)
        return carry

    lax.fori_loop(0, time_block, one_step, 0, unroll=True)


def _pad_gate_weight(w, nhid, nhid_p, k_pad, dtype):
    """(K, 2*nhid) with [gate | cand] halves -> (k_pad, 2*nhid_p), lane-aligned.

    Gate columns land in [:nhid], candidate columns in [nhid_p:nhid_p+nhid];
    padded rows/columns are zero so padding never leaks into real outputs.
    """
    k = w.shape[0]
    out = jnp.zeros((k_pad, 2 * nhid_p), dtype)
    out = out.at[:k, :nhid].set(w[:, :nhid].astype(dtype))
    out = out.at[:k, nhid_p:nhid_p + nhid].set(w[:, nhid:].astype(dtype))
    return out


@functools.partial(jax.jit, static_argnames=("time_block", "compute_dtype"))
def darts_cell_forward(inputs, hidden, w0, ws, *, time_block=8,
                       compute_dtype=jnp.bfloat16):
    """Pallas implementation of DARTSCell.forward (eval mode).

    Args:
      inputs: (T, B, ninp) float32
      hidden: (1, B, nhid) float32
      w0:     (ninp+nhid, 2*nhid) float32
      ws:     (STEPS, nhid, 2*nhid) float32
    Returns:
      (hiddens, last_hidden) with shapes (T, B, nhid) and (1, B, nhid)
    """
    T, B, ninp = inputs.shape
    nhid = hidden.shape[-1]

    nhid_p = _round_up(nhid, 128)        # lane alignment for gate/cand split
    b_p = _round_up(B, 16)               # sublane alignment (bf16 packs 16 rows)
    t_p = _round_up(T, time_block)

    # ---- weights: padded, bf16, DAG pairs fused along N (done once) ----
    w0x = _pad_gate_weight(w0[:ninp], nhid, nhid_p, ninp, compute_dtype)
    w0h = _pad_gate_weight(w0[ninp:], nhid, nhid_p, nhid_p, compute_dtype)
    packed = []
    for _, group in SCHEDULE:
        for s_idx, _ in group:
            packed.append(_pad_gate_weight(ws[s_idx - 1], nhid, nhid_p, nhid_p,
                                           compute_dtype))
    wsp = jnp.concatenate(packed, axis=1)            # (nhid_p, STEPS*2*nhid_p)

    # ---- hoisted input projection: one big parallel matmul over T*B rows ----
    x_p = jnp.zeros((t_p, b_p, ninp), inputs.dtype).at[:T, :B].set(inputs)
    xw = jnp.dot(x_p.reshape(t_p * b_p, ninp).astype(compute_dtype), w0x,
                 preferred_element_type=jnp.float32)
    xw = xw.reshape(t_p, b_p, 2 * nhid_p)

    h0 = jnp.zeros((b_p, nhid_p), jnp.float32).at[:B, :nhid].set(
        hidden[0].astype(jnp.float32))

    kernel = functools.partial(
        _darts_cell_kernel, nhid_p=nhid_p, time_block=time_block,
        schedule=SCHEDULE, concat=CONCAT, compute_dtype=compute_dtype)

    out = pl.pallas_call(
        kernel,
        out_shape=jax.ShapeDtypeStruct((t_p, b_p, nhid_p), jnp.float32),
        grid_spec=pltpu.PrefetchScalarGridSpec(
            num_scalar_prefetch=0,
            grid=(t_p // time_block,),
            in_specs=[
                # Precomputed x @ W0_x, streamed per time-block.
                pl.BlockSpec((time_block, b_p, 2 * nhid_p), lambda i: (i, 0, 0)),
                # Initial hidden.
                pl.BlockSpec((b_p, nhid_p), lambda i: (0, 0)),
                # Recurrent weights: whole-array VMEM residents (single
                # buffered, no per-step DMA; bf16 halves their footprint).
                pl.BlockSpec(memory_space=pltpu.MemorySpace.VMEM),
                pl.BlockSpec(memory_space=pltpu.MemorySpace.VMEM),
            ],
            out_specs=pl.BlockSpec((time_block, b_p, nhid_p), lambda i: (i, 0, 0)),
            scratch_shapes=[pltpu.VMEM((b_p, nhid_p), jnp.float32)],
        ),
        compiler_params=pltpu.CompilerParams(
            # Sequential carry over time -- must stay "arbitrary".
            dimension_semantics=("arbitrary",),
            # Safe on all generations at these shapes. For realistic DARTS
            # sizes (nhid ~ 850) raise toward 100 MiB on v5e/v6e and re-derive
            # the tiling for v7x's 64 MiB physical VMEM.
            vmem_limit_bytes=32 * 1024 * 1024,
        ),
    )(xw, h0, w0h, wsp)

    hiddens = out[:T, :B, :nhid]
    return hiddens, hiddens[-1][None]


def darts_cell_reference(inputs, hidden, w0, ws):
    """Pure-JAX f32 reference mirroring the torch forward (eval mode)."""
    T = inputs.shape[0]
    nhid = hidden.shape[-1]
    h = hidden[0]
    outs = []
    for t in range(T):
        x = inputs[t]
        xh = jnp.concatenate([x, h], axis=-1)
        ch0 = xh @ w0
        c0 = jax.nn.sigmoid(ch0[:, :nhid])
        h0 = jnp.tanh(ch0[:, nhid:])
        s0 = h + c0 * (h0 - h)
        states = [s0]
        for i, (name, pred) in enumerate(RECURRENT):
            s_prev = states[pred]
            ch = s_prev @ ws[i]
            c = jax.nn.sigmoid(ch[:, :nhid])
            hh = _activation(name, ch[:, nhid:])
            states.append(s_prev + c * (hh - s_prev))
        h = jnp.mean(jnp.stack([states[i] for i in CONCAT], -1), -1)
        outs.append(h)
    hiddens = jnp.stack(outs)
    return hiddens, hiddens[-1][None]


if __name__ == "__main__":
    T, B, ninp, nhid = 8, 2, 32, 32

    key = jax.random.PRNGKey(0)
    k_x, k_h, k_w0, k_ws = jax.random.split(key, 4)

    inputs = jax.random.normal(k_x, (T, B, ninp), dtype=jnp.float32)
    hidden = jax.random.normal(k_h, (1, B, nhid), dtype=jnp.float32)
    w0 = jax.random.uniform(
        k_w0, (ninp + nhid, 2 * nhid), minval=-INITRANGE, maxval=INITRANGE,
        dtype=jnp.float32)
    ws = jax.random.uniform(
        k_ws, (STEPS, nhid, 2 * nhid), minval=-INITRANGE, maxval=INITRANGE,
        dtype=jnp.float32)

    # time_block=4 -> grid of 2 time-blocks, exercising the cross-grid-step
    # hidden-state carry in VMEM scratch.
    hiddens, last = jax.block_until_ready(
        darts_cell_forward(inputs, hidden, w0, ws, time_block=4))

    ref_hiddens, ref_last = darts_cell_reference(inputs, hidden, w0, ws)
    assert hiddens.shape == (T, B, nhid)
    assert last.shape == (1, B, nhid)
    # bf16 MXU dots vs. the f32 reference -> relaxed tolerance.
    assert jnp.allclose(hiddens, ref_hiddens, atol=2e-2, rtol=2e-2), float(
        jnp.max(jnp.abs(hiddens - ref_hiddens)))
    assert jnp.allclose(last, ref_last, atol=2e-2, rtol=2e-2)

    print("KERNEL_OK")
</pallas_src>

<mosaic_0001>
module attributes {stable_mosaic.version = 11 : i64} {
  func.func @_darts_cell_kernel(%arg0: i32, %arg1: memref<4x16x256xf32, #tpu.memory_space<vmem>>, %arg2: memref<16x128xf32, #tpu.memory_space<vmem>>, %arg3: memref<128x256xbf16, #tpu.memory_space<vmem>>, %arg4: memref<128x2048xbf16, #tpu.memory_space<vmem>>, %arg5: memref<4x16x128xf32, #tpu.memory_space<vmem>>, %arg6: memref<16x128xf32, #tpu.memory_space<vmem>>) attributes {dimension_semantics = [#tpu.dimension_semantics<arbitrary>], iteration_bounds = array<i64: 2>, scalar_prefetch = 0 : i64, scratch_operands = 1 : i64, tpu.core_type = #tpu.core_type<tc>, window_params = [{transform_indices = @transform_0, window_bounds = array<i64: 4, 16, 256>}, {pipeline_mode = #tpu.pipeline_mode<synchronous>, transform_indices = @transform_1, window_bounds = array<i64: 16, 128>}, {pipeline_mode = #tpu.pipeline_mode<synchronous>, transform_indices = @transform_2, window_bounds = array<i64: 128, 256>}, {pipeline_mode = #tpu.pipeline_mode<synchronous>, transform_indices = @transform_3, window_bounds = array<i64: 128, 2048>}, {transform_indices = @transform_4, window_bounds = array<i64: 4, 16, 128>}]} {
    %c0_i32 = arith.constant 0 : i32
    %0 = arith.cmpi eq, %arg0, %c0_i32 : i32
    %1 = arith.extui %0 : i1 to i32
    %c0_i32_0 = arith.constant 0 : i32
    %2 = arith.cmpi ne, %1, %c0_i32_0 : i32
    scf.if %2 {
      %c0_255 = arith.constant 0 : index
      %c0_256 = arith.constant 0 : index
      %679 = vector.load %arg2[%c0_255, %c0_256] : memref<16x128xf32, #tpu.memory_space<vmem>>, vector<16x128xf32>
      %c0_257 = arith.constant 0 : index
      %c0_258 = arith.constant 0 : index
      %680 = vector.load %arg6[%c0_257, %c0_258] : memref<16x128xf32, #tpu.memory_space<vmem>>, vector<16x128xf32>
      tpu.vector_store %arg6[%c0_257, %c0_258], %679 {strides = array<i32>} : memref<16x128xf32, #tpu.memory_space<vmem>>, vector<16x128xf32>,
    } else {
    }
    %c0_i32_1 = arith.constant 0 : i32
    %c0 = arith.constant 0 : index
    %c0_2 = arith.constant 0 : index
    %3 = vector.load %arg6[%c0, %c0_2] : memref<16x128xf32, #tpu.memory_space<vmem>>, vector<16x128xf32>
    %4 = arith.index_cast %c0_i32_1 : i32 to index
    %c0_3 = arith.constant 0 : index
    %c0_4 = arith.constant 0 : index
    %5 = vector.load %arg1[%4, %c0_3, %c0_4] : memref<4x16x256xf32, #tpu.memory_space<vmem>>, vector<1x16x256xf32>
    %6 = vector.shape_cast %5 : vector<1x16x256xf32> to vector<16x256xf32>
    %7 = arith.truncf %3 : vector<16x128xf32> to vector<16x128xbf16>
    %c0_5 = arith.constant 0 : index
    %c0_6 = arith.constant 0 : index
    %8 = vector.load %arg3[%c0_5, %c0_6] : memref<128x256xbf16, #tpu.memory_space<vmem>>, vector<128x256xbf16>
    %cst = arith.constant dense<0.000000e+00> : vector<16x256xf32>
    %9 = tpu.matmul %7, %8, %cst {dimension_numbers = #tpu.dot_dimension_numbers<[1], [0], [0], [1], [0, 0, 1, 1], [], []>} : vector<16x128xbf16>, vector<128x256xbf16>, vector<16x256xf32> -> vector<16x256xf32>
    %10 = arith.addf %6, %9 : vector<16x256xf32>
    %11 = vector.extract_strided_slice %10 {offsets = [0, 0], sizes = [16, 128], strides = [1, 1]} : vector<16x256xf32> to vector<16x128xf32>
    %cst_7 = arith.constant 5.000000e-01 : f32
    %12 = vector.broadcast %cst_7 : f32 to vector<16x128xf32>
    %13 = arith.mulf %12, %11 : vector<16x128xf32>
    %14 = math.tanh %13 : vector<16x128xf32>
    %cst_8 = arith.constant 1.000000e+00 : f32
    %15 = vector.broadcast %cst_8 : f32 to vector<16x128xf32>
    %16 = arith.addf %14, %15 : vector<16x128xf32>
    %cst_9 = arith.constant 5.000000e-01 : f32
    %17 = vector.broadcast %cst_9 : f32 to vector<16x128xf32>
    %18 = arith.mulf %17, %16 : vector<16x128xf32>
    %19 = vector.extract_strided_slice %10 {offsets = [0, 128], sizes = [16, 128], strides = [1, 1]} : vector<16x256xf32> to vector<16x128xf32>
    %20 = math.tanh %19 : vector<16x128xf32>
    %21 = arith.subf %20, %3 : vector<16x128xf32>
    %22 = arith.mulf %18, %21 : vector<16x128xf32>
    %23 = arith.addf %3, %22 : vector<16x128xf32>
    %24 = arith.truncf %23 : vector<16x128xf32> to vector<16x128xbf16>
    %c0_10 = arith.constant 0 : index
    %c0_11 = arith.constant 0 : index
    %25 = vector.load %arg4[%c0_10, %c0_11] : memref<128x2048xbf16, #tpu.memory_space<vmem>>, vector<128x256xbf16>
    %cst_12 = arith.constant dense<0.000000e+00> : vector<16x256xf32>
    %26 = tpu.matmul %24, %25, %cst_12 {dimension_numbers = #tpu.dot_dimension_numbers<[1], [0], [0], [1], [0, 0, 1, 1], [], []>} : vector<16x128xbf16>, vector<128x256xbf16>, vector<16x256xf32> -> vector<16x256xf32>
    %27 = vector.extract_strided_slice %26 {offsets = [0, 0], sizes = [16, 128], strides = [1, 1]} : vector<16x256xf32> to vector<16x128xf32>
    %cst_13 = arith.constant 5.000000e-01 : f32
    %28 = vector.broadcast %cst_13 : f32 to vector<16x128xf32>
    %29 = arith.mulf %28, %27 : vector<16x128xf32>
    %30 = math.tanh %29 : vector<16x128xf32>
    %cst_14 = arith.constant 1.000000e+00 : f32
    %31 = vector.broadcast %cst_14 : f32 to vector<16x128xf32>
    %32 = arith.addf %30, %31 : vector<16x128xf32>
    %cst_15 = arith.constant 5.000000e-01 : f32
    %33 = vector.broadcast %cst_15 : f32 to vector<16x128xf32>
    %34 = arith.mulf %33, %32 : vector<16x128xf32>
    %35 = vector.extract_strided_slice %26 {offsets = [0, 128], sizes = [16, 128], strides = [1, 1]} : vector<16x256xf32> to vector<16x128xf32>
    %36 = math.tanh %35 : vector<16x128xf32>
    %37 = arith.subf %36, %23 : vector<16x128xf32>
    %38 = arith.mulf %34, %37 : vector<16x128xf32>
    %39 = arith.addf %23, %38 : vector<16x128xf32>
    %40 = arith.truncf %39 : vector<16x128xf32> to vector<16x128xbf16>
    %c0_16 = arith.constant 0 : index
    %c256 = arith.constant 256 : index
    %41 = vector.load %arg4[%c0_16, %c256] : memref<128x2048xbf16, #tpu.memory_space<vmem>>, vector<128x512xbf16>
    %cst_17 = arith.constant dense<0.000000e+00> : vector<16x512xf32>
    %42 = tpu.matmul %40, %41, %cst_17 {dimension_numbers = #tpu.dot_dimension_numbers<[1], [0], [0], [1], [0, 0, 1, 1], [], []>} : vector<16x128xbf16>, vector<128x512xbf16>, vector<16x512xf32> -> vector<16x512xf32>
    %43 = vector.extract_strided_slice %42 {offsets = [0, 0], sizes = [16, 128], strides = [1, 1]} : vector<16x512xf32> to vector<16x128xf32>
    %cst_18 = arith.constant 5.000000e-01 : f32
    %44 = vector.broadcast %cst_18 : f32 to vector<16x128xf32>
    %45 = arith.mulf %44, %43 : vector<16x128xf32>
    %46 = math.tanh %45 : vector<16x128xf32>
    %cst_19 = arith.constant 1.000000e+00 : f32
    %47 = vector.broadcast %cst_19 : f32 to vector<16x128xf32>
    %48 = arith.addf %46, %47 : vector<16x128xf32>
    %cst_20 = arith.constant 5.000000e-01 : f32
    %49 = vector.broadcast %cst_20 : f32 to vector<16x128xf32>
    %50 = arith.mulf %49, %48 : vector<16x128xf32>
    %51 = vector.extract_strided_slice %42 {offsets = [0, 128], sizes = [16, 128], strides = [1, 1]} : vector<16x512xf32> to vector<16x128xf32>
    %cst_21 = arith.constant 0.000000e+00 : f32
    %52 = vector.broadcast %cst_21 : f32 to vector<16x128xf32>
    %53 = arith.maximumf %51, %52 : vector<16x128xf32>
    %54 = arith.subf %53, %39 : vector<16x128xf32>
    %55 = arith.mulf %50, %54 : vector<16x128xf32>
    %56 = arith.addf %39, %55 : vector<16x128xf32>
    %57 = vector.extract_strided_slice %42 {offsets = [0, 256], sizes = [16, 128], strides = [1, 1]} : vector<16x512xf32> to vector<16x128xf32>
    %cst_22 = arith.constant 5.000000e-01 : f32
    %58 = vector.broadcast %cst_22 : f32 to vector<16x128xf32>
    %59 = arith.mulf %58, %57 : vector<16x128xf32>
    %60 = math.tanh %59 : vector<16x128xf32>
    %cst_23 = arith.constant 1.000000e+00 : f32
    %61 = vector.broadcast %cst_23 : f32 to vector<16x128xf32>
    %62 = arith.addf %60, %61 : vector<16x128xf32>
    %cst_24 = arith.constant 5.000000e-01 : f32
    %63 = vector.broadcast %cst_24 : f32 to vector<16x128xf32>
    %64 = arith.mulf %63, %62 : vector<16x128xf32>
    %65 = vector.extract_strided_slice %42 {offsets = [0, 384], sizes = [16, 128], strides = [1, 1]} : vector<16x512xf32> to vector<16x128xf32>
    %cst_25 = arith.constant 5.000000e-01 : f32
    %66 = vector.broadcast %cst_25 : f32 to vector<16x128xf32>
    %67 = arith.mulf %66, %65 : vector<16x128xf32>
    %68 = math.tanh %67 : vector<16x128xf32>
    %cst_26 = arith.constant 1.000000e+00 : f32
    %69 = vector.broadcast %cst_26 : f32 to vector<16x128xf32>
    %70 = arith.addf %68, %69 : vector<16x128xf32>
    %cst_27 = arith.constant 5.000000e-01 : f32
    %71 = vector.broadcast %cst_27 : f32 to vector<16x128xf32>
    %72 = arith.mulf %71, %70 : vector<16x128xf32>
    %73 = arith.subf %72, %39 : vector<16x128xf32>
    %74 = arith.mulf %64, %73 : vector<16x128xf32>
    %75 = arith.addf %39, %74 : vector<16x128xf32>
    %76 = arith.truncf %56 : vector<16x128xf32> to vector<16x128xbf16>
    %c0_28 = arith.constant 0 : index
    %c768 = arith.constant 768 : index
    %77 = vector.load %arg4[%c0_28, %c768] : memref<128x2048xbf16, #tpu.memory_space<vmem>>, vector<128x512xbf16>
    %cst_29 = arith.constant dense<0.000000e+00> : vector<16x512xf32>
    %78 = tpu.matmul %76, %77, %cst_29 {dimension_numbers = #tpu.dot_dimension_numbers<[1], [0], [0], [1], [0, 0, 1, 1], [], []>} : vector<16x128xbf16>, vector<128x512xbf16>, vector<16x512xf32> -> vector<16x512xf32>
    %79 = vector.extract_strided_slice %78 {offsets = [0, 0], sizes = [16, 128], strides = [1, 1]} : vector<16x512xf32> to vector<16x128xf32>
    %cst_30 = arith.constant 5.000000e-01 : f32
    %80 = vector.broadcast %cst_30 : f32 to vector<16x128xf32>
    %81 = arith.mulf %80, %79 : vector<16x128xf32>
    %82 = math.tanh %81 : vector<16x128xf32>
    %cst_31 = arith.constant 1.000000e+00 : f32
    %83 = vector.broadcast %cst_31 : f32 to vector<16x128xf32>
    %84 = arith.addf %82, %83 : vector<16x128xf32>
    %cst_32 = arith.constant 5.000000e-01 : f32
    %85 = vector.broadcast %cst_32 : f32 to vector<16x128xf32>
    %86 = arith.mulf %85, %84 : vector<16x128xf32>
    %87 = vector.extract_strided_slice %78 {offsets = [0, 128], sizes = [16, 128], strides = [1, 1]} : vector<16x512xf32> to vector<16x128xf32>
    %88 = arith.subf %87, %56 : vector<16x128xf32>
    %89 = arith.mulf %86, %88 : vector<16x128xf32>
    %90 = arith.addf %56, %89 : vector<16x128xf32>
    %91 = vector.extract_strided_slice %78 {offsets = [0, 256], sizes = [16, 128], strides = [1, 1]} : vector<16x512xf32> to vector<16x128xf32>
    %cst_33 = arith.constant 5.000000e-01 : f32
    %92 = vector.broadcast %cst_33 : f32 to vector<16x128xf32>
    %93 = arith.mulf %92, %91 : vector<16x128xf32>
    %94 = math.tanh %93 : vector<16x128xf32>
    %cst_34 = arith.constant 1.000000e+00 : f32
    %95 = vector.broadcast %cst_34 : f32 to vector<16x128xf32>
    %96 = arith.addf %94, %95 : vector<16x128xf32>
    %cst_35 = arith.constant 5.000000e-01 : f32
    %97 = vector.broadcast %cst_35 : f32 to vector<16x128xf32>
    %98 = arith.mulf %97, %96 : vector<16x128xf32>
    %99 = vector.extract_strided_slice %78 {offsets = [0, 384], sizes = [16, 128], strides = [1, 1]} : vector<16x512xf32> to vector<16x128xf32>
    %cst_36 = arith.constant 5.000000e-01 : f32
    %100 = vector.broadcast %cst_36 : f32 to vector<16x128xf32>
    %101 = arith.mulf %100, %99 : vector<16x128xf32>
    %102 = math.tanh %101 : vector<16x128xf32>
    %cst_37 = arith.constant 1.000000e+00 : f32
    %103 = vector.broadcast %cst_37 : f32 to vector<16x128xf32>
    %104 = arith.addf %102, %103 : vector<16x128xf32>
    %cst_38 = arith.constant 5.000000e-01 : f32
    %105 = vector.broadcast %cst_38 : f32 to vector<16x128xf32>
    %106 = arith.mulf %105, %104 : vector<16x128xf32>
    %107 = arith.subf %106, %56 : vector<16x128xf32>
    %108 = arith.mulf %98, %107 : vector<16x128xf32>
    %109 = arith.addf %56, %108 : vector<16x128xf32>
    %110 = arith.truncf %75 : vector<16x128xf32> to vector<16x128xbf16>
    %c0_39 = arith.constant 0 : index
    %c1280 = arith.constant 1280 : index
    %111 = vector.load %arg4[%c0_39, %c1280] : memref<128x2048xbf16, #tpu.memory_space<vmem>>, vector<128x256xbf16>
    %cst_40 = arith.constant dense<0.000000e+00> : vector<16x256xf32>
    %112 = tpu.matmul %110, %111, %cst_40 {dimension_numbers = #tpu.dot_dimension_numbers<[1], [0], [0], [1], [0, 0, 1, 1], [], []>} : vector<16x128xbf16>, vector<128x256xbf16>, vector<16x256xf32> -> vector<16x256xf32>
    %113 = vector.extract_strided_slice %112 {offsets = [0, 0], sizes = [16, 128], strides = [1, 1]} : vector<16x256xf32> to vector<16x128xf32>
    %cst_41 = arith.constant 5.000000e-01 : f32
    %114 = vector.broadcast %cst_41 : f32 to vector<16x128xf32>
    %115 = arith.mulf %114, %113 : vector<16x128xf32>
    %116 = math.tanh %115 : vector<16x128xf32>
    %cst_42 = arith.constant 1.000000e+00 : f32
    %117 = vector.broadcast %cst_42 : f32 to vector<16x128xf32>
    %118 = arith.addf %116, %117 : vector<16x128xf32>
    %cst_43 = arith.constant 5.000000e-01 : f32
    %119 = vector.broadcast %cst_43 : f32 to vector<16x128xf32>
    %120 = arith.mulf %119, %118 : vector<16x128xf32>
    %121 = vector.extract_strided_slice %112 {offsets = [0, 128], sizes = [16, 128], strides = [1, 1]} : vector<16x256xf32> to vector<16x128xf32>
    %122 = math.tanh %121 : vector<16x128xf32>
    %123 = arith.subf %122, %75 : vector<16x128xf32>
    %124 = arith.mulf %120, %123 : vector<16x128xf32>
    %125 = arith.addf %75, %124 : vector<16x128xf32>
    %126 = arith.truncf %90 : vector<16x128xf32> to vector<16x128xbf16>
    %c0_44 = arith.constant 0 : index
    %c1536 = arith.constant 1536 : index
    %127 = vector.load %arg4[%c0_44, %c1536] : memref<128x2048xbf16, #tpu.memory_space<vmem>>, vector<128x256xbf16>
    %cst_45 = arith.constant dense<0.000000e+00> : vector<16x256xf32>
    %128 = tpu.matmul %126, %127, %cst_45 {dimension_numbers = #tpu.dot_dimension_numbers<[1], [0], [0], [1], [0, 0, 1, 1], [], []>} : vector<16x128xbf16>, vector<128x256xbf16>, vector<16x256xf32> -> vector<16x256xf32>
    %129 = vector.extract_strided_slice %128 {offsets = [0, 0], sizes = [16, 128], strides = [1, 1]} : vector<16x256xf32> to vector<16x128xf32>
    %cst_46 = arith.constant 5.000000e-01 : f32
    %130 = vector.broadcast %cst_46 : f32 to vector<16x128xf32>
    %131 = arith.mulf %130, %129 : vector<16x128xf32>
    %132 = math.tanh %131 : vector<16x128xf32>
    %cst_47 = arith.constant 1.000000e+00 : f32
    %133 = vector.broadcast %cst_47 : f32 to vector<16x128xf32>
    %134 = arith.addf %132, %133 : vector<16x128xf32>
    %cst_48 = arith.constant 5.000000e-01 : f32
    %135 = vector.broadcast %cst_48 : f32 to vector<16x128xf32>
    %136 = arith.mulf %135, %134 : vector<16x128xf32>
    %137 = vector.extract_strided_slice %128 {offsets = [0, 128], sizes = [16, 128], strides = [1, 1]} : vector<16x256xf32> to vector<16x128xf32>
    %cst_49 = arith.constant 0.000000e+00 : f32
    %138 = vector.broadcast %cst_49 : f32 to vector<16x128xf32>
    %139 = arith.maximumf %137, %138 : vector<16x128xf32>
    %140 = arith.subf %139, %90 : vector<16x128xf32>
    %141 = arith.mulf %136, %140 : vector<16x128xf32>
    %142 = arith.addf %90, %141 : vector<16x128xf32>
    %143 = arith.truncf %125 : vector<16x128xf32> to vector<16x128xbf16>
    %c0_50 = arith.constant 0 : index
    %c1792 = arith.constant 1792 : index
    %144 = vector.load %arg4[%c0_50, %c1792] : memref<128x2048xbf16, #tpu.memory_space<vmem>>, vector<128x256xbf16>
    %cst_51 = arith.constant dense<0.000000e+00> : vector<16x256xf32>
    %145 = tpu.matmul %143, %144, %cst_51 {dimension_numbers = #tpu.dot_dimension_numbers<[1], [0], [0], [1], [0, 0, 1, 1], [], []>} : vector<16x128xbf16>, vector<128x256xbf16>, vector<16x256xf32> -> vector<16x256xf32>
    %146 = vector.extract_strided_slice %145 {offsets = [0, 0], sizes = [16, 128], strides = [1, 1]} : vector<16x256xf32> to vector<16x128xf32>
    %cst_52 = arith.constant 5.000000e-01 : f32
    %147 = vector.broadcast %cst_52 : f32 to vector<16x128xf32>
    %148 = arith.mulf %147, %146 : vector<16x128xf32>
    %149 = math.tanh %148 : vector<16x128xf32>
    %cst_53 = arith.constant 1.000000e+00 : f32
    %150 = vector.broadcast %cst_53 : f32 to vector<16x128xf32>
    %151 = arith.addf %149, %150 : vector<16x128xf32>
    %cst_54 = arith.constant 5.000000e-01 : f32
    %152 = vector.broadcast %cst_54 : f32 to vector<16x128xf32>
    %153 = arith.mulf %152, %151 : vector<16x128xf32>
    %154 = vector.extract_strided_slice %145 {offsets = [0, 128], sizes = [16, 128], strides = [1, 1]} : vector<16x256xf32> to vector<16x128xf32>
    %155 = arith.subf %154, %125 : vector<16x128xf32>
    %156 = arith.mulf %153, %155 : vector<16x128xf32>
    %157 = arith.addf %125, %156 : vector<16x128xf32>
    %158 = arith.addf %39, %56 : vector<16x128xf32>
    %159 = arith.addf %158, %75 : vector<16x128xf32>
    %160 = arith.addf %159, %90 : vector<16x128xf32>
    %161 = arith.addf %160, %125 : vector<16x128xf32>
    %162 = arith.addf %161, %142 : vector<16x128xf32>
    %163 = arith.addf %162, %109 : vector<16x128xf32>
    %164 = arith.addf %163, %157 : vector<16x128xf32>
    %cst_55 = arith.constant 1.250000e-01 : f32
    %165 = vector.broadcast %cst_55 : f32 to vector<16x128xf32>
    %166 = arith.mulf %164, %165 : vector<16x128xf32>
    %c0_56 = arith.constant 0 : index
    %c0_57 = arith.constant 0 : index
    %167 = vector.load %arg6[%c0_56, %c0_57] : memref<16x128xf32, #tpu.memory_space<vmem>>, vector<16x128xf32>
    tpu.vector_store %arg6[%c0_56, %c0_57], %166 {strides = array<i32>} : memref<16x128xf32, #tpu.memory_space<vmem>>, vector<16x128xf32>,
    %168 = arith.index_cast %c0_i32_1 : i32 to index
    %c0_58 = arith.constant 0 : index
    %c0_59 = arith.constant 0 : index
    %169 = vector.load %arg5[%168, %c0_58, %c0_59] : memref<4x16x128xf32, #tpu.memory_space<vmem>>, vector<1x16x128xf32>
    %170 = vector.shape_cast %169 : vector<1x16x128xf32> to vector<16x128xf32>
    %171 = vector.shape_cast %166 : vector<16x128xf32> to vector<1x16x128xf32>
    tpu.vector_store %arg5[%168, %c0_58, %c0_59], %171 {strides = array<i32>} : memref<4x16x128xf32, #tpu.memory_space<vmem>>, vector<1x16x128xf32>,
    %c1_i32 = arith.constant 1 : i32
    %c0_60 = arith.constant 0 : index
    %c0_61 = arith.constant 0 : index
    %172 = vector.load %arg6[%c0_60, %c0_61] : memref<16x128xf32, #tpu.memory_space<vmem>>, vector<16x128xf32>
    %173 = arith.index_cast %c1_i32 : i32 to index
    %c0_62 = arith.constant 0 : index
    %c0_63 = arith.constant 0 : index
    %174 = vector.load %arg1[%173, %c0_62, %c0_63] : memref<4x16x256xf32, #tpu.memory_space<vmem>>, vector<1x16x256xf32>
    %175 = vector.shape_cast %174 : vector<1x16x256xf32> to vector<16x256xf32>
    %176 = arith.truncf %172 : vector<16x128xf32> to vector<16x128xbf16>
    %c0_64 = arith.constant 0 : index
    %c0_65 = arith.constant 0 : index
    %177 = vector.load %arg3[%c0_64, %c0_65] : memref<128x256xbf16, #tpu.memory_space<vmem>>, vector<128x256xbf16>
    %cst_66 = arith.constant dense<0.000000e+00> : vector<16x256xf32>
    %178 = tpu.matmul %176, %177, %cst_66 {dimension_numbers = #tpu.dot_dimension_numbers<[1], [0], [0], [1], [0, 0, 1, 1], [], []>} : vector<16x128xbf16>, vector<128x256xbf16>, vector<16x256xf32> -> vector<16x256xf32>
    %179 = arith.addf %175, %178 : vector<16x256xf32>
    %180 = vector.extract_strided_slice %179 {offsets = [0, 0], sizes = [16, 128], strides = [1, 1]} : vector<16x256xf32> to vector<16x128xf32>
    %cst_67 = arith.constant 5.000000e-01 : f32
    %181 = vector.broadcast %cst_67 : f32 to vector<16x128xf32>
    %182 = arith.mulf %181, %180 : vector<16x128xf32>
    %183 = math.tanh %182 : vector<16x128xf32>
    %cst_68 = arith.constant 1.000000e+00 : f32
    %184 = vector.broadcast %cst_68 : f32 to vector<16x128xf32>
    %185 = arith.addf %183, %184 : vector<16x128xf32>
    %cst_69 = arith.constant 5.000000e-01 : f32
    %186 = vector.broadcast %cst_69 : f32 to vector<16x128xf32>
    %187 = arith.mulf %186, %185 : vector<16x128xf32>
    %188 = vector.extract_strided_slice %179 {offsets = [0, 128], sizes = [16, 128], strides = [1, 1]} : vector<16x256xf32> to vector<16x128xf32>
    %189 = math.tanh %188 : vector<16x128xf32>
    %190 = arith.subf %189, %172 : vector<16x128xf32>
    %191 = arith.mulf %187, %190 : vector<16x128xf32>
    %192 = arith.addf %172, %191 : vector<16x128xf32>
    %193 = arith.truncf %192 : vector<16x128xf32> to vector<16x128xbf16>
    %c0_70 = arith.constant 0 : index
    %c0_71 = arith.constant 0 : index
    %194 = vector.load %arg4[%c0_70, %c0_71] : memref<128x2048xbf16, #tpu.memory_space<vmem>>, vector<128x256xbf16>
    %cst_72 = arith.constant dense<0.000000e+00> : vector<16x256xf32>
    %195 = tpu.matmul %193, %194, %cst_72 {dimension_numbers = #tpu.dot_dimension_numbers<[1], [0], [0], [1], [0, 0, 1, 1], [], []>} : vector<16x128xbf16>, vector<128x256xbf16>, vector<16x256xf32> -> vector<16x256xf32>
    %196 = vector.extract_strided_slice %195 {offsets = [0, 0], sizes = [16, 128], strides = [1, 1]} : vector<16x256xf32> to vector<16x128xf32>
    %cst_73 = arith.constant 5.000000e-01 : f32
    %197 = vector.broadcast %cst_73 : f32 to vector<16x128xf32>
    %198 = arith.mulf %197, %196 : vector<16x128xf32>
    %199 = math.tanh %198 : vector<16x128xf32>
    %cst_74 = arith.constant 1.000000e+00 : f32
    %200 = vector.broadcast %cst_74 : f32 to vector<16x128xf32>
    %201 = arith.addf %199, %200 : vector<16x128xf32>
    %cst_75 = arith.constant 5.000000e-01 : f32
    %202 = vector.broadcast %cst_75 : f32 to vector<16x128xf32>
    %203 = arith.mulf %202, %201 : vector<16x128xf32>
    %204 = vector.extract_strided_slice %195 {offsets = [0, 128], sizes = [16, 128], strides = [1, 1]} : vector<16x256xf32> to vector<16x128xf32>
    %205 = math.tanh %204 : vector<16x128xf32>
    %206 = arith.subf %205, %192 : vector<16x128xf32>
    %207 = arith.mulf %203, %206 : vector<16x128xf32>
    %208 = arith.addf %192, %207 : vector<16x128xf32>
    %209 = arith.truncf %208 : vector<16x128xf32> to vector<16x128xbf16>
    %c0_76 = arith.constant 0 : index
    %c256_77 = arith.constant 256 : index
    %210 = vector.load %arg4[%c0_76, %c256_77] : memref<128x2048xbf16, #tpu.memory_space<vmem>>, vector<128x512xbf16>
    %cst_78 = arith.constant dense<0.000000e+00> : vector<16x512xf32>
    %211 = tpu.matmul %209, %210, %cst_78 {dimension_numbers = #tpu.dot_dimension_numbers<[1], [0], [0], [1], [0, 0, 1, 1], [], []>} : vector<16x128xbf16>, vector<128x512xbf16>, vector<16x512xf32> -> vector<16x512xf32>
    %212 = vector.extract_strided_slice %211 {offsets = [0, 0], sizes = [16, 128], strides = [1, 1]} : vector<16x512xf32> to vector<16x128xf32>
    %cst_79 = arith.constant 5.000000e-01 : f32
    %213 = vector.broadcast %cst_79 : f32 to vector<16x128xf32>
    %214 = arith.mulf %213, %212 : vector<16x128xf32>
    %215 = math.tanh %214 : vector<16x128xf32>
    %cst_80 = arith.constant 1.000000e+00 : f32
    %216 = vector.broadcast %cst_80 : f32 to vector<16x128xf32>
    %217 = arith.addf %215, %216 : vector<16x128xf32>
    %cst_81 = arith.constant 5.000000e-01 : f32
    %218 = vector.broadcast %cst_81 : f32 to vector<16x128xf32>
    %219 = arith.mulf %218, %217 : vector<16x128xf32>
    %220 = vector.extract_strided_slice %211 {offsets = [0, 128], sizes = [16, 128], strides = [1, 1]} : vector<16x512xf32> to vector<16x128xf32>
    %cst_82 = arith.constant 0.000000e+00 : f32
    %221 = vector.broadcast %cst_82 : f32 to vector<16x128xf32>
    %222 = arith.maximumf %220, %221 : vector<16x128xf32>
    %223 = arith.subf %222, %208 : vector<16x128xf32>
    %224 = arith.mulf %219, %223 : vector<16x128xf32>
    %225 = arith.addf %208, %224 : vector<16x128xf32>
    %226 = vector.extract_strided_slice %211 {offsets = [0, 256], sizes = [16, 128], strides = [1, 1]} : vector<16x512xf32> to vector<16x128xf32>
    %cst_83 = arith.constant 5.000000e-01 : f32
    %227 = vector.broadcast %cst_83 : f32 to vector<16x128xf32>
    %228 = arith.mulf %227, %226 : vector<16x128xf32>
    %229 = math.tanh %228 : vector<16x128xf32>
    %cst_84 = arith.constant 1.000000e+00 : f32
    %230 = vector.broadcast %cst_84 : f32 to vector<16x128xf32>
    %231 = arith.addf %229, %230 : vector<16x128xf32>
    %cst_85 = arith.constant 5.000000e-01 : f32
    %232 = vector.broadcast %cst_85 : f32 to vector<16x128xf32>
    %233 = arith.mulf %232, %231 : vector<16x128xf32>
    %234 = vector.extract_strided_slice %211 {offsets = [0, 384], sizes = [16, 128], strides = [1, 1]} : vector<16x512xf32> to vector<16x128xf32>
    %cst_86 = arith.constant 5.000000e-01 : f32
    %235 = vector.broadcast %cst_86 : f32 to vector<16x128xf32>
    %236 = arith.mulf %235, %234 : vector<16x128xf32>
    %237 = math.tanh %236 : vector<16x128xf32>
    %cst_87 = arith.constant 1.000000e+00 : f32
    %238 = vector.broadcast %cst_87 : f32 to vector<16x128xf32>
    %239 = arith.addf %237, %238 : vector<16x128xf32>
    %cst_88 = arith.constant 5.000000e-01 : f32
    %240 = vector.broadcast %cst_88 : f32 to vector<16x128xf32>
    %241 = arith.mulf %240, %239 : vector<16x128xf32>
    %242 = arith.subf %241, %208 : vector<16x128xf32>
    %243 = arith.mulf %233, %242 : vector<16x128xf32>
    %244 = arith.addf %208, %243 : vector<16x128xf32>
    %245 = arith.truncf %225 : vector<16x128xf32> to vector<16x128xbf16>
    %c0_89 = arith.constant 0 : index
    %c768_90 = arith.constant 768 : index
    %246 = vector.load %arg4[%c0_89, %c768_90] : memref<128x2048xbf16, #tpu.memory_space<vmem>>, vector<128x512xbf16>
    %cst_91 = arith.constant dense<0.000000e+00> : vector<16x512xf32>
    %247 = tpu.matmul %245, %246, %cst_91 {dimension_numbers = #tpu.dot_dimension_numbers<[1], [0], [0], [1], [0, 0, 1, 1], [], []>} : vector<16x128xbf16>, vector<128x512xbf16>, vector<16x512xf32> -> vector<16x512xf32>
    %248 = vector.extract_strided_slice %247 {offsets = [0, 0], sizes = [16, 128], strides = [1, 1]} : vector<16x512xf32> to vector<16x128xf32>
    %cst_92 = arith.constant 5.000000e-01 : f32
    %249 = vector.broadcast %cst_92 : f32 to vector<16x128xf32>
    %250 = arith.mulf %249, %248 : vector<16x128xf32>
    %251 = math.tanh %250 : vector<16x128xf32>
    %cst_93 = arith.constant 1.000000e+00 : f32
    %252 = vector.broadcast %cst_93 : f32 to vector<16x128xf32>
    %253 = arith.addf %251, %252 : vector<16x128xf32>
    %cst_94 = arith.constant 5.000000e-01 : f32
    %254 = vector.broadcast %cst_94 : f32 to vector<16x128xf32>
    %255 = arith.mulf %254, %253 : vector<16x128xf32>
    %256 = vector.extract_strided_slice %247 {offsets = [0, 128], sizes = [16, 128], strides = [1, 1]} : vector<16x512xf32> to vector<16x128xf32>
    %257 = arith.subf %256, %225 : vector<16x128xf32>
    %258 = arith.mulf %255, %257 : vector<16x128xf32>
    %259 = arith.addf %225, %258 : vector<16x128xf32>
    %260 = vector.extract_strided_slice %247 {offsets = [0, 256], sizes = [16, 128], strides = [1, 1]} : vector<16x512xf32> to vector<16x128xf32>
    %cst_95 = arith.constant 5.000000e-01 : f32
    %261 = vector.broadcast %cst_95 : f32 to vector<16x128xf32>
    %262 = arith.mulf %261, %260 : vector<16x128xf32>
    %263 = math.tanh %262 : vector<16x128xf32>
    %cst_96 = arith.constant 1.000000e+00 : f32
    %264 = vector.broadcast %cst_96 : f32 to vector<16x128xf32>
    %265 = arith.addf %263, %264 : vector<16x128xf32>
    %cst_97 = arith.constant 5.000000e-01 : f32
    %266 = vector.broadcast %cst_97 : f32 to vector<16x128xf32>
    %267 = arith.mulf %266, %265 : vector<16x128xf32>
    %268 = vector.extract_strided_slice %247 {offsets = [0, 384], sizes = [16, 128], strides = [1, 1]} : vector<16x512xf32> to vector<16x128xf32>
    %cst_98 = arith.constant 5.000000e-01 : f32
    %269 = vector.broadcast %cst_98 : f32 to vector<16x128xf32>
    %270 = arith.mulf %269, %268 : vector<16x128xf32>
    %271 = math.tanh %270 : vector<16x128xf32>
    %cst_99 = arith.constant 1.000000e+00 : f32
    %272 = vector.broadcast %cst_99 : f32 to vector<16x128xf32>
    %273 = arith.addf %271, %272 : vector<16x128xf32>
    %cst_100 = arith.constant 5.000000e-01 : f32
    %274 = vector.broadcast %cst_100 : f32 to vector<16x128xf32>
    %275 = arith.mulf %274, %273 : vector<16x128xf32>
    %276 = arith.subf %275, %225 : vector<16x128xf32>
    %277 = arith.mulf %267, %276 : vector<16x128xf32>
    %278 = arith.addf %225, %277 : vector<16x128xf32>
    %279 = arith.truncf %244 : vector<16x128xf32> to vector<16x128xbf16>
    %c0_101 = arith.constant 0 : index
    %c1280_102 = arith.constant 1280 : index
    %280 = vector.load %arg4[%c0_101, %c1280_102] : memref<128x2048xbf16, #tpu.memory_space<vmem>>, vector<128x256xbf16>
    %cst_103 = arith.constant dense<0.000000e+00> : vector<16x256xf32>
    %281 = tpu.matmul %279, %280, %cst_103 {dimension_numbers = #tpu.dot_dimension_numbers<[1], [0], [0], [1], [0, 0, 1, 1], [], []>} : vector<16x128xbf16>, vector<128x256xbf16>, vector<16x256xf32> -> vector<16x256xf32>
    %282 = vector.extract_strided_slice %281 {offsets = [0, 0], sizes = [16, 128], strides = [1, 1]} : vector<16x256xf32> to vector<16x128xf32>
    %cst_104 = arith.constant 5.000000e-01 : f32
    %283 = vector.broadcast %cst_104 : f32 to vector<16x128xf32>
    %284 = arith.mulf %283, %282 : vector<16x128xf32>
    %285 = math.tanh %284 : vector<16x128xf32>
    %cst_105 = arith.constant 1.000000e+00 : f32
    %286 = vector.broadcast %cst_105 : f32 to vector<16x128xf32>
    %287 = arith.addf %285, %286 : vector<16x128xf32>
    %cst_106 = arith.constant 5.000000e-01 : f32
    %288 = vector.broadcast %cst_106 : f32 to vector<16x128xf32>
    %289 = arith.mulf %288, %287 : vector<16x128xf32>
    %290 = vector.extract_strided_slice %281 {offsets = [0, 128], sizes = [16, 128], strides = [1, 1]} : vector<16x256xf32> to vector<16x128xf32>
    %291 = math.tanh %290 : vector<16x128xf32>
    %292 = arith.subf %291, %244 : vector<16x128xf32>
    %293 = arith.mulf %289, %292 : vector<16x128xf32>
    %294 = arith.addf %244, %293 : vector<16x128xf32>
    %295 = arith.truncf %259 : vector<16x128xf32> to vector<16x128xbf16>
    %c0_107 = arith.constant 0 : index
    %c1536_108 = arith.constant 1536 : index
    %296 = vector.load %arg4[%c0_107, %c1536_108] : memref<128x2048xbf16, #tpu.memory_space<vmem>>, vector<128x256xbf16>
    %cst_109 = arith.constant dense<0.000000e+00> : vector<16x256xf32>
    %297 = tpu.matmul %295, %296, %cst_109 {dimension_numbers = #tpu.dot_dimension_numbers<[1], [0], [0], [1], [0, 0, 1, 1], [], []>} : vector<16x128xbf16>, vector<128x256xbf16>, vector<16x256xf32> -> vector<16x256xf32>
    %298 = vector.extract_strided_slice %297 {offsets = [0, 0], sizes = [16, 128], strides = [1, 1]} : vector<16x256xf32> to vector<16x128xf32>
    %cst_110 = arith.constant 5.000000e-01 : f32
    %299 = vector.broadcast %cst_110 : f32 to vector<16x128xf32>
    %300 = arith.mulf %299, %298 : vector<16x128xf32>
    %301 = math.tanh %300 : vector<16x128xf32>
    %cst_111 = arith.constant 1.000000e+00 : f32
    %302 = vector.broadcast %cst_111 : f32 to vector<16x128xf32>
    %303 = arith.addf %301, %302 : vector<16x128xf32>
    %cst_112 = arith.constant 5.000000e-01 : f32
    %304 = vector.broadcast %cst_112 : f32 to vector<16x128xf32>
    %305 = arith.mulf %304, %303 : vector<16x128xf32>
    %306 = vector.extract_strided_slice %297 {offsets = [0, 128], sizes = [16, 128], strides = [1, 1]} : vector<16x256xf32> to vector<16x128xf32>
    %cst_113 = arith.constant 0.000000e+00 : f32
    %307 = vector.broadcast %cst_113 : f32 to vector<16x128xf32>
    %308 = arith.maximumf %306, %307 : vector<16x128xf32>
    %309 = arith.subf %308, %259 : vector<16x128xf32>
    %310 = arith.mulf %305, %309 : vector<16x128xf32>
    %311 = arith.addf %259, %310 : vector<16x128xf32>
    %312 = arith.truncf %294 : vector<16x128xf32> to vector<16x128xbf16>
    %c0_114 = arith.constant 0 : index
    %c1792_115 = arith.constant 1792 : index
    %313 = vector.load %arg4[%c0_114, %c1792_115] : memref<128x2048xbf16, #tpu.memory_space<vmem>>, vector<128x256xbf16>
    %cst_116 = arith.constant dense<0.000000e+00> : vector<16x256xf32>
    %314 = tpu.matmul %312, %313, %cst_116 {dimension_numbers = #tpu.dot_dimension_numbers<[1], [0], [0], [1], [0, 0, 1, 1], [], []>} : vector<16x128xbf16>, vector<128x256xbf16>, vector<16x256xf32> -> vector<16x256xf32>
    %315 = vector.extract_strided_slice %314 {offsets = [0, 0], sizes = [16, 128], strides = [1, 1]} : vector<16x256xf32> to vector<16x128xf32>
    %cst_117 = arith.constant 5.000000e-01 : f32
    %316 = vector.broadcast %cst_117 : f32 to vector<16x128xf32>
    %317 = arith.mulf %316, %315 : vector<16x128xf32>
    %318 = math.tanh %317 : vector<16x128xf32>
    %cst_118 = arith.constant 1.000000e+00 : f32
    %319 = vector.broadcast %cst_118 : f32 to vector<16x128xf32>
    %320 = arith.addf %318, %319 : vector<16x128xf32>
    %cst_119 = arith.constant 5.000000e-01 : f32
    %321 = vector.broadcast %cst_119 : f32 to vector<16x128xf32>
    %322 = arith.mulf %321, %320 : vector<16x128xf32>
    %323 = vector.extract_strided_slice %314 {offsets = [0, 128], sizes = [16, 128], strides = [1, 1]} : vector<16x256xf32> to vector<16x128xf32>
    %324 = arith.subf %323, %294 : vector<16x128xf32>
    %325 = arith.mulf %322, %324 : vector<16x128xf32>
    %326 = arith.addf %294, %325 : vector<16x128xf32>
    %327 = arith.addf %208, %225 : vector<16x128xf32>
    %328 = arith.addf %327, %244 : vector<16x128xf32>
    %329 = arith.addf %328, %259 : vector<16x128xf32>
    %330 = arith.addf %329, %294 : vector<16x128xf32>
    %331 = arith.addf %330, %311 : vector<16x128xf32>
    %332 = arith.addf %331, %278 : vector<16x128xf32>
    %333 = arith.addf %332, %326 : vector<16x128xf32>
    %cst_120 = arith.constant 1.250000e-01 : f32
    %334 = vector.broadcast %cst_120 : f32 to vector<16x128xf32>
    %335 = arith.mulf %333, %334 : vector<16x128xf32>
    %c0_121 = arith.constant 0 : index
    %c0_122 = arith.constant 0 : index
    %336 = vector.load %arg6[%c0_121, %c0_122] : memref<16x128xf32, #tpu.memory_space<vmem>>, vector<16x128xf32>
    tpu.vector_store %arg6[%c0_121, %c0_122], %335 {strides = array<i32>} : memref<16x128xf32, #tpu.memory_space<vmem>>, vector<16x128xf32>,
    %337 = arith.index_cast %c1_i32 : i32 to index
    %c0_123 = arith.constant 0 : index
    %c0_124 = arith.constant 0 : index
    %338 = vector.load %arg5[%337, %c0_123, %c0_124] : memref<4x16x128xf32, #tpu.memory_space<vmem>>, vector<1x16x128xf32>
    %339 = vector.shape_cast %338 : vector<1x16x128xf32> to vector<16x128xf32>
    %340 = vector.shape_cast %335 : vector<16x128xf32> to vector<1x16x128xf32>
    tpu.vector_store %arg5[%337, %c0_123, %c0_124], %340 {strides = array<i32>} : memref<4x16x128xf32, #tpu.memory_space<vmem>>, vector<1x16x128xf32>,
    %c2_i32 = arith.constant 2 : i32
    %c0_125 = arith.constant 0 : index
    %c0_126 = arith.constant 0 : index
    %341 = vector.load %arg6[%c0_125, %c0_126] : memref<16x128xf32, #tpu.memory_space<vmem>>, vector<16x128xf32>
    %342 = arith.index_cast %c2_i32 : i32 to index
    %c0_127 = arith.constant 0 : index
    %c0_128 = arith.constant 0 : index
    %343 = vector.load %arg1[%342, %c0_127, %c0_128] : memref<4x16x256xf32, #tpu.memory_space<vmem>>, vector<1x16x256xf32>
    %344 = vector.shape_cast %343 : vector<1x16x256xf32> to vector<16x256xf32>
    %345 = arith.truncf %341 : vector<16x128xf32> to vector<16x128xbf16>
    %c0_129 = arith.constant 0 : index
    %c0_130 = arith.constant 0 : index
    %346 = vector.load %arg3[%c0_129, %c0_130] : memref<128x256xbf16, #tpu.memory_space<vmem>>, vector<128x256xbf16>
    %cst_131 = arith.constant dense<0.000000e+00> : vector<16x256xf32>
    %347 = tpu.matmul %345, %346, %cst_131 {dimension_numbers = #tpu.dot_dimension_numbers<[1], [0], [0], [1], [0, 0, 1, 1], [], []>} : vector<16x128xbf16>, vector<128x256xbf16>, vector<16x256xf32> -> vector<16x256xf32>
    %348 = arith.addf %344, %347 : vector<16x256xf32>
    %349 = vector.extract_strided_slice %348 {offsets = [0, 0], sizes = [16, 128], strides = [1, 1]} : vector<16x256xf32> to vector<16x128xf32>
    %cst_132 = arith.constant 5.000000e-01 : f32
    %350 = vector.broadcast %cst_132 : f32 to vector<16x128xf32>
    %351 = arith.mulf %350, %349 : vector<16x128xf32>
    %352 = math.tanh %351 : vector<16x128xf32>
    %cst_133 = arith.constant 1.000000e+00 : f32
    %353 = vector.broadcast %cst_133 : f32 to vector<16x128xf32>
    %354 = arith.addf %352, %353 : vector<16x128xf32>
    %cst_134 = arith.constant 5.000000e-01 : f32
    %355 = vector.broadcast %cst_134 : f32 to vector<16x128xf32>
    %356 = arith.mulf %355, %354 : vector<16x128xf32>
    %357 = vector.extract_strided_slice %348 {offsets = [0, 128], sizes = [16, 128], strides = [1, 1]} : vector<16x256xf32> to vector<16x128xf32>
    %358 = math.tanh %357 : vector<16x128xf32>
    %359 = arith.subf %358, %341 : vector<16x128xf32>
    %360 = arith.mulf %356, %359 : vector<16x128xf32>
    %361 = arith.addf %341, %360 : vector<16x128xf32>
    %362 = arith.truncf %361 : vector<16x128xf32> to vector<16x128xbf16>
    %c0_135 = arith.constant 0 : index
    %c0_136 = arith.constant 0 : index
    %363 = vector.load %arg4[%c0_135, %c0_136] : memref<128x2048xbf16, #tpu.memory_space<vmem>>, vector<128x256xbf16>
    %cst_137 = arith.constant dense<0.000000e+00> : vector<16x256xf32>
    %364 = tpu.matmul %362, %363, %cst_137 {dimension_numbers = #tpu.dot_dimension_numbers<[1], [0], [0], [1], [0, 0, 1, 1], [], []>} : vector<16x128xbf16>, vector<128x256xbf16>, vector<16x256xf32> -> vector<16x256xf32>
    %365 = vector.extract_strided_slice %364 {offsets = [0, 0], sizes = [16, 128], strides = [1, 1]} : vector<16x256xf32> to vector<16x128xf32>
    %cst_138 = arith.constant 5.000000e-01 : f32
    %366 = vector.broadcast %cst_138 : f32 to vector<16x128xf32>
    %367 = arith.mulf %366, %365 : vector<16x128xf32>
    %368 = math.tanh %367 : vector<16x128xf32>
    %cst_139 = arith.constant 1.000000e+00 : f32
    %369 = vector.broadcast %cst_139 : f32 to vector<16x128xf32>
    %370 = arith.addf %368, %369 : vector<16x128xf32>
    %cst_140 = arith.constant 5.000000e-01 : f32
    %371 = vector.broadcast %cst_140 : f32 to vector<16x128xf32>
    %372 = arith.mulf %371, %370 : vector<16x128xf32>
    %373 = vector.extract_strided_slice %364 {offsets = [0, 128], sizes = [16, 128], strides = [1, 1]} : vector<16x256xf32> to vector<16x128xf32>
    %374 = math.tanh %373 : vector<16x128xf32>
    %375 = arith.subf %374, %361 : vector<16x128xf32>
    %376 = arith.mulf %372, %375 : vector<16x128xf32>
    %377 = arith.addf %361, %376 : vector<16x128xf32>
    %378 = arith.truncf %377 : vector<16x128xf32> to vector<16x128xbf16>
    %c0_141 = arith.constant 0 : index
    %c256_142 = arith.constant 256 : index
    %379 = vector.load %arg4[%c0_141, %c256_142] : memref<128x2048xbf16, #tpu.memory_space<vmem>>, vector<128x512xbf16>
    %cst_143 = arith.constant dense<0.000000e+00> : vector<16x512xf32>
    %380 = tpu.matmul %378, %379, %cst_143 {dimension_numbers = #tpu.dot_dimension_numbers<[1], [0], [0], [1], [0, 0, 1, 1], [], []>} : vector<16x128xbf16>, vector<128x512xbf16>, vector<16x512xf32> -> vector<16x512xf32>
    %381 = vector.extract_strided_slice %380 {offsets = [0, 0], sizes = [16, 128], strides = [1, 1]} : vector<16x512xf32> to vector<16x128xf32>
    %cst_144 = arith.constant 5.000000e-01 : f32
    %382 = vector.broadcast %cst_144 : f32 to vector<16x128xf32>
    %383 = arith.mulf %382, %381 : vector<16x128xf32>
    %384 = math.tanh %383 : vector<16x128xf32>
    %cst_145 = arith.constant 1.000000e+00 : f32
    %385 = vector.broadcast %cst_145 : f32 to vector<16x128xf32>
    %386 = arith.addf %384, %385 : vector<16x128xf32>
    %cst_146 = arith.constant 5.000000e-01 : f32
    %387 = vector.broadcast %cst_146 : f32 to vector<16x128xf32>
    %388 = arith.mulf %387, %386 : vector<16x128xf32>
    %389 = vector.extract_strided_slice %380 {offsets = [0, 128], sizes = [16, 128], strides = [1, 1]} : vector<16x512xf32> to vector<16x128xf32>
    %cst_147 = arith.constant 0.000000e+00 : f32
    %390 = vector.broadcast %cst_147 : f32 to vector<16x128xf32>
    %391 = arith.maximumf %389, %390 : vector<16x128xf32>
    %392 = arith.subf %391, %377 : vector<16x128xf32>
    %393 = arith.mulf %388, %392 : vector<16x128xf32>
    %394 = arith.addf %377, %393 : vector<16x128xf32>
    %395 = vector.extract_strided_slice %380 {offsets = [0, 256], sizes = [16, 128], strides = [1, 1]} : vector<16x512xf32> to vector<16x128xf32>
    %cst_148 = arith.constant 5.000000e-01 : f32
    %396 = vector.broadcast %cst_148 : f32 to vector<16x128xf32>
    %397 = arith.mulf %396, %395 : vector<16x128xf32>
    %398 = math.tanh %397 : vector<16x128xf32>
    %cst_149 = arith.constant 1.000000e+00 : f32
    %399 = vector.broadcast %cst_149 : f32 to vector<16x128xf32>
    %400 = arith.addf %398, %399 : vector<16x128xf32>
    %cst_150 = arith.constant 5.000000e-01 : f32
    %401 = vector.broadcast %cst_150 : f32 to vector<16x128xf32>
    %402 = arith.mulf %401, %400 : vector<16x128xf32>
    %403 = vector.extract_strided_slice %380 {offsets = [0, 384], sizes = [16, 128], strides = [1, 1]} : vector<16x512xf32> to vector<16x128xf32>
    %cst_151 = arith.constant 5.000000e-01 : f32
    %404 = vector.broadcast %cst_151 : f32 to vector<16x128xf32>
    %405 = arith.mulf %404, %403 : vector<16x128xf32>
    %406 = math.tanh %405 : vector<16x128xf32>
    %cst_152 = arith.constant 1.000000e+00 : f32
    %407 = vector.broadcast %cst_152 : f32 to vector<16x128xf32>
    %408 = arith.addf %406, %407 : vector<16x128xf32>
    %cst_153 = arith.constant 5.000000e-01 : f32
    %409 = vector.broadcast %cst_153 : f32 to vector<16x128xf32>
    %410 = arith.mulf %409, %408 : vector<16x128xf32>
    %411 = arith.subf %410, %377 : vector<16x128xf32>
    %412 = arith.mulf %402, %411 : vector<16x128xf32>
    %413 = arith.addf %377, %412 : vector<16x128xf32>
    %414 = arith.truncf %394 : vector<16x128xf32> to vector<16x128xbf16>
    %c0_154 = arith.constant 0 : index
    %c768_155 = arith.constant 768 : index
    %415 = vector.load %arg4[%c0_154, %c768_155] : memref<128x2048xbf16, #tpu.memory_space<vmem>>, vector<128x512xbf16>
    %cst_156 = arith.constant dense<0.000000e+00> : vector<16x512xf32>
    %416 = tpu.matmul %414, %415, %cst_156 {dimension_numbers = #tpu.dot_dimension_numbers<[1], [0], [0], [1], [0, 0, 1, 1], [], []>} : vector<16x128xbf16>, vector<128x512xbf16>, vector<16x512xf32> -> vector<16x512xf32>
    %417 = vector.extract_strided_slice %416 {offsets = [0, 0], sizes = [16, 128], strides = [1, 1]} : vector<16x512xf32> to vector<16x128xf32>
    %cst_157 = arith.constant 5.000000e-01 : f32
    %418 = vector.broadcast %cst_157 : f32 to vector<16x128xf32>
    %419 = arith.mulf %418, %417 : vector<16x128xf32>
    %420 = math.tanh %419 : vector<16x128xf32>
    %cst_158 = arith.constant 1.000000e+00 : f32
    %421 = vector.broadcast %cst_158 : f32 to vector<16x128xf32>
    %422 = arith.addf %420, %421 : vector<16x128xf32>
    %cst_159 = arith.constant 5.000000e-01 : f32
    %423 = vector.broadcast %cst_159 : f32 to vector<16x128xf32>
    %424 = arith.mulf %423, %422 : vector<16x128xf32>
    %425 = vector.extract_strided_slice %416 {offsets = [0, 128], sizes = [16, 128], strides = [1, 1]} : vector<16x512xf32> to vector<16x128xf32>
    %426 = arith.subf %425, %394 : vector<16x128xf32>
    %427 = arith.mulf %424, %426 : vector<16x128xf32>
    %428 = arith.addf %394, %427 : vector<16x128xf32>
    %429 = vector.extract_strided_slice %416 {offsets = [0, 256], sizes = [16, 128], strides = [1, 1]} : vector<16x512xf32> to vector<16x128xf32>
    %cst_160 = arith.constant 5.000000e-01 : f32
    %430 = vector.broadcast %cst_160 : f32 to vector<16x128xf32>
    %431 = arith.mulf %430, %429 : vector<16x128xf32>
    %432 = math.tanh %431 : vector<16x128xf32>
    %cst_161 = arith.constant 1.000000e+00 : f32
    %433 = vector.broadcast %cst_161 : f32 to vector<16x128xf32>
    %434 = arith.addf %432, %433 : vector<16x128xf32>
    %cst_162 = arith.constant 5.000000e-01 : f32
    %435 = vector.broadcast %cst_162 : f32 to vector<16x128xf32>
    %436 = arith.mulf %435, %434 : vector<16x128xf32>
    %437 = vector.extract_strided_slice %416 {offsets = [0, 384], sizes = [16, 128], strides = [1, 1]} : vector<16x512xf32> to vector<16x128xf32>
    %cst_163 = arith.constant 5.000000e-01 : f32
    %438 = vector.broadcast %cst_163 : f32 to vector<16x128xf32>
    %439 = arith.mulf %438, %437 : vector<16x128xf32>
    %440 = math.tanh %439 : vector<16x128xf32>
    %cst_164 = arith.constant 1.000000e+00 : f32
    %441 = vector.broadcast %cst_164 : f32 to vector<16x128xf32>
    %442 = arith.addf %440, %441 : vector<16x128xf32>
    %cst_165 = arith.constant 5.000000e-01 : f32
    %443 = vector.broadcast %cst_165 : f32 to vector<16x128xf32>
    %444 = arith.mulf %443, %442 : vector<16x128xf32>
    %445 = arith.subf %444, %394 : vector<16x128xf32>
    %446 = arith.mulf %436, %445 : vector<16x128xf32>
    %447 = arith.addf %394, %446 : vector<16x128xf32>
    %448 = arith.truncf %413 : vector<16x128xf32> to vector<16x128xbf16>
    %c0_166 = arith.constant 0 : index
    %c1280_167 = arith.constant 1280 : index
    %449 = vector.load %arg4[%c0_166, %c1280_167] : memref<128x2048xbf16, #tpu.memory_space<vmem>>, vector<128x256xbf16>
    %cst_168 = arith.constant dense<0.000000e+00> : vector<16x256xf32>
    %450 = tpu.matmul %448, %449, %cst_168 {dimension_numbers = #tpu.dot_dimension_numbers<[1], [0], [0], [1], [0, 0, 1, 1], [], []>} : vector<16x128xbf16>, vector<128x256xbf16>, vector<16x256xf32> -> vector<16x256xf32>
    %451 = vector.extract_strided_slice %450 {offsets = [0, 0], sizes = [16, 128], strides = [1, 1]} : vector<16x256xf32> to vector<16x128xf32>
    %cst_169 = arith.constant 5.000000e-01 : f32
    %452 = vector.broadcast %cst_169 : f32 to vector<16x128xf32>
    %453 = arith.mulf %452, %451 : vector<16x128xf32>
    %454 = math.tanh %453 : vector<16x128xf32>
    %cst_170 = arith.constant 1.000000e+00 : f32
    %455 = vector.broadcast %cst_170 : f32 to vector<16x128xf32>
    %456 = arith.addf %454, %455 : vector<16x128xf32>
    %cst_171 = arith.constant 5.000000e-01 : f32
    %457 = vector.broadcast %cst_171 : f32 to vector<16x128xf32>
    %458 = arith.mulf %457, %456 : vector<16x128xf32>
    %459 = vector.extract_strided_slice %450 {offsets = [0, 128], sizes = [16, 128], strides = [1, 1]} : vector<16x256xf32> to vector<16x128xf32>
    %460 = math.tanh %459 : vector<16x128xf32>
    %461 = arith.subf %460, %413 : vector<16x128xf32>
    %462 = arith.mulf %458, %461 : vector<16x128xf32>
    %463 = arith.addf %413, %462 : vector<16x128xf32>
    %464 = arith.truncf %428 : vector<16x128xf32> to vector<16x128xbf16>
    %c0_172 = arith.constant 0 : index
    %c1536_173 = arith.constant 1536 : index
    %465 = vector.load %arg4[%c0_172, %c1536_173] : memref<128x2048xbf16, #tpu.memory_space<vmem>>, vector<128x256xbf16>
    %cst_174 = arith.constant dense<0.000000e+00> : vector<16x256xf32>
    %466 = tpu.matmul %464, %465, %cst_174 {dimension_numbers = #tpu.dot_dimension_numbers<[1], [0], [0], [1], [0, 0, 1, 1], [], []>} : vector<16x128xbf16>, vector<128x256xbf16>, vector<16x256xf32> -> vector<16x256xf32>
    %467 = vector.extract_strided_slice %466 {offsets = [0, 0], sizes = [16, 128], strides = [1, 1]} : vector<16x256xf32> to vector<16x128xf32>
    %cst_175 = arith.constant 5.000000e-01 : f32
    %468 = vector.broadcast %cst_175 : f32 to vector<16x128xf32>
    %469 = arith.mulf %468, %467 : vector<16x128xf32>
    %470 = math.tanh %469 : vector<16x128xf32>
    %cst_176 = arith.constant 1.000000e+00 : f32
    %471 = vector.broadcast %cst_176 : f32 to vector<16x128xf32>
    %472 = arith.addf %470, %471 : vector<16x128xf32>
    %cst_177 = arith.constant 5.000000e-01 : f32
    %473 = vector.broadcast %cst_177 : f32 to vector<16x128xf32>
    %474 = arith.mulf %473, %472 : vector<16x128xf32>
    %475 = vector.extract_strided_slice %466 {offsets = [0, 128], sizes = [16, 128], strides = [1, 1]} : vector<16x256xf32> to vector<16x128xf32>
    %cst_178 = arith.constant 0.000000e+00 : f32
    %476 = vector.broadcast %cst_178 : f32 to vector<16x128xf32>
    %477 = arith.maximumf %475, %476 : vector<16x128xf32>
    %478 = arith.subf %477, %428 : vector<16x128xf32>
    %479 = arith.mulf %474, %478 : vector<16x128xf32>
    %480 = arith.addf %428, %479 : vector<16x128xf32>
    %481 = arith.truncf %463 : vector<16x128xf32> to vector<16x128xbf16>
    %c0_179 = arith.constant 0 : index
    %c1792_180 = arith.constant 1792 : index
    %482 = vector.load %arg4[%c0_179, %c1792_180] : memref<128x2048xbf16, #tpu.memory_space<vmem>>, vector<128x256xbf16>
    %cst_181 = arith.constant dense<0.000000e+00> : vector<16x256xf32>
    %483 = tpu.matmul %481, %482, %cst_181 {dimension_numbers = #tpu.dot_dimension_numbers<[1], [0], [0], [1], [0, 0, 1, 1], [], []>} : vector<16x128xbf16>, vector<128x256xbf16>, vector<16x256xf32> -> vector<16x256xf32>
    %484 = vector.extract_strided_slice %483 {offsets = [0, 0], sizes = [16, 128], strides = [1, 1]} : vector<16x256xf32> to vector<16x128xf32>
    %cst_182 = arith.constant 5.000000e-01 : f32
    %485 = vector.broadcast %cst_182 : f32 to vector<16x128xf32>
    %486 = arith.mulf %485, %484 : vector<16x128xf32>
    %487 = math.tanh %486 : vector<16x128xf32>
    %cst_183 = arith.constant 1.000000e+00 : f32
    %488 = vector.broadcast %cst_183 : f32 to vector<16x128xf32>
    %489 = arith.addf %487, %488 : vector<16x128xf32>
    %cst_184 = arith.constant 5.000000e-01 : f32
    %490 = vector.broadcast %cst_184 : f32 to vector<16x128xf32>
    %491 = arith.mulf %490, %489 : vector<16x128xf32>
    %492 = vector.extract_strided_slice %483 {offsets = [0, 128], sizes = [16, 128], strides = [1, 1]} : vector<16x256xf32> to vector<16x128xf32>
    %493 = arith.subf %492, %463 : vector<16x128xf32>
    %494 = arith.mulf %491, %493 : vector<16x128xf32>
    %495 = arith.addf %463, %494 : vector<16x128xf32>
    %496 = arith.addf %377, %394 : vector<16x128xf32>
    %497 = arith.addf %496, %413 : vector<16x128xf32>
    %498 = arith.addf %497, %428 : vector<16x128xf32>
    %499 = arith.addf %498, %463 : vector<16x128xf32>
    %500 = arith.addf %499, %480 : vector<16x128xf32>
    %501 = arith.addf %500, %447 : vector<16x128xf32>
    %502 = arith.addf %501, %495 : vector<16x128xf32>
    %cst_185 = arith.constant 1.250000e-01 : f32
    %503 = vector.broadcast %cst_185 : f32 to vector<16x128xf32>
    %504 = arith.mulf %502, %503 : vector<16x128xf32>
    %c0_186 = arith.constant 0 : index
    %c0_187 = arith.constant 0 : index
    %505 = vector.load %arg6[%c0_186, %c0_187] : memref<16x128xf32, #tpu.memory_space<vmem>>, vector<16x128xf32>
    tpu.vector_store %arg6[%c0_186, %c0_187], %504 {strides = array<i32>} : memref<16x128xf32, #tpu.memory_space<vmem>>, vector<16x128xf32>,
    %506 = arith.index_cast %c2_i32 : i32 to index
    %c0_188 = arith.constant 0 : index
    %c0_189 = arith.constant 0 : index
    %507 = vector.load %arg5[%506, %c0_188, %c0_189] : memref<4x16x128xf32, #tpu.memory_space<vmem>>, vector<1x16x128xf32>
    %508 = vector.shape_cast %507 : vector<1x16x128xf32> to vector<16x128xf32>
    %509 = vector.shape_cast %504 : vector<16x128xf32> to vector<1x16x128xf32>
    tpu.vector_store %arg5[%506, %c0_188, %c0_189], %509 {strides = array<i32>} : memref<4x16x128xf32, #tpu.memory_space<vmem>>, vector<1x16x128xf32>,
    %c3_i32 = arith.constant 3 : i32
    %c0_190 = arith.constant 0 : index
    %c0_191 = arith.constant 0 : index
    %510 = vector.load %arg6[%c0_190, %c0_191] : memref<16x128xf32, #tpu.memory_space<vmem>>, vector<16x128xf32>
    %511 = arith.index_cast %c3_i32 : i32 to index
    %c0_192 = arith.constant 0 : index
    %c0_193 = arith.constant 0 : index
    %512 = vector.load %arg1[%511, %c0_192, %c0_193] : memref<4x16x256xf32, #tpu.memory_space<vmem>>, vector<1x16x256xf32>
    %513 = vector.shape_cast %512 : vector<1x16x256xf32> to vector<16x256xf32>
    %514 = arith.truncf %510 : vector<16x128xf32> to vector<16x128xbf16>
    %c0_194 = arith.constant 0 : index
    %c0_195 = arith.constant 0 : index
    %515 = vector.load %arg3[%c0_194, %c0_195] : memref<128x256xbf16, #tpu.memory_space<vmem>>, vector<128x256xbf16>
    %cst_196 = arith.constant dense<0.000000e+00> : vector<16x256xf32>
    %516 = tpu.matmul %514, %515, %cst_196 {dimension_numbers = #tpu.dot_dimension_numbers<[1], [0], [0], [1], [0, 0, 1, 1], [], []>} : vector<16x128xbf16>, vector<128x256xbf16>, vector<16x256xf32> -> vector<16x256xf32>
    %517 = arith.addf %513, %516 : vector<16x256xf32>
    %518 = vector.extract_strided_slice %517 {offsets = [0, 0], sizes = [16, 128], strides = [1, 1]} : vector<16x256xf32> to vector<16x128xf32>
    %cst_197 = arith.constant 5.000000e-01 : f32
    %519 = vector.broadcast %cst_197 : f32 to vector<16x128xf32>
    %520 = arith.mulf %519, %518 : vector<16x128xf32>
    %521 = math.tanh %520 : vector<16x128xf32>
    %cst_198 = arith.constant 1.000000e+00 : f32
    %522 = vector.broadcast %cst_198 : f32 to vector<16x128xf32>
    %523 = arith.addf %521, %522 : vector<16x128xf32>
    %cst_199 = arith.constant 5.000000e-01 : f32
    %524 = vector.broadcast %cst_199 : f32 to vector<16x128xf32>
    %525 = arith.mulf %524, %523 : vector<16x128xf32>
    %526 = vector.extract_strided_slice %517 {offsets = [0, 128], sizes = [16, 128], strides = [1, 1]} : vector<16x256xf32> to vector<16x128xf32>
    %527 = math.tanh %526 : vector<16x128xf32>
    %528 = arith.subf %527, %510 : vector<16x128xf32>
    %529 = arith.mulf %525, %528 : vector<16x128xf32>
    %530 = arith.addf %510, %529 : vector<16x128xf32>
    %531 = arith.truncf %530 : vector<16x128xf32> to vector<16x128xbf16>
    %c0_200 = arith.constant 0 : index
    %c0_201 = arith.constant 0 : index
    %532 = vector.load %arg4[%c0_200, %c0_201] : memref<128x2048xbf16, #tpu.memory_space<vmem>>, vector<128x256xbf16>
    %cst_202 = arith.constant dense<0.000000e+00> : vector<16x256xf32>
    %533 = tpu.matmul %531, %532, %cst_202 {dimension_numbers = #tpu.dot_dimension_numbers<[1], [0], [0], [1], [0, 0, 1, 1], [], []>} : vector<16x128xbf16>, vector<128x256xbf16>, vector<16x256xf32> -> vector<16x256xf32>
    %534 = vector.extract_strided_slice %533 {offsets = [0, 0], sizes = [16, 128], strides = [1, 1]} : vector<16x256xf32> to vector<16x128xf32>
    %cst_203 = arith.constant 5.000000e-01 : f32
    %535 = vector.broadcast %cst_203 : f32 to vector<16x128xf32>
    %536 = arith.mulf %535, %534 : vector<16x128xf32>
    %537 = math.tanh %536 : vector<16x128xf32>
    %cst_204 = arith.constant 1.000000e+00 : f32
    %538 = vector.broadcast %cst_204 : f32 to vector<16x128xf32>
    %539 = arith.addf %537, %538 : vector<16x128xf32>
    %cst_205 = arith.constant 5.000000e-01 : f32
    %540 = vector.broadcast %cst_205 : f32 to vector<16x128xf32>
    %541 = arith.mulf %540, %539 : vector<16x128xf32>
    %542 = vector.extract_strided_slice %533 {offsets = [0, 128], sizes = [16, 128], strides = [1, 1]} : vector<16x256xf32> to vector<16x128xf32>
    %543 = math.tanh %542 : vector<16x128xf32>
    %544 = arith.subf %543, %530 : vector<16x128xf32>
    %545 = arith.mulf %541, %544 : vector<16x128xf32>
    %546 = arith.addf %530, %545 : vector<16x128xf32>
    %547 = arith.truncf %546 : vector<16x128xf32> to vector<16x128xbf16>
    %c0_206 = arith.constant 0 : index
    %c256_207 = arith.constant 256 : index
    %548 = vector.load %arg4[%c0_206, %c256_207] : memref<128x2048xbf16, #tpu.memory_space<vmem>>, vector<128x512xbf16>
    %cst_208 = arith.constant dense<0.000000e+00> : vector<16x512xf32>
    %549 = tpu.matmul %547, %548, %cst_208 {dimension_numbers = #tpu.dot_dimension_numbers<[1], [0], [0], [1], [0, 0, 1, 1], [], []>} : vector<16x128xbf16>, vector<128x512xbf16>, vector<16x512xf32> -> vector<16x512xf32>
    %550 = vector.extract_strided_slice %549 {offsets = [0, 0], sizes = [16, 128], strides = [1, 1]} : vector<16x512xf32> to vector<16x128xf32>
    %cst_209 = arith.constant 5.000000e-01 : f32
    %551 = vector.broadcast %cst_209 : f32 to vector<16x128xf32>
    %552 = arith.mulf %551, %550 : vector<16x128xf32>
    %553 = math.tanh %552 : vector<16x128xf32>
    %cst_210 = arith.constant 1.000000e+00 : f32
    %554 = vector.broadcast %cst_210 : f32 to vector<16x128xf32>
    %555 = arith.addf %553, %554 : vector<16x128xf32>
    %cst_211 = arith.constant 5.000000e-01 : f32
    %556 = vector.broadcast %cst_211 : f32 to vector<16x128xf32>
    %557 = arith.mulf %556, %555 : vector<16x128xf32>
    %558 = vector.extract_strided_slice %549 {offsets = [0, 128], sizes = [16, 128], strides = [1, 1]} : vector<16x512xf32> to vector<16x128xf32>
    %cst_212 = arith.constant 0.000000e+00 : f32
    %559 = vector.broadcast %cst_212 : f32 to vector<16x128xf32>
    %560 = arith.maximumf %558, %559 : vector<16x128xf32>
    %561 = arith.subf %560, %546 : vector<16x128xf32>
    %562 = arith.mulf %557, %561 : vector<16x128xf32>
    %563 = arith.addf %546, %562 : vector<16x128xf32>
    %564 = vector.extract_strided_slice %549 {offsets = [0, 256], sizes = [16, 128], strides = [1, 1]} : vector<16x512xf32> to vector<16x128xf32>
    %cst_213 = arith.constant 5.000000e-01 : f32
    %565 = vector.broadcast %cst_213 : f32 to vector<16x128xf32>
    %566 = arith.mulf %565, %564 : vector<16x128xf32>
    %567 = math.tanh %566 : vector<16x128xf32>
    %cst_214 = arith.constant 1.000000e+00 : f32
    %568 = vector.broadcast %cst_214 : f32 to vector<16x128xf32>
    %569 = arith.addf %567, %568 : vector<16x128xf32>
    %cst_215 = arith.constant 5.000000e-01 : f32
    %570 = vector.broadcast %cst_215 : f32 to vector<16x128xf32>
    %571 = arith.mulf %570, %569 : vector<16x128xf32>
    %572 = vector.extract_strided_slice %549 {offsets = [0, 384], sizes = [16, 128], strides = [1, 1]} : vector<16x512xf32> to vector<16x128xf32>
    %cst_216 = arith.constant 5.000000e-01 : f32
    %573 = vector.broadcast %cst_216 : f32 to vector<16x128xf32>
    %574 = arith.mulf %573, %572 : vector<16x128xf32>
    %575 = math.tanh %574 : vector<16x128xf32>
    %cst_217 = arith.constant 1.000000e+00 : f32
    %576 = vector.broadcast %cst_217 : f32 to vector<16x128xf32>
    %577 = arith.addf %575, %576 : vector<16x128xf32>
    %cst_218 = arith.constant 5.000000e-01 : f32
    %578 = vector.broadcast %cst_218 : f32 to vector<16x128xf32>
    %579 = arith.mulf %578, %577 : vector<16x128xf32>
    %580 = arith.subf %579, %546 : vector<16x128xf32>
    %581 = arith.mulf %571, %580 : vector<16x128xf32>
    %582 = arith.addf %546, %581 : vector<16x128xf32>
    %583 = arith.truncf %563 : vector<16x128xf32> to vector<16x128xbf16>
    %c0_219 = arith.constant 0 : index
    %c768_220 = arith.constant 768 : index
    %584 = vector.load %arg4[%c0_219, %c768_220] : memref<128x2048xbf16, #tpu.memory_space<vmem>>, vector<128x512xbf16>
    %cst_221 = arith.constant dense<0.000000e+00> : vector<16x512xf32>
    %585 = tpu.matmul %583, %584, %cst_221 {dimension_numbers = #tpu.dot_dimension_numbers<[1], [0], [0], [1], [0, 0, 1, 1], [], []>} : vector<16x128xbf16>, vector<128x512xbf16>, vector<16x512xf32> -> vector<16x512xf32>
    %586 = vector.extract_strided_slice %585 {offsets = [0, 0], sizes = [16, 128], strides = [1, 1]} : vector<16x512xf32> to vector<16x128xf32>
    %cst_222 = arith.constant 5.000000e-01 : f32
    %587 = vector.broadcast %cst_222 : f32 to vector<16x128xf32>
    %588 = arith.mulf %587, %586 : vector<16x128xf32>
    %589 = math.tanh %588 : vector<16x128xf32>
    %cst_223 = arith.constant 1.000000e+00 : f32
    %590 = vector.broadcast %cst_223 : f32 to vector<16x128xf32>
    %591 = arith.addf %589, %590 : vector<16x128xf32>
    %cst_224 = arith.constant 5.000000e-01 : f32
    %592 = vector.broadcast %cst_224 : f32 to vector<16x128xf32>
    %593 = arith.mulf %592, %591 : vector<16x128xf32>
    %594 = vector.extract_strided_slice %585 {offsets = [0, 128], sizes = [16, 128], strides = [1, 1]} : vector<16x512xf32> to vector<16x128xf32>
    %595 = arith.subf %594, %563 : vector<16x128xf32>
    %596 = arith.mulf %593, %595 : vector<16x128xf32>
    %597 = arith.addf %563, %596 : vector<16x128xf32>
    %598 = vector.extract_strided_slice %585 {offsets = [0, 256], sizes = [16, 128], strides = [1, 1]} : vector<16x512xf32> to vector<16x128xf32>
    %cst_225 = arith.constant 5.000000e-01 : f32
    %599 = vector.broadcast %cst_225 : f32 to vector<16x128xf32>
    %600 = arith.mulf %599, %598 : vector<16x128xf32>
    %601 = math.tanh %600 : vector<16x128xf32>
    %cst_226 = arith.constant 1.000000e+00 : f32
    %602 = vector.broadcast %cst_226 : f32 to vector<16x128xf32>
    %603 = arith.addf %601, %602 : vector<16x128xf32>
    %cst_227 = arith.constant 5.000000e-01 : f32
    %604 = vector.broadcast %cst_227 : f32 to vector<16x128xf32>
    %605 = arith.mulf %604, %603 : vector<16x128xf32>
    %606 = vector.extract_strided_slice %585 {offsets = [0, 384], sizes = [16, 128], strides = [1, 1]} : vector<16x512xf32> to vector<16x128xf32>
    %cst_228 = arith.constant 5.000000e-01 : f32
    %607 = vector.broadcast %cst_228 : f32 to vector<16x128xf32>
    %608 = arith.mulf %607, %606 : vector<16x128xf32>
    %609 = math.tanh %608 : vector<16x128xf32>
    %cst_229 = arith.constant 1.000000e+00 : f32
    %610 = vector.broadcast %cst_229 : f32 to vector<16x128xf32>
    %611 = arith.addf %609, %610 : vector<16x128xf32>
    %cst_230 = arith.constant 5.000000e-01 : f32
    %612 = vector.broadcast %cst_230 : f32 to vector<16x128xf32>
    %613 = arith.mulf %612, %611 : vector<16x128xf32>
    %614 = arith.subf %613, %563 : vector<16x128xf32>
    %615 = arith.mulf %605, %614 : vector<16x128xf32>
    %616 = arith.addf %563, %615 : vector<16x128xf32>
    %617 = arith.truncf %582 : vector<16x128xf32> to vector<16x128xbf16>
    %c0_231 = arith.constant 0 : index
    %c1280_232 = arith.constant 1280 : index
    %618 = vector.load %arg4[%c0_231, %c1280_232] : memref<128x2048xbf16, #tpu.memory_space<vmem>>, vector<128x256xbf16>
    %cst_233 = arith.constant dense<0.000000e+00> : vector<16x256xf32>
    %619 = tpu.matmul %617, %618, %cst_233 {dimension_numbers = #tpu.dot_dimension_numbers<[1], [0], [0], [1], [0, 0, 1, 1], [], []>} : vector<16x128xbf16>, vector<128x256xbf16>, vector<16x256xf32> -> vector<16x256xf32>
    %620 = vector.extract_strided_slice %619 {offsets = [0, 0], sizes = [16, 128], strides = [1, 1]} : vector<16x256xf32> to vector<16x128xf32>
    %cst_234 = arith.constant 5.000000e-01 : f32
    %621 = vector.broadcast %cst_234 : f32 to vector<16x128xf32>
    %622 = arith.mulf %621, %620 : vector<16x128xf32>
    %623 = math.tanh %622 : vector<16x128xf32>
    %cst_235 = arith.constant 1.000000e+00 : f32
    %624 = vector.broadcast %cst_235 : f32 to vector<16x128xf32>
    %625 = arith.addf %623, %624 : vector<16x128xf32>
    %cst_236 = arith.constant 5.000000e-01 : f32
    %626 = vector.broadcast %cst_236 : f32 to vector<16x128xf32>
    %627 = arith.mulf %626, %625 : vector<16x128xf32>
    %628 = vector.extract_strided_slice %619 {offsets = [0, 128], sizes = [16, 128], strides = [1, 1]} : vector<16x256xf32> to vector<16x128xf32>
    %629 = math.tanh %628 : vector<16x128xf32>
    %630 = arith.subf %629, %582 : vector<16x128xf32>
    %631 = arith.mulf %627, %630 : vector<16x128xf32>
    %632 = arith.addf %582, %631 : vector<16x128xf32>
    %633 = arith.truncf %597 : vector<16x128xf32> to vector<16x128xbf16>
    %c0_237 = arith.constant 0 : index
    %c1536_238 = arith.constant 1536 : index
    %634 = vector.load %arg4[%c0_237, %c1536_238] : memref<128x2048xbf16, #tpu.memory_space<vmem>>, vector<128x256xbf16>
    %cst_239 = arith.constant dense<0.000000e+00> : vector<16x256xf32>
    %635 = tpu.matmul %633, %634, %cst_239 {dimension_numbers = #tpu.dot_dimension_numbers<[1], [0], [0], [1], [0, 0, 1, 1], [], []>} : vector<16x128xbf16>, vector<128x256xbf16>, vector<16x256xf32> -> vector<16x256xf32>
    %636 = vector.extract_strided_slice %635 {offsets = [0, 0], sizes = [16, 128], strides = [1, 1]} : vector<16x256xf32> to vector<16x128xf32>
    %cst_240 = arith.constant 5.000000e-01 : f32
    %637 = vector.broadcast %cst_240 : f32 to vector<16x128xf32>
    %638 = arith.mulf %637, %636 : vector<16x128xf32>
    %639 = math.tanh %638 : vector<16x128xf32>
    %cst_241 = arith.constant 1.000000e+00 : f32
    %640 = vector.broadcast %cst_241 : f32 to vector<16x128xf32>
    %641 = arith.addf %639, %640 : vector<16x128xf32>
    %cst_242 = arith.constant 5.000000e-01 : f32
    %642 = vector.broadcast %cst_242 : f32 to vector<16x128xf32>
    %643 = arith.mulf %642, %641 : vector<16x128xf32>
    %644 = vector.extract_strided_slice %635 {offsets = [0, 128], sizes = [16, 128], strides = [1, 1]} : vector<16x256xf32> to vector<16x128xf32>
    %cst_243 = arith.constant 0.000000e+00 : f32
    %645 = vector.broadcast %cst_243 : f32 to vector<16x128xf32>
    %646 = arith.maximumf %644, %645 : vector<16x128xf32>
    %647 = arith.subf %646, %597 : vector<16x128xf32>
    %648 = arith.mulf %643, %647 : vector<16x128xf32>
    %649 = arith.addf %597, %648 : vector<16x128xf32>
    %650 = arith.truncf %632 : vector<16x128xf32> to vector<16x128xbf16>
    %c0_244 = arith.constant 0 : index
    %c1792_245 = arith.constant 1792 : index
    %651 = vector.load %arg4[%c0_244, %c1792_245] : memref<128x2048xbf16, #tpu.memory_space<vmem>>, vector<128x256xbf16>
    %cst_246 = arith.constant dense<0.000000e+00> : vector<16x256xf32>
    %652 = tpu.matmul %650, %651, %cst_246 {dimension_numbers = #tpu.dot_dimension_numbers<[1], [0], [0], [1], [0, 0, 1, 1], [], []>} : vector<16x128xbf16>, vector<128x256xbf16>, vector<16x256xf32> -> vector<16x256xf32>
    %653 = vector.extract_strided_slice %652 {offsets = [0, 0], sizes = [16, 128], strides = [1, 1]} : vector<16x256xf32> to vector<16x128xf32>
    %cst_247 = arith.constant 5.000000e-01 : f32
    %654 = vector.broadcast %cst_247 : f32 to vector<16x128xf32>
    %655 = arith.mulf %654, %653 : vector<16x128xf32>
    %656 = math.tanh %655 : vector<16x128xf32>
    %cst_248 = arith.constant 1.000000e+00 : f32
    %657 = vector.broadcast %cst_248 : f32 to vector<16x128xf32>
    %658 = arith.addf %656, %657 : vector<16x128xf32>
    %cst_249 = arith.constant 5.000000e-01 : f32
    %659 = vector.broadcast %cst_249 : f32 to vector<16x128xf32>
    %660 = arith.mulf %659, %658 : vector<16x128xf32>
    %661 = vector.extract_strided_slice %652 {offsets = [0, 128], sizes = [16, 128], strides = [1, 1]} : vector<16x256xf32> to vector<16x128xf32>
    %662 = arith.subf %661, %632 : vector<16x128xf32>
    %663 = arith.mulf %660, %662 : vector<16x128xf32>
    %664 = arith.addf %632, %663 : vector<16x128xf32>
    %665 = arith.addf %546, %563 : vector<16x128xf32>
    %666 = arith.addf %665, %582 : vector<16x128xf32>
    %667 = arith.addf %666, %597 : vector<16x128xf32>
    %668 = arith.addf %667, %632 : vector<16x128xf32>
    %669 = arith.addf %668, %649 : vector<16x128xf32>
    %670 = arith.addf %669, %616 : vector<16x128xf32>
    %671 = arith.addf %670, %664 : vector<16x128xf32>
    %cst_250 = arith.constant 1.250000e-01 : f32
    %672 = vector.broadcast %cst_250 : f32 to vector<16x128xf32>
    %673 = arith.mulf %671, %672 : vector<16x128xf32>
    %c0_251 = arith.constant 0 : index
    %c0_252 = arith.constant 0 : index
    %674 = vector.load %arg6[%c0_251, %c0_252] : memref<16x128xf32, #tpu.memory_space<vmem>>, vector<16x128xf32>
    tpu.vector_store %arg6[%c0_251, %c0_252], %673 {strides = array<i32>} : memref<16x128xf32, #tpu.memory_space<vmem>>, vector<16x128xf32>,
    %675 = arith.index_cast %c3_i32 : i32 to index
    %c0_253 = arith.constant 0 : index
    %c0_254 = arith.constant 0 : index
    %676 = vector.load %arg5[%675, %c0_253, %c0_254] : memref<4x16x128xf32, #tpu.memory_space<vmem>>, vector<1x16x128xf32>
    %677 = vector.shape_cast %676 : vector<1x16x128xf32> to vector<16x128xf32>
    %678 = vector.shape_cast %673 : vector<16x128xf32> to vector<1x16x128xf32>
    tpu.vector_store %arg5[%675, %c0_253, %c0_254], %678 {strides = array<i32>} : memref<4x16x128xf32, #tpu.memory_space<vmem>>, vector<1x16x128xf32>,
    %c4_i32 = arith.constant 4 : i32
    return
  }
  func.func @transform_0(%arg0: i32) -> (i32, i32, i32) {
    %c0_i32 = arith.constant 0 : i32
    %c0_i32_0 = arith.constant 0 : i32
    %c0_i32_1 = arith.constant 0 : i32
    return %arg0, %c0_i32, %c0_i32_0 : i32, i32, i32
  }
  func.func @transform_1(%arg0: i32) -> (i32, i32) {
    %c0_i32 = arith.constant 0 : i32
    %c0_i32_0 = arith.constant 0 : i32
    %c0_i32_1 = arith.constant 0 : i32
    return %c0_i32, %c0_i32_0 : i32, i32
  }
  func.func @transform_2(%arg0: i32) -> (i32, i32) {
    %c0_i32 = arith.constant 0 : i32
    %c0_i32_0 = arith.constant 0 : i32
    %c0_i32_1 = arith.constant 0 : i32
    return %c0_i32, %c0_i32_0 : i32, i32
  }
  func.func @transform_3(%arg0: i32) -> (i32, i32) {
    %c0_i32 = arith.constant 0 : i32
    %c0_i32_0 = arith.constant 0 : i32
    %c0_i32_1 = arith.constant 0 : i32
    return %c0_i32, %c0_i32_0 : i32, i32
  }
  func.func @transform_4(%arg0: i32) -> (i32, i32, i32) {
    %c0_i32 = arith.constant 0 : i32
    %c0_i32_0 = arith.constant 0 : i32
    %c0_i32_1 = arith.constant 0 : i32
    return %arg0, %c0_i32, %c0_i32_0 : i32, i32, i32
  }
}

</mosaic_0001>

<bundles_post_ra>
// kernel: darts_cell_forward.1
= control target key start
LH: loop header
LB: loop body
LE: loop exit
PB: predicated region body
PF: predicated region fallthrough
CT: control target
= control target key end

     0   :  { %s7012_s15 = smov 0   ;;  %s9185_s0 = inlined_call_operand.vmem [shape: f32[8,16,256], index: 0, kind: input, shape index: {}]   ;;  %s9186_s1 = inlined_call_operand.vmem [shape: f32[16,128], index: 1, kind: input, shape index: {}]   ;;  %s9187_s2 = inlined_call_operand.vmem [shape: bf16[128,256], index: 2, kind: input, shape index: {}]   ;;  %s9188_s3 = inlined_call_operand.vmem [shape: bf16[128,2048], index: 3, kind: input, shape index: {}]   ;;  %s9189_s4 = inlined_call_operand.vmem [shape: f32[8,16,128], index: 4, kind: output, shape index: {}]  }
   0x1 LB: > { %s6039_s16 = sadd.s32 4294967295, %s6984_s15   ;;  %p6043_p0 = scmp.ge.s32.totalorder %s6984_s15, 1  ;;  %s6984_s15 = sphi %s7012_s15, %s14_s15  }
   0x2   : > { %p164_p1 = scmp.lt.s32.totalorder %s6984_s15, 3 }
   0x4   : > { %p165_p2 = pnand %p6043_p0, %p164_p1 }
   0x5   : > { %s6044_s17 = sshll.u32 (!%p165_p2), %s6039_s16, 2  ;;  %p6050_p4 = scmp.ne.s32.totalorder (!%p165_p2), %s6039_s16, 0 }
   0x6   : > { %168 = sbr.rel (%p165_p2) target bundleno = 4663 (0x1237), region = 36  ;;  %p193_p3 = scmp.lt.s32.totalorder (!%p165_p2), %s6044_s17, 7 }
   0xb   : > { %s9191_s17 = smov (!%p193_p3, %s6044_s17), 7  ;;  %210 = sbr.rel (%p6050_p4) target bundleno = 18 (0x12), region = 40 }
   0xc   : > { %s6647_s18 = sshll.u32 %s9191_s17, 5  ;;  %s6648_s19 = sshll.u32 %s9191_s17, 4 }
   0xd   : > { %s7023_s22 = scalar_lea.vmem %s9185_s0, %s6647_s18  ;;  %s7028_s25 = scalar_lea.vmem %s9189_s4, %s6648_s19 }
  0x10   : > { %v211_v0 = vld [vmem:[%s9186_s1] sm:$0xff]  ;;  %v212_v1 = vld [vmem:[%s9186_s1 + $0x8] sm:$0xff] }
  0x11   : > { %213 = vst [vmem:[#allocation2] sm:$0xff] %v211_v0  ;;  %214 = vst [vmem:[#allocation2 + $0x8] sm:$0xff] %v212_v1 }
  0x12 PF: > { %v6658_v2 = vld [vmem:[%s9187_s2 + $0x74] ss:$8 sps:$4 sm:$0xff]   ;;  %v6660_v3 = vld [vmem:[%s9187_s2 + $0x70] ss:$8 sps:$4 sm:$0xff]   ;;  %v6986_v4 = vmov 0   ;;  %v396_v22 = vld [vmem:[%s9188_s3 + $0x380] sm:$0xff] }
  0x13   : > { %350 = vmatprep.mubr.bf16.mxu0 %v6986_v4  ;;  %510 = vmatprep.mubr.bf16.mxu1 %v6986_v4  ;;  %v6661_v5 = vld [vmem:[%s9187_s2 + $0x64] ss:$8 sps:$4 sm:$0xff]   ;;  %v6663_v6 = vld [vmem:[%s9187_s2 + $0x60] ss:$8 sps:$4 sm:$0xff]   ;;  %v6664_v7 = vld [vmem:[%s9187_s2 + $0x54] ss:$8 sps:$4 sm:$0xff]  }
  0x14   : > { %318 = vmatprep.subr.bf16.mxu0 %v6658_v2  ;;  %v6666_v8 = vld [vmem:[%s9187_s2 + $0x50] ss:$8 sps:$4 sm:$0xff]   ;;  %v6667_v9 = vld [vmem:[%s9187_s2 + $0x44] ss:$8 sps:$4 sm:$0xff]   ;;  %v6669_v10 = vld [vmem:[%s9187_s2 + $0x40] ss:$8 sps:$4 sm:$0xff]  }
  0x15   : > { %319 = vmatpush1.bf16.msra.mxu0 %v6660_v3  ;;  %v6670_v11 = vld [vmem:[%s9187_s2 + $0x34] ss:$8 sps:$4 sm:$0xff]   ;;  %v6672_v12 = vld [vmem:[%s9187_s2 + $0x30] ss:$8 sps:$4 sm:$0xff]   ;;  %v6673_v13 = vld [vmem:[%s9187_s2 + $0x24] ss:$8 sps:$4 sm:$0xff]  }
  0x16   : > { %320 = vmatprep.subr.bf16.mxu0 %v6661_v5  ;;  %v6675_v14 = vld [vmem:[%s9187_s2 + $0x20] ss:$8 sps:$4 sm:$0xff]   ;;  %v6676_v15 = vld [vmem:[%s9187_s2 + $0x14] ss:$8 sps:$4 sm:$0xff]   ;;  %v6678_v16 = vld [vmem:[%s9187_s2 + $0x10] ss:$8 sps:$4 sm:$0xff]  }
  0x17   : > { %v6679_v17 = vld [vmem:[%s9187_s2 + $0x4] ss:$8 sps:$4 sm:$0xff]   ;;  %v6681_v18 = vld [vmem:[%s9187_s2] ss:$8 sps:$4 sm:$0xff]   ;;  %v567_v56 = vld [vmem:[%s9188_s3 + $0x390] sm:$0xff] }
  0x18   : > { %v7086_v19 = vld [vmem:[#allocation2] sm:$0xff]  ;;  %v7088_v20 = vld [vmem:[#allocation2 + $0x8] sm:$0xff]  ;;  %v569_v59 = vld [vmem:[%s9188_s3 + $0x3d0] sm:$0xff] }
  0x19   : > { %321 = vmatpush1.bf16.msra.mxu0 %v6663_v6  ;;  %v221_v21 = vpack.c.bf16 %v7088_v20, %v7086_v19  ;;  %v397_v23 = vld [vmem:[%s9188_s3 + $0x3c0] sm:$0xff]  ;;  %v566_v54 = vld [vmem:[%s9188_s3 + $0x388] sm:$0xff]  ;;  %v6113_v60 = vcombine.low %v567_v56, %v569_v59  ;;  %v6114_v61 = vcombine.high %v567_v56, %v569_v59  ;;  %v219_v3 = vld [vmem:[%s7023_s22 + $0x10] sm:$0xff] }
  0x1a   : > { %322 = vmatprep.subr.bf16.mxu0 %v6664_v7  ;;  %v6082_v24 = vcombine.high %v396_v22, %v397_v23  ;;  %v6081_v25 = vcombine.low %v396_v22, %v397_v23  ;;  %v394_v26 = vld [vmem:[%s9188_s3 + $0x300] sm:$0xff]  ;;  %v568_v55 = vld [vmem:[%s9188_s3 + $0x3c8] sm:$0xff]  ;;  %v553_v56 = vld [vmem:[%s9188_s3 + $0x1d0] sm:$0xff] }
  0x1b   : > { %v395_v27 = vld [vmem:[%s9188_s3 + $0x340] sm:$0xff]  ;;  %v6111_v57 = vcombine.low %v566_v54, %v568_v55  ;;  %v6112_v58 = vcombine.high %v566_v54, %v568_v55  ;;  %v218_v0 = vld [vmem:[%s7023_s22 + $0x8] sm:$0xff]  ;;  %v551_v54 = vld [vmem:[%s9188_s3 + $0x190] sm:$0xff] }
  0x1c   : > { %478 = vmatprep.subr.bf16.mxu1 %v6082_v24  ;;  %v6080_v28 = vcombine.high %v394_v26, %v395_v27  ;;  %v6079_v29 = vcombine.low %v394_v26, %v395_v27  ;;  %v392_v30 = vld [vmem:[%s9188_s3 + $0x280] sm:$0xff]  ;;  %v6098_v59 = vcombine.high %v551_v54, %v553_v56 }
  0x1d   : > { %323 = vmatpush1.bf16.msra.mxu0 %v6666_v8  ;;  %479 = vmatpush1.bf16.msra.mxu1 %v6081_v25  ;;  %v393_v31 = vld [vmem:[%s9188_s3 + $0x2c0] sm:$0xff]  ;;  %v220_v8 = vld [vmem:[%s7023_s22 + $0x18] sm:$0xff] }
  0x1e   : > { %324 = vmatprep.subr.bf16.mxu0 %v6667_v9  ;;  %480 = vmatprep.subr.bf16.mxu1 %v6080_v28  ;;  %v6078_v32 = vcombine.high %v392_v30, %v393_v31  ;;  %v6077_v33 = vcombine.low %v392_v30, %v393_v31  ;;  %v390_v34 = vld [vmem:[%s9188_s3 + $0x200] sm:$0xff]  ;;  %v562_v30 = vld [vmem:[%s9188_s3 + $0x308] sm:$0xff] }
  0x1f   : > { %v391_v35 = vld [vmem:[%s9188_s3 + $0x240] sm:$0xff]  ;;  %v564_v31 = vld [vmem:[%s9188_s3 + $0x348] sm:$0xff] }
  0x20   : > { %v6076_v36 = vcombine.high %v390_v34, %v391_v35  ;;  %v6075_v37 = vcombine.low %v390_v34, %v391_v35  ;;  %v388_v38 = vld [vmem:[%s9188_s3 + $0x180] sm:$0xff] }
  0x21   : > { %325 = vmatpush1.bf16.msra.mxu0 %v6669_v10  ;;  %481 = vmatpush1.bf16.msra.mxu1 %v6079_v29  ;;  %v389_v39 = vld [vmem:[%s9188_s3 + $0x1c0] sm:$0xff] }
  0x22   : > { %326 = vmatprep.subr.bf16.mxu0 %v6670_v11  ;;  %482 = vmatprep.subr.bf16.mxu1 %v6078_v32  ;;  %v6074_v40 = vcombine.high %v388_v38, %v389_v39  ;;  %v6073_v41 = vcombine.low %v388_v38, %v389_v39  ;;  %v386_v42 = vld [vmem:[%s9188_s3 + $0x100] sm:$0xff]  ;;  %v565_v32 = vld [vmem:[%s9188_s3 + $0x350] sm:$0xff] }
  0x23   : > { %v387_v43 = vld [vmem:[%s9188_s3 + $0x140] sm:$0xff]  ;;  %v559_v38 = vld [vmem:[%s9188_s3 + $0x290] sm:$0xff] }
  0x24   : > { %v6072_v44 = vcombine.high %v386_v42, %v387_v43  ;;  %v6071_v45 = vcombine.low %v386_v42, %v387_v43  ;;  %v384_v46 = vld [vmem:[%s9188_s3 + $0x80] sm:$0xff] }
  0x25   : > { %327 = vmatpush1.bf16.msra.mxu0 %v6672_v12  ;;  %483 = vmatpush1.bf16.msra.mxu1 %v6077_v33  ;;  %v385_v47 = vld [vmem:[%s9188_s3 + $0xc0] sm:$0xff]  ;;  %v6107_v33 = vcombine.low %v562_v30, %v564_v31 }
  0x26   : > { %328 = vmatprep.subr.bf16.mxu0 %v6673_v13  ;;  %484 = vmatprep.subr.bf16.mxu1 %v6076_v36  ;;  %v6070_v48 = vcombine.high %v384_v46, %v385_v47  ;;  %v6069_v49 = vcombine.low %v384_v46, %v385_v47  ;;  %v382_v50 = vld [vmem:[%s9188_s3] sm:$0xff]  ;;  %v558_v36 = vld [vmem:[%s9188_s3 + $0x288] sm:$0xff]  ;;  %v555_v46 = vld [vmem:[%s9188_s3 + $0x210] sm:$0xff] }
  0x27   : > { %v383_v51 = vld [vmem:[%s9188_s3 + $0x40] sm:$0xff] }
  0x28   : > { %v6068_v52 = vcombine.high %v382_v50, %v383_v51  ;;  %v6067_v53 = vcombine.low %v382_v50, %v383_v51  ;;  %v217_v62 = vld [vmem:[%s7023_s22] sm:$0xff] }
  0x29   : > { %329 = vmatpush1.bf16.msra.mxu0 %v6675_v14  ;;  %485 = vmatpush1.bf16.msra.mxu1 %v6075_v37  ;;  %v560_v37 = vld [vmem:[%s9188_s3 + $0x2c8] sm:$0xff] }
  0x2a   : > { %330 = vmatprep.subr.bf16.mxu0 %v6676_v15  ;;  %486 = vmatprep.subr.bf16.mxu1 %v6074_v40  ;;  %v6104_v39 = vcombine.high %v558_v36, %v560_v37  ;;  %v561_v40 = vld [vmem:[%s9188_s3 + $0x2d0] sm:$0xff] }
  0x2b   : > { %v6105_v42 = vcombine.low %v559_v38, %v561_v40  ;;  %v6106_v43 = vcombine.high %v559_v38, %v561_v40 }
  0x2d   : > { %331 = vmatpush1.bf16.msra.mxu0 %v6678_v16  ;;  %487 = vmatpush1.bf16.msra.mxu1 %v6073_v41  ;;  %v6103_v41 = vcombine.low %v558_v36, %v560_v37 }
  0x2e   : > { %332 = vmatprep.subr.bf16.mxu0 %v6679_v17  ;;  %488 = vmatprep.subr.bf16.mxu1 %v6072_v44  ;;  %v554_v44 = vld [vmem:[%s9188_s3 + $0x208] sm:$0xff] }
  0x31   : > { %333 = vmatpush1.bf16.msra.mxu0 %v6681_v18  ;;  %489 = vmatpush1.bf16.msra.mxu1 %v6071_v45  ;;  %v556_v45 = vld [vmem:[%s9188_s3 + $0x248] sm:$0xff] }
  0x32   : > { %490 = vmatprep.subr.bf16.mxu1 %v6070_v48  ;;  %730 = vmatprep.subr.bf16.mxu0 %v6112_v58  ;;  %v6100_v47 = vcombine.high %v554_v44, %v556_v45  ;;  %v557_v48 = vld [vmem:[%s9188_s3 + $0x250] sm:$0xff]  ;;  %v6097_v58 = vcombine.low %v551_v54, %v553_v56  ;;  %v882_v54 = vld [vmem:[%s9188_s3 + $0x360] sm:$0xff] }
  0x33   : > { %v6101_v50 = vcombine.low %v555_v46, %v557_v48  ;;  %v6102_v51 = vcombine.high %v555_v46, %v557_v48 }
  0x34   : > { %351 = vmatmul.mubr.bf16.vlgmr.msra.gmra.mxu0 %v221_v21 }
  0x35   : > { %762 = vmatprep.mubr.bf16.mxu0 %v6986_v4  ;;  %491 = vmatpush1.bf16.msra.mxu1 %v6069_v49  ;;  %v6099_v49 = vcombine.low %v554_v44, %v556_v45 }
  0x36   : > { %492 = vmatprep.subr.bf16.mxu1 %v6068_v52  ;;  %731 = vmatpush1.bf16.msra.mxu0 %v6111_v57  ;;  %v550_v52 = vld [vmem:[%s9188_s3 + $0x188] sm:$0xff] }
  0x39   : > { %493 = vmatpush1.bf16.msra.mxu1 %v6067_v53  ;;  %v552_v53 = vld [vmem:[%s9188_s3 + $0x1c8] sm:$0xff] }
  0x3a   : > { %773 = vmatprep.subr.bf16.mxu1 %v6114_v61  ;;  %v6096_v55 = vcombine.high %v550_v52, %v552_v53  ;;  %v6095_v57 = vcombine.low %v550_v52, %v552_v53  ;;  %v548_v61 = vld [vmem:[%s9188_s3 + $0x148] sm:$0xff]  ;;  %v879_v52 = vld [vmem:[%s9188_s3 + $0x318] sm:$0xff]  ;;  %v880_v53 = vld [vmem:[%s9188_s3 + $0x320] sm:$0xff] }
  0x3b   : > { %v6142_v56 = vcombine.high %v880_v53, %v882_v54 }
  0xf4   : > { %v352_v63 = vpop.f32.mrf.mxu0 }
  0xf5   : > { %v361_v1 = vadd.f32 %v352_v63, %v217_v62  ;;  %v547_v62 = vld [vmem:[%s9188_s3 + $0x110] sm:$0xff] }
  0xf6   : > { %v354_v2 = vpop.f32.mrf.mxu0 }
  0xf7   : > { %v365_v5 = vmul.f32 0.5, %v361_v1  ;;  %v362_v6 = vadd.f32 %v354_v2, %v218_v0  ;;  %v549_v0 = vld [vmem:[%s9188_s3 + $0x150] sm:$0xff] }
  0xf8   : > { %v356_v7 = vpop.f32.mrf.mxu0  ;;  %v6093_v2 = vcombine.low %v547_v62, %v549_v0 }
  0xf9   : > { %6754 = vtanh.f32 %v365_v5  ;;  %v363_v9 = vadd.f32 %v356_v7, %v219_v3  ;;  %v6094_v3 = vcombine.high %v547_v62, %v549_v0  ;;  %v542_v5 = vld [vmem:[%s9188_s3 + $0x88] sm:$0xff]  ;;  %v543_v7 = vld [vmem:[%s9188_s3 + $0x90] sm:$0xff]  ;;  %v878_v62 = vld [vmem:[%s9188_s3 + $0x2e0] sm:$0xff] }
  0xfa   : > { %v358_v10 = vpop.f32.mrf.mxu0  ;;  %6756 = vtanh.f32 %v362_v6  ;;  %v544_v6 = vld [vmem:[%s9188_s3 + $0xc8] sm:$0xff] }
  0xfb   : > { %v366_v11 = vmul.f32 0.5, %v363_v9  ;;  %v364_v12 = vadd.f32 %v358_v10, %v220_v8  ;;  %v6088_v8 = vcombine.high %v542_v5, %v544_v6  ;;  %v545_v9 = vld [vmem:[%s9188_s3 + $0xd0] sm:$0xff]  ;;  %v6087_v10 = vcombine.low %v542_v5, %v544_v6  ;;  %v872_v6 = vld [vmem:[%s9188_s3 + $0x220] sm:$0xff] }
  0xfd   : > { %6758 = vtanh.f32 %v366_v11  ;;  %v6089_v11 = vcombine.low %v543_v7, %v545_v9 }
  0xfe   : > { %6760 = vtanh.f32 %v364_v12  ;;  %v6090_v12 = vcombine.high %v543_v7, %v545_v9  ;;  %v874_v7 = vld [vmem:[%s9188_s3 + $0x260] sm:$0xff] }
  0xff   : > { %v6134_v9 = vcombine.high %v872_v6, %v874_v7 }
 0x106   : > { %v6755_v13 = vpop.eup %6754 }
 0x107   : > { %v369_v14 = vadd.f32 1.0, %v6755_v13  ;;  %v6757_v15 = vpop.eup %6756  ;;  %v538_v13 = vld [vmem:[%s9188_s3 + $0x8] sm:$0xff] }
 0x108   : > { %v375_v22 = vsub.f32 %v6757_v15, %v7086_v19  ;;  %v539_v15 = vld [vmem:[%s9188_s3 + $0x10] sm:$0xff] }
 0x109   : > { %v371_v16 = vmul.f32 0.5, %v369_v14  ;;  %v540_v14 = vld [vmem:[%s9188_s3 + $0x48] sm:$0xff] }
 0x10a   : > { %v6759_v17 = vpop.eup %6758 }
 0x10b   : > { %v6761_v18 = vpop.eup %6760  ;;  %v370_v21 = vadd.f32 1.0, %v6759_v17  ;;  %v377_v25 = vmul.f32 %v375_v22, %v371_v16  ;;  %v6084_v16 = vcombine.high %v538_v13, %v540_v14  ;;  %v541_v17 = vld [vmem:[%s9188_s3 + $0x50] sm:$0xff] }
 0x10c   : > { %v376_v24 = vsub.f32 %v6761_v18, %v7088_v20  ;;  %v6083_v18 = vcombine.low %v538_v13, %v540_v14  ;;  %v6086_v22 = vcombine.high %v539_v15, %v541_v17  ;;  %v868_v14 = vld [vmem:[%s9188_s3 + $0x1a0] sm:$0xff] }
 0x10d   : > { %v372_v23 = vmul.f32 0.5, %v370_v21  ;;  %v7160_v27 = vadd.f32 %v377_v25, %v7086_v19  ;;  %v563_v19 = vld [vmem:[%s9188_s3 + $0x310] sm:$0xff]  ;;  %v6085_v21 = vcombine.low %v539_v15, %v541_v17  ;;  %v870_v15 = vld [vmem:[%s9188_s3 + $0x1e0] sm:$0xff] }
 0x10e   : > { %v6109_v34 = vcombine.low %v563_v19, %v565_v32  ;;  %v6110_v35 = vcombine.high %v563_v19, %v565_v32  ;;  %v6130_v17 = vcombine.high %v868_v14, %v870_v15 }
 0x10f   : > { %v378_v26 = vmul.f32 %v376_v24, %v372_v23  ;;  %v883_v23 = vld [vmem:[%s9188_s3 + $0x398] sm:$0xff] }
 0x110   : > { %v885_v24 = vld [vmem:[%s9188_s3 + $0x3d8] sm:$0xff] }
 0x111   : > { %v7163_v28 = vadd.f32 %v378_v26, %v7088_v20  ;;  %v6108_v20 = vcombine.high %v562_v30, %v564_v31  ;;  %v6143_v25 = vcombine.low %v883_v23, %v885_v24  ;;  %v6144_v26 = vcombine.high %v883_v23, %v885_v24  ;;  %v886_v30 = vld [vmem:[%s9188_s3 + $0x3e0] sm:$0xff] }
 0x112   : > { %v864_v24 = vld [vmem:[%s9188_s3 + $0x120] sm:$0xff] }
 0x113   : > { %v381_v29 = vpack.c.bf16 %v7163_v28, %v7160_v27  ;;  %732 = vmatprep.subr.bf16.mxu0 %v6108_v20 }
 0x114   : > { %733 = vmatpush1.bf16.msra.mxu0 %v6107_v33 }
 0x115   : > { %511 = vmatmul.mubr.bf16.vlgmr.msra.gmra.mxu1 %v381_v29  ;;  %734 = vmatprep.subr.bf16.mxu0 %v6104_v39  ;;  %v884_v29 = vld [vmem:[%s9188_s3 + $0x3a0] sm:$0xff] }
 0x116   : > { %774 = vmatpush1.bf16.msra.mxu1 %v6113_v60  ;;  %805 = vmatprep.mubr.bf16.mxu1 %v6986_v4  ;;  %v546_v60 = vld [vmem:[%s9188_s3 + $0x108] sm:$0xff]  ;;  %v6145_v31 = vcombine.low %v884_v29, %v886_v30  ;;  %v6146_v19 = vcombine.high %v884_v29, %v886_v30 }
 0x117   : > { %775 = vmatprep.subr.bf16.mxu1 %v6110_v35  ;;  %v6092_v63 = vcombine.high %v546_v60, %v548_v61  ;;  %v6091_v1 = vcombine.low %v546_v60, %v548_v61  ;;  %v876_v61 = vld [vmem:[%s9188_s3 + $0x2a0] sm:$0xff] }
 0x118   : > { %735 = vmatpush1.bf16.msra.mxu0 %v6103_v41  ;;  %v6138_v0 = vcombine.high %v876_v61, %v878_v62 }
 0x119   : > { %736 = vmatprep.subr.bf16.mxu0 %v6100_v47 }
 0x11a   : > { %776 = vmatpush1.bf16.msra.mxu1 %v6109_v34 }
 0x11b   : > { %777 = vmatprep.subr.bf16.mxu1 %v6106_v43 }
 0x11c   : > { %737 = vmatpush1.bf16.msra.mxu0 %v6099_v49 }
 0x11d   : > { %738 = vmatprep.subr.bf16.mxu0 %v6096_v55 }
 0x11e   : > { %778 = vmatpush1.bf16.msra.mxu1 %v6105_v42 }
 0x11f   : > { %779 = vmatprep.subr.bf16.mxu1 %v6102_v51 }
 0x120   : > { %739 = vmatpush1.bf16.msra.mxu0 %v6095_v57  ;;  %v6141_v57 = vcombine.low %v880_v53, %v882_v54 }
 0x121   : > { %740 = vmatprep.subr.bf16.mxu0 %v6092_v63 }
 0x122   : > { %780 = vmatpush1.bf16.msra.mxu1 %v6101_v50 }
 0x123   : > { %781 = vmatprep.subr.bf16.mxu1 %v6098_v59  ;;  %v877_v59 = vld [vmem:[%s9188_s3 + $0x2d8] sm:$0xff] }
 0x124   : > { %741 = vmatpush1.bf16.msra.mxu0 %v6091_v1  ;;  %v6137_v1 = vcombine.low %v876_v61, %v878_v62 }
 0x125   : > { %742 = vmatprep.subr.bf16.mxu0 %v6088_v8 }
 0x126   : > { %782 = vmatpush1.bf16.msra.mxu1 %v6097_v58  ;;  %v875_v58 = vld [vmem:[%s9188_s3 + $0x298] sm:$0xff] }
 0x127   : > { %783 = vmatprep.subr.bf16.mxu1 %v6094_v3  ;;  %v6136_v60 = vcombine.high %v875_v58, %v877_v59  ;;  %v6135_v63 = vcombine.low %v875_v58, %v877_v59  ;;  %v873_v3 = vld [vmem:[%s9188_s3 + $0x258] sm:$0xff] }
 0x128   : > { %743 = vmatpush1.bf16.msra.mxu0 %v6087_v10  ;;  %v6133_v10 = vcombine.low %v872_v6, %v874_v7 }
 0x129   : > { %744 = vmatprep.subr.bf16.mxu0 %v6084_v16 }
 0x12a   : > { %784 = vmatpush1.bf16.msra.mxu1 %v6093_v2  ;;  %v871_v2 = vld [vmem:[%s9188_s3 + $0x218] sm:$0xff] }
 0x12b   : > { %785 = vmatprep.subr.bf16.mxu1 %v6090_v12  ;;  %v6132_v5 = vcombine.high %v871_v2, %v873_v3  ;;  %v6131_v8 = vcombine.low %v871_v2, %v873_v3  ;;  %v869_v12 = vld [vmem:[%s9188_s3 + $0x1d8] sm:$0xff] }
 0x12c   : > { %745 = vmatpush1.bf16.msra.mxu0 %v6083_v18  ;;  %v6129_v18 = vcombine.low %v868_v14, %v870_v15  ;;  %v1182_v14 = vld [vmem:[%s9188_s3 + $0x328] sm:$0xff] }
 0x12d   : > { %1047 = vmatprep.subr.bf16.mxu0 %v6144_v26  ;;  %v1183_v15 = vld [vmem:[%s9188_s3 + $0x368] sm:$0xff] }
 0x12e   : > { %786 = vmatpush1.bf16.msra.mxu1 %v6089_v11  ;;  %v867_v11 = vld [vmem:[%s9188_s3 + $0x198] sm:$0xff] }
 0x12f   : > { %787 = vmatprep.subr.bf16.mxu1 %v6086_v22  ;;  %v6128_v13 = vcombine.high %v867_v11, %v869_v12  ;;  %v6127_v16 = vcombine.low %v867_v11, %v869_v12  ;;  %v865_v22 = vld [vmem:[%s9188_s3 + $0x158] sm:$0xff] }
 0x132   : > { %788 = vmatpush1.bf16.msra.mxu1 %v6085_v21  ;;  %v863_v21 = vld [vmem:[%s9188_s3 + $0x118] sm:$0xff] }
 0x133   : > { %1090 = vmatprep.subr.bf16.mxu1 %v6146_v19  ;;  %v6124_v23 = vcombine.high %v863_v21, %v865_v22  ;;  %v6123_v26 = vcombine.low %v863_v21, %v865_v22  ;;  %v861_v19 = vld [vmem:[%s9188_s3 + $0xd8] sm:$0xff] }
 0x1d5   : > { %v512_v20 = vpop.f32.mrf.mxu1 }
 0x1d6   : > { %v521_v32 = vmul.f32 0.5, %v512_v20 }
 0x1d7   : > { %v514_v33 = vpop.f32.mrf.mxu1 }
 0x1d8   : > { %6762 = vtanh.f32 %v521_v32  ;;  %v860_v32 = vld [vmem:[%s9188_s3 + $0xa0] sm:$0xff] }
 0x1d9   : > { %v516_v34 = vpop.f32.mrf.mxu1  ;;  %6764 = vtanh.f32 %v514_v33  ;;  %v862_v33 = vld [vmem:[%s9188_s3 + $0xe0] sm:$0xff] }
 0x1da   : > { %v522_v35 = vmul.f32 0.5, %v516_v34 }
 0x1db   : > { %v518_v36 = vpop.f32.mrf.mxu1 }
 0x1dc   : > { %6766 = vtanh.f32 %v522_v35  ;;  %v6122_v35 = vcombine.high %v860_v32, %v862_v33 }
 0x1dd   : > { %6768 = vtanh.f32 %v518_v36  ;;  %v6121_v36 = vcombine.low %v860_v32, %v862_v33  ;;  %v1176_v33 = vld [vmem:[%s9188_s3 + $0x1a8] sm:$0xff] }
 0x1e5   : > { %v6763_v37 = vpop.eup %6762 }
 0x1e6   : > { %v525_v38 = vadd.f32 1.0, %v6763_v37  ;;  %v6765_v39 = vpop.eup %6764  ;;  %v855_v37 = vld [vmem:[%s9188_s3 + $0x18] sm:$0xff] }
 0x1e7   : > { %v531_v43 = vsub.f32 %v6765_v39, %v7160_v27 }
 0x1e8   : > { %v527_v40 = vmul.f32 0.5, %v525_v38  ;;  %v857_v38 = vld [vmem:[%s9188_s3 + $0x58] sm:$0xff] }
 0x1e9   : > { %v6767_v41 = vpop.eup %6766  ;;  %v6116_v39 = vcombine.high %v855_v37, %v857_v38 }
 0x1ea   : > { %v6769_v42 = vpop.eup %6768  ;;  %v526_v44 = vadd.f32 1.0, %v6767_v41  ;;  %v533_v45 = vmul.f32 %v531_v43, %v527_v40  ;;  %v856_v40 = vld [vmem:[%s9188_s3 + $0x20] sm:$0xff] }
 0x1eb   : > { %v532_v47 = vsub.f32 %v6769_v42, %v7163_v28  ;;  %v858_v41 = vld [vmem:[%s9188_s3 + $0x60] sm:$0xff]  ;;  %v6115_v42 = vcombine.low %v855_v37, %v857_v38 }
 0x1ec   : > { %v528_v46 = vmul.f32 0.5, %v526_v44  ;;  %v7267_v49 = vadd.f32 %v533_v45, %v7160_v27  ;;  %v881_v27 = vld [vmem:[%s9188_s3 + $0x358] sm:$0xff]  ;;  %v6118_v43 = vcombine.high %v856_v40, %v858_v41  ;;  %v6117_v44 = vcombine.low %v856_v40, %v858_v41  ;;  %v1184_v45 = vld [vmem:[%s9188_s3 + $0x3a8] sm:$0xff] }
 0x1ed   : > { %v6139_v55 = vcombine.low %v879_v52, %v881_v27  ;;  %v1175_v40 = vld [vmem:[%s9188_s3 + $0x168] sm:$0xff] }
 0x1ee   : > { %v534_v48 = vmul.f32 %v532_v47, %v528_v46  ;;  %v1185_v46 = vld [vmem:[%s9188_s3 + $0x3e8] sm:$0xff] }
 0x1ef   : > { %v6162_v47 = vcombine.high %v1184_v45, %v1185_v46 }
 0x1f0   : > { %v7270_v50 = vadd.f32 %v534_v48, %v7163_v28  ;;  %v6140_v28 = vcombine.high %v879_v52, %v881_v27  ;;  %v6161_v48 = vcombine.low %v1184_v45, %v1185_v46  ;;  %v1341_v52 = vld [vmem:[%s9188_s3 + $0x3f0] sm:$0xff] }
 0x1f2   : > { %v537_v51 = vpack.c.bf16 %v7270_v50, %v7267_v49 }
 0x1f4   : > { %763 = vmatmul.mubr.bf16.vlgmr.msra.gmra.mxu0 %v537_v51  ;;  %806 = vmatmul.mubr.bf16.vlgmr.msra.gmra.mxu1 %v537_v51  ;;  %v1340_v51 = vld [vmem:[%s9188_s3 + $0x3b0] sm:$0xff] }
 0x1f5   : > { %1048 = vmatpush1.bf16.msra.mxu0 %v6143_v25  ;;  %1091 = vmatpush1.bf16.msra.mxu1 %v6145_v31  ;;  %v866_v25 = vld [vmem:[%s9188_s3 + $0x160] sm:$0xff]  ;;  %v859_v31 = vld [vmem:[%s9188_s3 + $0x98] sm:$0xff]  ;;  %v6177_v27 = vcombine.low %v1340_v51, %v1341_v52 }
 0x1f6   : > { %1079 = vmatprep.mubr.bf16.mxu0 %v6986_v4  ;;  %1122 = vmatprep.mubr.bf16.mxu1 %v6986_v4  ;;  %v6126_v29 = vcombine.high %v864_v24, %v866_v25  ;;  %v6125_v30 = vcombine.low %v864_v24, %v866_v25  ;;  %v6120_v20 = vcombine.high %v859_v31, %v861_v19  ;;  %v1180_v24 = vld [vmem:[%s9188_s3 + $0x2a8] sm:$0xff] }
 0x1f7   : > { %1049 = vmatprep.subr.bf16.mxu0 %v6140_v28  ;;  %1092 = vmatprep.subr.bf16.mxu1 %v6142_v56  ;;  %v6119_v34 = vcombine.low %v859_v31, %v861_v19  ;;  %v6178_v28 = vcombine.high %v1340_v51, %v1341_v52  ;;  %v1181_v25 = vld [vmem:[%s9188_s3 + $0x2e8] sm:$0xff] }
 0x1f8   : > { %v1179_v31 = vld [vmem:[%s9188_s3 + $0x268] sm:$0xff]  ;;  %v6157_v19 = vcombine.low %v1180_v24, %v1181_v25 }
 0x1f9   : > { %1050 = vmatpush1.bf16.msra.mxu0 %v6139_v55  ;;  %1093 = vmatpush1.bf16.msra.mxu1 %v6141_v57 }
 0x1fa   : > { %1051 = vmatprep.subr.bf16.mxu0 %v6136_v60  ;;  %1094 = vmatprep.subr.bf16.mxu1 %v6138_v0 }
 0x1fd   : > { %1052 = vmatpush1.bf16.msra.mxu0 %v6135_v63  ;;  %1095 = vmatpush1.bf16.msra.mxu1 %v6137_v1 }
 0x1fe   : > { %1053 = vmatprep.subr.bf16.mxu0 %v6132_v5  ;;  %1096 = vmatprep.subr.bf16.mxu1 %v6134_v9 }
 0x201   : > { %1054 = vmatpush1.bf16.msra.mxu0 %v6131_v8  ;;  %1097 = vmatpush1.bf16.msra.mxu1 %v6133_v10 }
 0x202   : > { %1055 = vmatprep.subr.bf16.mxu0 %v6128_v13  ;;  %1098 = vmatprep.subr.bf16.mxu1 %v6130_v17 }
 0x205   : > { %1056 = vmatpush1.bf16.msra.mxu0 %v6127_v16  ;;  %1099 = vmatpush1.bf16.msra.mxu1 %v6129_v18 }
 0x206   : > { %1057 = vmatprep.subr.bf16.mxu0 %v6124_v23  ;;  %1100 = vmatprep.subr.bf16.mxu1 %v6126_v29  ;;  %v6160_v23 = vcombine.high %v1182_v14, %v1183_v15  ;;  %v6158_v29 = vcombine.high %v1180_v24, %v1181_v25  ;;  %v1330_v25 = vld [vmem:[%s9188_s3 + $0x130] sm:$0xff] }
 0x209   : > { %1058 = vmatpush1.bf16.msra.mxu0 %v6123_v26  ;;  %1101 = vmatpush1.bf16.msra.mxu1 %v6125_v30  ;;  %v6159_v26 = vcombine.low %v1182_v14, %v1183_v15  ;;  %v1178_v30 = vld [vmem:[%s9188_s3 + $0x228] sm:$0xff]  ;;  %v1335_v14 = vld [vmem:[%s9188_s3 + $0x270] sm:$0xff] }
 0x20a   : > { %1059 = vmatprep.subr.bf16.mxu0 %v6120_v20  ;;  %1102 = vmatprep.subr.bf16.mxu1 %v6122_v35  ;;  %v6156_v20 = vcombine.high %v1178_v30, %v1179_v31 }
 0x20d   : > { %1060 = vmatpush1.bf16.msra.mxu0 %v6119_v34  ;;  %1103 = vmatpush1.bf16.msra.mxu1 %v6121_v36  ;;  %v1177_v34 = vld [vmem:[%s9188_s3 + $0x1e8] sm:$0xff]  ;;  %v6155_v36 = vcombine.low %v1178_v30, %v1179_v31  ;;  %v1328_v31 = vld [vmem:[%s9188_s3 + $0xb0] sm:$0xff] }
 0x20e   : > { %1061 = vmatprep.subr.bf16.mxu0 %v6116_v39  ;;  %1104 = vmatprep.subr.bf16.mxu1 %v6118_v43  ;;  %v6154_v38 = vcombine.high %v1176_v33, %v1177_v34  ;;  %v1174_v39 = vld [vmem:[%s9188_s3 + $0x128] sm:$0xff]  ;;  %v6153_v43 = vcombine.low %v1176_v33, %v1177_v34  ;;  %v1326_v33 = vld [vmem:[%s9188_s3 + $0x30] sm:$0xff] }
 0x20f   : > { %v6152_v45 = vcombine.high %v1174_v39, %v1175_v40  ;;  %v1327_v34 = vld [vmem:[%s9188_s3 + $0x70] sm:$0xff] }
 0x211   : > { %1062 = vmatpush1.bf16.msra.mxu0 %v6115_v42  ;;  %1105 = vmatpush1.bf16.msra.mxu1 %v6117_v44 }
 0x212   : > { %1266 = vmatprep.subr.bf16.mxu0 %v6162_v47  ;;  %1422 = vmatprep.subr.bf16.mxu1 %v6178_v28  ;;  %v1172_v47 = vld [vmem:[%s9188_s3 + $0xa8] sm:$0xff] }
 0x2b4   : > { %v764_v53 = vpop.f32.mrf.mxu0  ;;  %v807_v58 = vpop.f32.mrf.mxu1 }
 0x2b5   : > { %v816_v54 = vmul.f32 0.5, %v764_v53  ;;  %v832_v21 = vmul.f32 0.5, %v807_v58 }
 0x2b6   : > { %v766_v55 = vpop.f32.mrf.mxu0  ;;  %v809_v59 = vpop.f32.mrf.mxu1 }
 0x2b7   : > { %6770 = vtanh.f32 %v816_v54  ;;  %v824_v0 = vmax.f32 %v766_v55, 0.0  ;;  %v840_v10 = vmul.f32 0.5, %v809_v59  ;;  %v1170_v55 = vld [vmem:[%s9188_s3 + $0x28] sm:$0xff] }
 0x2b8   : > { %v768_v56 = vpop.f32.mrf.mxu0  ;;  %v811_v60 = vpop.f32.mrf.mxu1 }
 0x2b9   : > { %v817_v57 = vmul.f32 0.5, %v768_v56  ;;  %v826_v6 = vsub.f32 %v824_v0, %v7267_v49  ;;  %v833_v17 = vmul.f32 0.5, %v811_v60  ;;  %v1171_v56 = vld [vmem:[%s9188_s3 + $0x68] sm:$0xff] }
 0x2ba   : > { %v770_v62 = vpop.f32.mrf.mxu0  ;;  %v813_v1 = vpop.f32.mrf.mxu1  ;;  %v6147_v0 = vcombine.low %v1170_v55, %v1171_v56 }
 0x2bb   : > { %6772 = vtanh.f32 %v817_v57  ;;  %v825_v3 = vmax.f32 %v770_v62, 0.0  ;;  %v841_v8 = vmul.f32 0.5, %v813_v1  ;;  %v6148_v62 = vcombine.high %v1170_v55, %v1171_v56 }
 0x2bd   : > { %v827_v12 = vsub.f32 %v825_v3, %v7270_v50  ;;  %6774 = vtanh.f32 %v841_v8 }
 0x2be   : > { %6776 = vtanh.f32 %v840_v10  ;;  %v1337_v10 = vld [vmem:[%s9188_s3 + $0x2f0] sm:$0xff] }
 0x2bf   : > { %6778 = vtanh.f32 %v833_v17 }
 0x2c0   : > { %6780 = vtanh.f32 %v832_v21  ;;  %v1332_v21 = vld [vmem:[%s9188_s3 + $0x1b0] sm:$0xff] }
 0x2c4   : > { %v6771_v61 = vpop.eup %6770 }
 0x2c5   : > { %v820_v63 = vadd.f32 1.0, %v6771_v61 }
 0x2c7   : > { %v822_v2 = vmul.f32 0.5, %v820_v63 }
 0x2c8   : > { %v6773_v5 = vpop.eup %6772 }
 0x2c9   : > { %v821_v7 = vadd.f32 1.0, %v6773_v5  ;;  %v828_v9 = vmul.f32 %v826_v6, %v822_v2  ;;  %v1338_v5 = vld [vmem:[%s9188_s3 + $0x330] sm:$0xff] }
 0x2ca   : > { %v6775_v32 = vpop.eup %6774  ;;  %v1339_v6 = vld [vmem:[%s9188_s3 + $0x370] sm:$0xff] }
 0x2cb   : > { %v823_v11 = vmul.f32 0.5, %v821_v7  ;;  %v7381_v16 = vadd.f32 %v828_v9, %v7267_v49  ;;  %v6777_v35 = vpop.eup %6776  ;;  %v845_v37 = vadd.f32 1.0, %v6775_v32  ;;  %v6176_v7 = vcombine.high %v1338_v5, %v1339_v6  ;;  %v1336_v9 = vld [vmem:[%s9188_s3 + $0x2b0] sm:$0xff] }
 0x2cc   : > { %v844_v41 = vadd.f32 1.0, %v6777_v35  ;;  %v6779_v42 = vpop.eup %6778  ;;  %v6175_v8 = vcombine.low %v1338_v5, %v1339_v6  ;;  %v6164_v35 = vcombine.high %v1326_v33, %v1327_v34  ;;  %v1483_v5 = vld [vmem:[%s9188_s3 + $0x78] sm:$0xff] }
 0x2cd   : > { %v829_v13 = vmul.f32 %v827_v12, %v823_v11  ;;  %v847_v44 = vmul.f32 0.5, %v845_v37  ;;  %v6781_v46 = vpop.eup %6780  ;;  %v837_v52 = vadd.f32 1.0, %v6779_v42  ;;  %v6174_v11 = vcombine.high %v1336_v9, %v1337_v10  ;;  %v1496_v37 = vld [vmem:[%s9188_s3 + $0x3b8] sm:$0xff] }
 0x2ce   : > { %v846_v51 = vmul.f32 0.5, %v844_v41  ;;  %v836_v28 = vadd.f32 1.0, %v6781_v46  ;;  %v6173_v12 = vcombine.low %v1336_v9, %v1337_v10  ;;  %v1494_v41 = vld [vmem:[%s9188_s3 + $0x338] sm:$0xff] }
 0x2cf   : > { %v7384_v18 = vadd.f32 %v829_v13, %v7270_v50  ;;  %v849_v53 = vsub.f32 %v847_v44, %v7270_v50  ;;  %v839_v58 = vmul.f32 0.5, %v837_v52  ;;  %v1334_v13 = vld [vmem:[%s9188_s3 + $0x230] sm:$0xff]  ;;  %v1495_v42 = vld [vmem:[%s9188_s3 + $0x378] sm:$0xff] }
 0x2d0   : > { %v848_v57 = vsub.f32 %v846_v51, %v7267_v49  ;;  %v838_v60 = vmul.f32 0.5, %v836_v28  ;;  %v6172_v15 = vcombine.high %v1334_v13, %v1335_v14  ;;  %v6171_v17 = vcombine.low %v1334_v13, %v1335_v14  ;;  %v1493_v46 = vld [vmem:[%s9188_s3 + $0x2f8] sm:$0xff] }
 0x2d1   : > { %v854_v22 = vpack.c.bf16 %v7384_v18, %v7381_v16  ;;  %v851_v61 = vmul.f32 %v849_v53, %v839_v58  ;;  %v6191_v44 = vcombine.low %v1494_v41, %v1495_v42  ;;  %v1490_v51 = vld [vmem:[%s9188_s3 + $0x238] sm:$0xff] }
 0x2d2   : > { %v850_v63 = vmul.f32 %v848_v57, %v838_v60  ;;  %v1491_v52 = vld [vmem:[%s9188_s3 + $0x278] sm:$0xff] }
 0x2d3   : > { %1080 = vmatmul.mubr.bf16.vlgmr.msra.gmra.mxu0 %v854_v22  ;;  %1123 = vmatmul.mubr.bf16.vlgmr.msra.gmra.mxu1 %v854_v22  ;;  %v7429_v1 = vadd.f32 %v851_v61, %v7270_v50  ;;  %v1333_v22 = vld [vmem:[%s9188_s3 + $0x1f0] sm:$0xff]  ;;  %v6187_v28 = vcombine.low %v1490_v51, %v1491_v52  ;;  %v1488_v53 = vld [vmem:[%s9188_s3 + $0x1b8] sm:$0xff] }
 0x2d4   : > { %1267 = vmatpush1.bf16.msra.mxu0 %v6161_v48  ;;  %1298 = vmatprep.mubr.bf16.mxu0 %v6986_v4  ;;  %v1173_v48 = vld [vmem:[%s9188_s3 + $0xe8] sm:$0xff]  ;;  %v7432_v2 = vadd.f32 %v850_v63, %v7267_v49  ;;  %v6169_v24 = vcombine.low %v1332_v21, %v1333_v22  ;;  %v1486_v57 = vld [vmem:[%s9188_s3 + $0x138] sm:$0xff] }
 0x2d5   : > { %1268 = vmatprep.subr.bf16.mxu0 %v6160_v23  ;;  %1423 = vmatpush1.bf16.msra.mxu1 %v6177_v27  ;;  %v6151_v27 = vcombine.low %v1174_v39, %v1175_v40  ;;  %v6150_v54 = vcombine.high %v1172_v47, %v1173_v48  ;;  %v6149_v59 = vcombine.low %v1172_v47, %v1173_v48  ;;  %v1487_v58 = vld [vmem:[%s9188_s3 + $0x178] sm:$0xff] }
 0x2d6   : > { %1454 = vmatprep.mubr.bf16.mxu1 %v6986_v4  ;;  %v1169_v3 = vpack.c.bf16 %v7429_v1, %v7432_v2  ;;  %1424 = vmatprep.subr.bf16.mxu1 %v6176_v7  ;;  %v6170_v23 = vcombine.high %v1332_v21, %v1333_v22  ;;  %v6183_v60 = vcombine.low %v1486_v57, %v1487_v58  ;;  %v1484_v61 = vld [vmem:[%s9188_s3 + $0xb8] sm:$0xff] }
 0x2d8   : > { %1269 = vmatpush1.bf16.msra.mxu0 %v6159_v26  ;;  %v1331_v26 = vld [vmem:[%s9188_s3 + $0x170] sm:$0xff] }
 0x2d9   : > { %1270 = vmatprep.subr.bf16.mxu0 %v6158_v29  ;;  %1425 = vmatpush1.bf16.msra.mxu1 %v6175_v8  ;;  %v6168_v29 = vcombine.high %v1330_v25, %v1331_v26  ;;  %v6167_v30 = vcombine.low %v1330_v25, %v1331_v26 }
 0x2da   : > { %1426 = vmatprep.subr.bf16.mxu1 %v6174_v11 }
 0x2dc   : > { %1271 = vmatpush1.bf16.msra.mxu0 %v6157_v19  ;;  %v1329_v19 = vld [vmem:[%s9188_s3 + $0xf0] sm:$0xff] }
 0x2dd   : > { %1272 = vmatprep.subr.bf16.mxu0 %v6156_v20  ;;  %1427 = vmatpush1.bf16.msra.mxu1 %v6173_v12  ;;  %v6166_v20 = vcombine.high %v1328_v31, %v1329_v19  ;;  %v6165_v32 = vcombine.low %v1328_v31, %v1329_v19 }
 0x2de   : > { %1428 = vmatprep.subr.bf16.mxu1 %v6172_v15 }
 0x2e0   : > { %1273 = vmatpush1.bf16.msra.mxu0 %v6155_v36  ;;  %v6163_v36 = vcombine.low %v1326_v33, %v1327_v34 }
 0x2e1   : > { %1274 = vmatprep.subr.bf16.mxu0 %v6154_v38  ;;  %1429 = vmatpush1.bf16.msra.mxu1 %v6171_v17  ;;  %v1497_v38 = vld [vmem:[%s9188_s3 + $0x3f8] sm:$0xff] }
 0x2e2   : > { %1430 = vmatprep.subr.bf16.mxu1 %v6170_v23  ;;  %v6193_v39 = vcombine.low %v1496_v37, %v1497_v38  ;;  %v6194_v40 = vcombine.high %v1496_v37, %v1497_v38 }
 0x2e4   : > { %1275 = vmatpush1.bf16.msra.mxu0 %v6153_v43  ;;  %v6192_v43 = vcombine.high %v1494_v41, %v1495_v42 }
 0x2e5   : > { %1276 = vmatprep.subr.bf16.mxu0 %v6152_v45  ;;  %1431 = vmatpush1.bf16.msra.mxu1 %v6169_v24  ;;  %v1492_v45 = vld [vmem:[%s9188_s3 + $0x2b8] sm:$0xff] }
 0x2e6   : > { %1432 = vmatprep.subr.bf16.mxu1 %v6168_v29  ;;  %v6190_v47 = vcombine.high %v1492_v45, %v1493_v46  ;;  %v6189_v48 = vcombine.low %v1492_v45, %v1493_v46 }
 0x2e8   : > { %1277 = vmatpush1.bf16.msra.mxu0 %v6151_v27  ;;  %v6188_v27 = vcombine.high %v1490_v51, %v1491_v52 }
 0x2e9   : > { %1278 = vmatprep.subr.bf16.mxu0 %v6150_v54  ;;  %1433 = vmatpush1.bf16.msra.mxu1 %v6167_v30  ;;  %v1489_v54 = vld [vmem:[%s9188_s3 + $0x1f8] sm:$0xff] }
 0x2ea   : > { %1434 = vmatprep.subr.bf16.mxu1 %v6166_v20  ;;  %v6186_v55 = vcombine.high %v1488_v53, %v1489_v54  ;;  %v6185_v56 = vcombine.low %v1488_v53, %v1489_v54  ;;  %v6682_v53 = vld [vmem:[%s9187_s2 + $0x70] ss:$8 sps:$4 sm:$0xff]   ;;  %v6687_v54 = vld [vmem:[%s9187_s2 + $0x64] ss:$8 sps:$4 sm:$0xff]  }
 0x2ec   : > { %1279 = vmatpush1.bf16.msra.mxu0 %v6149_v59  ;;  %v6184_v59 = vcombine.high %v1486_v57, %v1487_v58  ;;  %v6688_v57 = vld [vmem:[%s9187_s2 + $0x50] ss:$8 sps:$4 sm:$0xff]   ;;  %v6693_v58 = vld [vmem:[%s9187_s2 + $0x44] ss:$8 sps:$4 sm:$0xff]  }
 0x2ed   : > { %1280 = vmatprep.subr.bf16.mxu0 %v6148_v62  ;;  %1435 = vmatpush1.bf16.msra.mxu1 %v6165_v32  ;;  %v1485_v62 = vld [vmem:[%s9188_s3 + $0xf8] sm:$0xff] }
 0x2ee   : > { %1436 = vmatprep.subr.bf16.mxu1 %v6164_v35  ;;  %v6182_v63 = vcombine.high %v1484_v61, %v1485_v62 }
 0x2f0   : > { %1281 = vmatpush1.bf16.msra.mxu0 %v6147_v0  ;;  %v6181_v0 = vcombine.low %v1484_v61, %v1485_v62  ;;  %v6694_v61 = vld [vmem:[%s9187_s2 + $0x30] ss:$8 sps:$4 sm:$0xff]   ;;  %v6699_v62 = vld [vmem:[%s9187_s2 + $0x24] ss:$8 sps:$4 sm:$0xff]  }
 0x2f1   : > { %1437 = vmatpush1.bf16.msra.mxu1 %v6163_v36  ;;  %1578 = vmatprep.subr.bf16.mxu0 %v6194_v40 }
 0x2f3   : > { %1299 = vmatmul.mubr.bf16.vlgmr.msra.gmra.mxu0 %v1169_v3  ;;  %v1482_v3 = vld [vmem:[%s9188_s3 + $0x38] sm:$0xff] }
 0x2f4   : > { %1610 = vmatprep.mubr.bf16.mxu0 %v6986_v4  ;;  %1579 = vmatpush1.bf16.msra.mxu0 %v6193_v39  ;;  %v6179_v6 = vcombine.low %v1482_v3, %v1483_v5  ;;  %v6180_v7 = vcombine.high %v1482_v3, %v1483_v5  ;;  %v6700_v3 = vld [vmem:[%s9187_s2 + $0x10] ss:$8 sps:$4 sm:$0xff]   ;;  %v6705_v5 = vld [vmem:[%s9187_s2 + $0x4] ss:$8 sps:$4 sm:$0xff]  }
 0x2f5   : > { %1580 = vmatprep.subr.bf16.mxu0 %v6192_v43 }
 0x2f8   : > { %1581 = vmatpush1.bf16.msra.mxu0 %v6191_v44 }
 0x2f9   : > { %1582 = vmatprep.subr.bf16.mxu0 %v6190_v47 }
 0x2fc   : > { %1583 = vmatpush1.bf16.msra.mxu0 %v6189_v48 }
 0x2fd   : > { %1584 = vmatprep.subr.bf16.mxu0 %v6188_v27 }
 0x300   : > { %1585 = vmatpush1.bf16.msra.mxu0 %v6187_v28  ;;  %v6684_v28 = vld [vmem:[%s9187_s2 + $0x74] ss:$8 sps:$4 sm:$0xff]  }
 0x301   : > { %1586 = vmatprep.subr.bf16.mxu0 %v6186_v55  ;;  %1759 = vmatprep.subr.bf16.mxu1 %v6684_v28  ;;  %v6685_v55 = vld [vmem:[%s9187_s2 + $0x60] ss:$8 sps:$4 sm:$0xff]  }
 0x304   : > { %1587 = vmatpush1.bf16.msra.mxu0 %v6185_v56  ;;  %v6690_v56 = vld [vmem:[%s9187_s2 + $0x54] ss:$8 sps:$4 sm:$0xff]  }
 0x305   : > { %1588 = vmatprep.subr.bf16.mxu0 %v6184_v59  ;;  %v6691_v59 = vld [vmem:[%s9187_s2 + $0x40] ss:$8 sps:$4 sm:$0xff]  }
 0x308   : > { %1589 = vmatpush1.bf16.msra.mxu0 %v6183_v60  ;;  %v6696_v60 = vld [vmem:[%s9187_s2 + $0x34] ss:$8 sps:$4 sm:$0xff]  }
 0x309   : > { %1590 = vmatprep.subr.bf16.mxu0 %v6182_v63  ;;  %v6697_v63 = vld [vmem:[%s9187_s2 + $0x20] ss:$8 sps:$4 sm:$0xff]  }
 0x30c   : > { %1591 = vmatpush1.bf16.msra.mxu0 %v6181_v0  ;;  %v6702_v0 = vld [vmem:[%s9187_s2 + $0x14] ss:$8 sps:$4 sm:$0xff]  }
 0x30d   : > { %1592 = vmatprep.subr.bf16.mxu0 %v6180_v7 }
 0x310   : > { %1593 = vmatpush1.bf16.msra.mxu0 %v6179_v6  ;;  %v6703_v6 = vld [vmem:[%s9187_s2] ss:$8 sps:$4 sm:$0xff]  }
 0x393   : > { %v1081_v8 = vpop.f32.mrf.mxu0  ;;  %v1124_v7 = vpop.f32.mrf.mxu1 }
 0x394   : > { %v1133_v9 = vmul.f32 0.5, %v1081_v8 }
 0x395   : > { %v1083_v10 = vpop.f32.mrf.mxu0  ;;  %v1126_v8 = vpop.f32.mrf.mxu1 }
 0x396   : > { %6782 = vtanh.f32 %v1133_v9  ;;  %v1141_v22 = vsub.f32 %v1083_v10, %v7381_v16 }
 0x397   : > { %v1085_v11 = vpop.f32.mrf.mxu0  ;;  %v1128_v9 = vpop.f32.mrf.mxu1 }
 0x398   : > { %v1134_v12 = vmul.f32 0.5, %v1085_v11 }
 0x399   : > { %v1087_v21 = vpop.f32.mrf.mxu0  ;;  %v1130_v10 = vpop.f32.mrf.mxu1 }
 0x39a   : > { %6784 = vtanh.f32 %v1134_v12  ;;  %v1142_v26 = vsub.f32 %v1087_v21, %v7384_v18  ;;  %v1156_v21 = vmul.f32 0.5, %v1130_v10 }
 0x3a3   : > { %v6783_v13 = vpop.eup %6782 }
 0x3a4   : > { %v1137_v14 = vadd.f32 1.0, %v6783_v13 }
 0x3a6   : > { %v1139_v15 = vmul.f32 0.5, %v1137_v14  ;;  %v1155_v14 = vmul.f32 0.5, %v1126_v8 }
 0x3a7   : > { %v6785_v17 = vpop.eup %6784 }
 0x3a8   : > { %v1138_v23 = vadd.f32 1.0, %v6785_v17  ;;  %v1143_v24 = vmul.f32 %v1141_v22, %v1139_v15  ;;  %v1147_v22 = vmul.f32 0.5, %v1124_v7 }
 0x3aa   : > { %v1140_v25 = vmul.f32 0.5, %v1138_v23  ;;  %v7530_v30 = vadd.f32 %v1143_v24, %v7381_v16  ;;  %v1148_v23 = vmul.f32 0.5, %v1128_v9 }
 0x3ac   : > { %v1144_v29 = vmul.f32 %v1142_v26, %v1140_v25 }
 0x3ae   : > { %v7533_v31 = vadd.f32 %v1144_v29, %v7384_v18 }
 0x3b0   : > { %v1325_v19 = vpack.c.bf16 %v7533_v31, %v7530_v30 }
 0x3b2   : > { %1455 = vmatmul.mubr.bf16.vlgmr.msra.gmra.mxu1 %v1325_v19 }
 0x3b3   : > { %v1300_v20 = vpop.f32.mrf.mxu0  ;;  %1791 = vmatprep.mubr.bf16.mxu1 %v6986_v4  ;;  %1760 = vmatpush1.bf16.msra.mxu1 %v6682_v53 }
 0x3b4   : > { %v1309_v32 = vmul.f32 0.5, %v1300_v20  ;;  %1761 = vmatprep.subr.bf16.mxu1 %v6687_v54 }
 0x3b5   : > { %v1302_v33 = vpop.f32.mrf.mxu0 }
 0x3b6   : > { %6786 = vtanh.f32 %v1309_v32 }
 0x3b7   : > { %v1304_v34 = vpop.f32.mrf.mxu0  ;;  %6788 = vtanh.f32 %v1302_v33  ;;  %1762 = vmatpush1.bf16.msra.mxu1 %v6685_v55 }
 0x3b8   : > { %v1310_v35 = vmul.f32 0.5, %v1304_v34  ;;  %1763 = vmatprep.subr.bf16.mxu1 %v6690_v56 }
 0x3b9   : > { %v1306_v36 = vpop.f32.mrf.mxu0 }
 0x3ba   : > { %6790 = vtanh.f32 %v1310_v35 }
 0x3bb   : > { %6792 = vtanh.f32 %v1306_v36  ;;  %1764 = vmatpush1.bf16.msra.mxu1 %v6688_v57 }
 0x3bc   : > { %1765 = vmatprep.subr.bf16.mxu1 %v6693_v58 }
 0x3bf   : > { %1766 = vmatpush1.bf16.msra.mxu1 %v6691_v59 }
 0x3c0   : > { %1767 = vmatprep.subr.bf16.mxu1 %v6696_v60 }
 0x3c3   : > { %v6787_v37 = vpop.eup %6786  ;;  %1768 = vmatpush1.bf16.msra.mxu1 %v6694_v61 }
 0x3c4   : > { %v1313_v38 = vadd.f32 1.0, %v6787_v37  ;;  %v6789_v39 = vpop.eup %6788  ;;  %1769 = vmatprep.subr.bf16.mxu1 %v6699_v62  ;;  %v1636_v62 = vadd.f32 %v7384_v18, %v7270_v50 }
 0x3c5   : > { %v1319_v43 = vsub.f32 %v6789_v39, %v7432_v2 }
 0x3c6   : > { %v1315_v40 = vmul.f32 0.5, %v1313_v38 }
 0x3c7   : > { %v6791_v41 = vpop.eup %6790  ;;  %1770 = vmatpush1.bf16.msra.mxu1 %v6697_v63 }
 0x3c8   : > { %v6793_v42 = vpop.eup %6792  ;;  %v1314_v44 = vadd.f32 1.0, %v6791_v41  ;;  %v1321_v45 = vmul.f32 %v1319_v43, %v1315_v40  ;;  %1771 = vmatprep.subr.bf16.mxu1 %v6702_v0 }
 0x3c9   : > { %v1320_v47 = vsub.f32 %v6793_v42, %v7429_v1 }
 0x3ca   : > { %v1316_v46 = vmul.f32 0.5, %v1314_v44  ;;  %v7541_v51 = vadd.f32 %v1321_v45, %v7432_v2 }
 0x3cb   : > { %1772 = vmatpush1.bf16.msra.mxu1 %v6700_v3 }
 0x3cc   : > { %v1322_v48 = vmul.f32 %v1320_v47, %v1316_v46  ;;  %1773 = vmatprep.subr.bf16.mxu1 %v6705_v5 }
 0x3ce   : > { %v7544_v52 = vadd.f32 %v1322_v48, %v7429_v1  ;;  %v1635_v48 = vadd.f32 %v7381_v16, %v7267_v49 }
 0x3cf   : > { %1774 = vmatpush1.bf16.msra.mxu1 %v6703_v6 }
 0x3d0   : > { %v1481_v27 = vpack.c.bf16 %v7544_v52, %v7541_v51  ;;  %v1637_v54 = vadd.f32 %v1635_v48, %v7432_v2  ;;  %v1638_v2 = vadd.f32 %v1636_v62, %v7429_v1  ;;  %v1830_v48 = vld [vmem:[%s9188_s3 + $0x1c0] sm:$0xff] }
 0x3d1   : > { %v1824_v62 = vld [vmem:[%s9188_s3 + $0x40] sm:$0xff] }
 0x3d2   : > { %1611 = vmatmul.mubr.bf16.vlgmr.msra.gmra.mxu0 %v1481_v27  ;;  %v1639_v60 = vadd.f32 %v1637_v54, %v7530_v30  ;;  %v1640_v9 = vadd.f32 %v1638_v2, %v7533_v31  ;;  %v1828_v54 = vld [vmem:[%s9188_s3 + $0x140] sm:$0xff]  ;;  %v2008_v2 = vld [vmem:[%s9188_s3 + $0x390] sm:$0xff] }
 0x3d3   : > { %1951 = vmatprep.mubr.bf16.mxu0 %v6986_v4 }
 0x3d4   : > { %v1641_v0 = vadd.f32 %v1639_v60, %v7541_v51 }
 0x472   : > { %v1456_v11 = vpop.f32.mrf.mxu1 }
 0x473   : > { %v1465_v13 = vmul.f32 0.5, %v1456_v11 }
 0x474   : > { %v1458_v12 = vpop.f32.mrf.mxu1 }
 0x475   : > { %6794 = vtanh.f32 %v1465_v13  ;;  %v1473_v34 = vmax.f32 %v1458_v12, 0.0 }
 0x476   : > { %v1460_v15 = vpop.f32.mrf.mxu1  ;;  %6796 = vtanh.f32 %v1155_v14  ;;  %v1642_v14 = vadd.f32 %v1640_v9, %v7544_v52 }
 0x477   : > { %v1466_v17 = vmul.f32 0.5, %v1460_v15  ;;  %v1475_v43 = vsub.f32 %v1473_v34, %v7530_v30 }
 0x478   : > { %v1462_v39 = vpop.f32.mrf.mxu1 }
 0x479   : > { %6798 = vtanh.f32 %v1466_v17  ;;  %v1474_v45 = vmax.f32 %v1462_v39, 0.0  ;;  %v1833_v39 = vld [vmem:[%s9188_s3 + $0x280] sm:$0xff] }
 0x47a   : > { %6800 = vtanh.f32 %v1156_v21 }
 0x47b   : > { %6802 = vtanh.f32 %v1147_v22  ;;  %v1476_v56 = vsub.f32 %v1474_v45, %v7533_v31 }
 0x47c   : > { %6804 = vtanh.f32 %v1148_v23 }
 0x482   : > { %v6795_v24 = vpop.eup %6794 }
 0x483   : > { %v6797_v26 = vpop.eup %6796  ;;  %v1469_v19 = vadd.f32 1.0, %v6795_v24 }
 0x484   : > { %v1159_v33 = vadd.f32 1.0, %v6797_v26 }
 0x485   : > { %v1471_v38 = vmul.f32 0.5, %v1469_v19 }
 0x486   : > { %v6799_v32 = vpop.eup %6798  ;;  %v1161_v42 = vmul.f32 0.5, %v1159_v33 }
 0x487   : > { %v6801_v37 = vpop.eup %6800  ;;  %v1470_v41 = vadd.f32 1.0, %v6799_v32  ;;  %v1477_v47 = vmul.f32 %v1475_v43, %v1471_v38  ;;  %v1831_v43 = vld [vmem:[%s9188_s3 + $0x200] sm:$0xff] }
 0x488   : > { %v6803_v40 = vpop.eup %6802  ;;  %v1160_v44 = vadd.f32 1.0, %v6801_v37  ;;  %v1163_v53 = vsub.f32 %v1161_v42, %v7381_v16 }
 0x489   : > { %v1151_v46 = vadd.f32 1.0, %v6803_v40  ;;  %v6805_v27 = vpop.eup %6804  ;;  %v1472_v28 = vmul.f32 0.5, %v1470_v41  ;;  %v1479_v59 = vadd.f32 %v1477_v47, %v7530_v30  ;;  %v1834_v40 = vld [vmem:[%s9188_s3 + $0x2c0] sm:$0xff] }
 0x48a   : > { %v1162_v55 = vmul.f32 0.5, %v1160_v44  ;;  %v1152_v58 = vadd.f32 1.0, %v6805_v27  ;;  %v6226_v41 = vcombine.high %v1833_v39, %v1834_v40  ;;  %v6225_v42 = vcombine.low %v1833_v39, %v1834_v40  ;;  %v1832_v44 = vld [vmem:[%s9188_s3 + $0x240] sm:$0xff]  ;;  %v2003_v39 = vld [vmem:[%s9188_s3 + $0x308] sm:$0xff] }
 0x48b   : > { %v1153_v57 = vmul.f32 0.5, %v1151_v46  ;;  %v1478_v61 = vmul.f32 %v1476_v56, %v1472_v28  ;;  %v1643_v7 = vadd.f32 %v1641_v0, %v1479_v59  ;;  %v6224_v45 = vcombine.high %v1831_v43, %v1832_v44  ;;  %v1829_v47 = vld [vmem:[%s9188_s3 + $0x180] sm:$0xff]  ;;  %v2007_v0 = vld [vmem:[%s9188_s3 + $0x388] sm:$0xff] }
 0x48c   : > { %v1164_v3 = vsub.f32 %v1162_v55, %v7384_v18  ;;  %v1154_v6 = vmul.f32 0.5, %v1152_v58  ;;  %v6223_v46 = vcombine.low %v1831_v43, %v1832_v44  ;;  %v6222_v27 = vcombine.high %v1829_v47, %v1830_v48  ;;  %v1826_v58 = vld [vmem:[%s9188_s3 + $0xc0] sm:$0xff]  ;;  %v2005_v40 = vld [vmem:[%s9188_s3 + $0x348] sm:$0xff] }
 0x48d   : > { %v1165_v63 = vmul.f32 %v1163_v53, %v1153_v57  ;;  %v1480_v8 = vadd.f32 %v1478_v61, %v7533_v31  ;;  %v6221_v28 = vcombine.low %v1829_v47, %v1830_v48  ;;  %v1827_v53 = vld [vmem:[%s9188_s3 + $0x100] sm:$0xff]  ;;  %v2000_v47 = vld [vmem:[%s9188_s3 + $0x290] sm:$0xff] }
 0x48e   : > { %v1166_v13 = vmul.f32 %v1164_v3, %v1154_v6  ;;  %v6220_v55 = vcombine.high %v1827_v53, %v1828_v54  ;;  %v6219_v56 = vcombine.low %v1827_v53, %v1828_v54  ;;  %v1825_v57 = vld [vmem:[%s9188_s3 + $0x80] sm:$0xff]  ;;  %v2009_v3 = vld [vmem:[%s9188_s3 + $0x3c8] sm:$0xff] }
 0x48f   : > { %v1167_v50 = vadd.f32 %v1165_v63, %v7381_v16  ;;  %v1644_v21 = vadd.f32 %v1642_v14, %v1480_v8  ;;  %v6218_v59 = vcombine.high %v1825_v57, %v1826_v58  ;;  %v6217_v60 = vcombine.low %v1825_v57, %v1826_v58  ;;  %v1823_v61 = vld [vmem:[%s9188_s3] sm:$0xff]  ;;  %v1996_v57 = vld [vmem:[%s9188_s3 + $0x210] sm:$0xff] }
 0x490   : > { %v6215_v63 = vcombine.low %v1823_v61, %v1824_v62  ;;  %v6260_v6 = vcombine.high %v2007_v0, %v2009_v3 }
 0x491   : > { %v1645_v17 = vadd.f32 %v1643_v7, %v1167_v50  ;;  %v2010_v7 = vld [vmem:[%s9188_s3 + $0x3d0] sm:$0xff] }
 0x492   : > { %v1612_v25 = vpop.f32.mrf.mxu0  ;;  %v6261_v8 = vcombine.low %v2008_v2, %v2010_v7  ;;  %v6262_v9 = vcombine.high %v2008_v2, %v2010_v7  ;;  %2171 = vmatprep.subr.bf16.mxu1 %v6260_v6  ;;  %v1994_v2 = vld [vmem:[%s9188_s3 + $0x1d0] sm:$0xff] }
 0x493   : > { %v1621_v29 = vmul.f32 0.5, %v1612_v25  ;;  %v1168_v25 = vadd.f32 %v1166_v13, %v7384_v18  ;;  %v1837_v18 = vld [vmem:[%s9188_s3 + $0x380] sm:$0xff]  ;;  %v6197_v13 = vld [vmem:[%s7023_s22 + $0x30] sm:$0xff] }
 0x494   : > { %v1614_v20 = vpop.f32.mrf.mxu0 }
 0x495   : > { %6806 = vtanh.f32 %v1621_v29  ;;  %v1629_v10 = vsub.f32 %v1614_v20, %v7541_v51  ;;  %v1646_v19 = vadd.f32 %v1644_v21, %v1168_v25 }
 0x496   : > { %v1616_v35 = vpop.f32.mrf.mxu0 }
 0x497   : > { %v1622_v36 = vmul.f32 0.5, %v1616_v35  ;;  %v1835_v35 = vld [vmem:[%s9188_s3 + $0x300] sm:$0xff] }
 0x498   : > { %v1618_v12 = vpop.f32.mrf.mxu0 }
 0x499   : > { %6808 = vtanh.f32 %v1622_v36  ;;  %v1630_v31 = vsub.f32 %v1618_v12, %v7544_v52  ;;  %v1836_v36 = vld [vmem:[%s9188_s3 + $0x340] sm:$0xff] }
 0x49a   : > { %v6228_v37 = vcombine.high %v1835_v35, %v1836_v36  ;;  %v6227_v38 = vcombine.low %v1835_v35, %v1836_v36 }
 0x4a2   : > { %v6807_v49 = vpop.eup %6806 }
 0x4a3   : > { %v1625_v5 = vadd.f32 1.0, %v6807_v49  ;;  %v6216_v49 = vcombine.high %v1823_v61, %v1824_v62 }
 0x4a5   : > { %v1627_v30 = vmul.f32 0.5, %v1625_v5  ;;  %v6259_v5 = vcombine.low %v2007_v0, %v2009_v3  ;;  %v1992_v0 = vld [vmem:[%s9188_s3 + $0x190] sm:$0xff] }
 0x4a6   : > { %v6809_v11 = vpop.eup %6808  ;;  %v6245_v6 = vcombine.low %v1992_v0, %v1994_v2  ;;  %v6246_v7 = vcombine.high %v1992_v0, %v1994_v2  ;;  %v2323_v0 = vld [vmem:[%s9188_s3 + $0x360] sm:$0xff] }
 0x4a7   : > { %v1631_v15 = vmul.f32 %v1629_v10, %v1627_v30  ;;  %v1626_v1 = vadd.f32 1.0, %v6809_v11  ;;  %v6195_v30 = vld [vmem:[%s7023_s22 + $0x20] sm:$0xff]  ;;  %v6196_v11 = vld [vmem:[%s7023_s22 + $0x28] sm:$0xff] }
 0x4a9   : > { %v1633_v22 = vadd.f32 %v1631_v15, %v7541_v51  ;;  %v1628_v23 = vmul.f32 0.5, %v1626_v1 }
 0x4ab   : > { %v1647_v24 = vadd.f32 %v1645_v17, %v1633_v22  ;;  %v1632_v26 = vmul.f32 %v1630_v31, %v1628_v23  ;;  %v6198_v17 = vld [vmem:[%s7023_s22 + $0x38] sm:$0xff] }
 0x4ad   : > { %v7618_v16 = vmul.f32 0.125, %v1647_v24  ;;  %v1634_v29 = vadd.f32 %v1632_v26, %v7544_v52  ;;  %v1838_v52 = vld [vmem:[%s9188_s3 + $0x3c0] sm:$0xff] }
 0x4ae   : > { %v6230_v33 = vcombine.high %v1837_v18, %v1838_v52  ;;  %v6229_v34 = vcombine.low %v1837_v18, %v1838_v52 }
 0x4af   : > { %1653 = vst [vmem:[%s7028_s25] sm:$0xff] %v7618_v16  ;;  %v1648_v20 = vadd.f32 %v1646_v19, %v1634_v29 }
 0x4b0   : > { %1919 = vmatprep.subr.bf16.mxu0 %v6230_v33 }
 0x4b1   : > { %v7623_v32 = vmul.f32 0.125, %v1648_v20  ;;  %1920 = vmatpush1.bf16.msra.mxu0 %v6229_v34 }
 0x4b2   : > { %1921 = vmatprep.subr.bf16.mxu0 %v6228_v37 }
 0x4b3   : > { %1654 = vst [vmem:[%s7028_s25 + $0x8] sm:$0xff] %v7623_v32  ;;  %v1662_v51 = vpack.c.bf16 %v7623_v32, %v7618_v16 }
 0x4b5   : > { %1792 = vmatmul.mubr.bf16.vlgmr.msra.gmra.mxu1 %v1662_v51  ;;  %1922 = vmatpush1.bf16.msra.mxu0 %v6227_v38 }
 0x4b6   : > { %2203 = vmatprep.mubr.bf16.mxu1 %v6986_v4  ;;  %1923 = vmatprep.subr.bf16.mxu0 %v6226_v41  ;;  %v2006_v41 = vld [vmem:[%s9188_s3 + $0x350] sm:$0xff] }
 0x4b7   : > { %2172 = vmatpush1.bf16.msra.mxu1 %v6259_v5 }
 0x4b9   : > { %1924 = vmatpush1.bf16.msra.mxu0 %v6225_v42  ;;  %v6255_v42 = vcombine.low %v2003_v39, %v2005_v40 }
 0x4ba   : > { %1925 = vmatprep.subr.bf16.mxu0 %v6224_v45  ;;  %v1999_v45 = vld [vmem:[%s9188_s3 + $0x288] sm:$0xff] }
 0x4bd   : > { %1926 = vmatpush1.bf16.msra.mxu0 %v6223_v46  ;;  %v2001_v46 = vld [vmem:[%s9188_s3 + $0x2c8] sm:$0xff] }
 0x4be   : > { %1927 = vmatprep.subr.bf16.mxu0 %v6222_v27  ;;  %v6252_v48 = vcombine.high %v1999_v45, %v2001_v46  ;;  %v2002_v27 = vld [vmem:[%s9188_s3 + $0x2d0] sm:$0xff] }
 0x4bf   : > { %v6253_v53 = vcombine.low %v2000_v47, %v2002_v27  ;;  %v6254_v54 = vcombine.high %v2000_v47, %v2002_v27 }
 0x4c1   : > { %1928 = vmatpush1.bf16.msra.mxu0 %v6221_v28  ;;  %v6251_v28 = vcombine.low %v1999_v45, %v2001_v46 }
 0x4c2   : > { %1929 = vmatprep.subr.bf16.mxu0 %v6220_v55  ;;  %v1995_v55 = vld [vmem:[%s9188_s3 + $0x208] sm:$0xff] }
 0x4c5   : > { %1930 = vmatpush1.bf16.msra.mxu0 %v6219_v56  ;;  %v1997_v56 = vld [vmem:[%s9188_s3 + $0x248] sm:$0xff] }
 0x4c6   : > { %1931 = vmatprep.subr.bf16.mxu0 %v6218_v59  ;;  %v6248_v58 = vcombine.high %v1995_v55, %v1997_v56  ;;  %v1998_v59 = vld [vmem:[%s9188_s3 + $0x250] sm:$0xff] }
 0x4c7   : > { %v6249_v61 = vcombine.low %v1996_v57, %v1998_v59  ;;  %v6250_v62 = vcombine.high %v1996_v57, %v1998_v59 }
 0x4c9   : > { %1932 = vmatpush1.bf16.msra.mxu0 %v6217_v60  ;;  %v6247_v60 = vcombine.low %v1995_v55, %v1997_v56 }
 0x4ca   : > { %1933 = vmatprep.subr.bf16.mxu0 %v6216_v49  ;;  %v1991_v49 = vld [vmem:[%s9188_s3 + $0x188] sm:$0xff] }
 0x4cd   : > { %1934 = vmatpush1.bf16.msra.mxu0 %v6215_v63  ;;  %v1993_v63 = vld [vmem:[%s9188_s3 + $0x1c8] sm:$0xff] }
 0x4ce   : > { %2214 = vmatprep.subr.bf16.mxu0 %v6262_v9  ;;  %v6244_v3 = vcombine.high %v1991_v49, %v1993_v63  ;;  %v6243_v5 = vcombine.low %v1991_v49, %v1993_v63  ;;  %v1989_v9 = vld [vmem:[%s9188_s3 + $0x148] sm:$0xff]  ;;  %v2320_v49 = vld [vmem:[%s9188_s3 + $0x318] sm:$0xff]  ;;  %v2321_v63 = vld [vmem:[%s9188_s3 + $0x320] sm:$0xff] }
 0x4cf   : > { %v6290_v2 = vcombine.high %v2321_v63, %v2323_v0 }
 0x575   : > { %v1793_v10 = vpop.f32.mrf.mxu1 }
 0x576   : > { %v1802_v50 = vadd.f32 %v6195_v30, %v1793_v10  ;;  %v1988_v30 = vld [vmem:[%s9188_s3 + $0x110] sm:$0xff] }
 0x577   : > { %v1795_v12 = vpop.f32.mrf.mxu1 }
 0x578   : > { %v1806_v14 = vmul.f32 0.5, %v1802_v50  ;;  %v1803_v15 = vadd.f32 %v6196_v11, %v1795_v12  ;;  %v1990_v11 = vld [vmem:[%s9188_s3 + $0x150] sm:$0xff] }
 0x579   : > { %v1797_v1 = vpop.f32.mrf.mxu1  ;;  %v6241_v12 = vcombine.low %v1988_v30, %v1990_v11 }
 0x57a   : > { %6810 = vtanh.f32 %v1806_v14  ;;  %v1804_v21 = vadd.f32 %v6197_v13, %v1797_v1  ;;  %v6242_v13 = vcombine.high %v1988_v30, %v1990_v11  ;;  %v1983_v14 = vld [vmem:[%s9188_s3 + $0x88] sm:$0xff]  ;;  %v1984_v1 = vld [vmem:[%s9188_s3 + $0x90] sm:$0xff]  ;;  %v2319_v30 = vld [vmem:[%s9188_s3 + $0x2e0] sm:$0xff] }
 0x57b   : > { %v1799_v22 = vpop.f32.mrf.mxu1  ;;  %6812 = vtanh.f32 %v1803_v15  ;;  %v1985_v15 = vld [vmem:[%s9188_s3 + $0xc8] sm:$0xff] }
 0x57c   : > { %v1807_v23 = vmul.f32 0.5, %v1804_v21  ;;  %v1805_v31 = vadd.f32 %v6198_v17, %v1799_v22  ;;  %v6236_v17 = vcombine.high %v1983_v14, %v1985_v15  ;;  %v1986_v21 = vld [vmem:[%s9188_s3 + $0xd0] sm:$0xff]  ;;  %v6235_v22 = vcombine.low %v1983_v14, %v1985_v15  ;;  %v2313_v15 = vld [vmem:[%s9188_s3 + $0x220] sm:$0xff] }
 0x57e   : > { %6814 = vtanh.f32 %v1807_v23  ;;  %v6237_v23 = vcombine.low %v1984_v1, %v1986_v21 }
 0x57f   : > { %6816 = vtanh.f32 %v1805_v31  ;;  %v6238_v31 = vcombine.high %v1984_v1, %v1986_v21  ;;  %v2315_v1 = vld [vmem:[%s9188_s3 + $0x260] sm:$0xff] }
 0x580   : > { %v6282_v21 = vcombine.high %v2313_v15, %v2315_v1 }
 0x587   : > { %v6811_v24 = vpop.eup %6810 }
 0x588   : > { %v1810_v25 = vadd.f32 1.0, %v6811_v24  ;;  %v6813_v26 = vpop.eup %6812  ;;  %v1979_v24 = vld [vmem:[%s9188_s3 + $0x8] sm:$0xff] }
 0x589   : > { %v1816_v51 = vsub.f32 %v6813_v26, %v7618_v16  ;;  %v1980_v26 = vld [vmem:[%s9188_s3 + $0x10] sm:$0xff] }
 0x58a   : > { %v1812_v29 = vmul.f32 0.5, %v1810_v25  ;;  %v1981_v25 = vld [vmem:[%s9188_s3 + $0x48] sm:$0xff] }
 0x58b   : > { %v6815_v19 = vpop.eup %6814 }
 0x58c   : > { %v6817_v20 = vpop.eup %6816  ;;  %v1811_v18 = vadd.f32 1.0, %v6815_v19  ;;  %v1818_v34 = vmul.f32 %v1816_v51, %v1812_v29  ;;  %v6232_v29 = vcombine.high %v1979_v24, %v1981_v25  ;;  %v1982_v19 = vld [vmem:[%s9188_s3 + $0x50] sm:$0xff] }
 0x58d   : > { %v1817_v33 = vsub.f32 %v6817_v20, %v7623_v32  ;;  %v6231_v20 = vcombine.low %v1979_v24, %v1981_v25  ;;  %v6233_v51 = vcombine.low %v1980_v26, %v1982_v19  ;;  %v2309_v25 = vld [vmem:[%s9188_s3 + $0x1a0] sm:$0xff] }
 0x58e   : > { %v1813_v52 = vmul.f32 0.5, %v1811_v18  ;;  %v7697_v36 = vadd.f32 %v1818_v34, %v7618_v16  ;;  %v2004_v16 = vld [vmem:[%s9188_s3 + $0x310] sm:$0xff]  ;;  %v6234_v18 = vcombine.high %v1980_v26, %v1982_v19  ;;  %v2311_v26 = vld [vmem:[%s9188_s3 + $0x1e0] sm:$0xff] }
 0x58f   : > { %v6257_v43 = vcombine.low %v2004_v16, %v2006_v41  ;;  %v6258_v44 = vcombine.high %v2004_v16, %v2006_v41  ;;  %v6278_v19 = vcombine.high %v2309_v25, %v2311_v26 }
 0x590   : > { %v1819_v35 = vmul.f32 %v1817_v33, %v1813_v52  ;;  %v2324_v52 = vld [vmem:[%s9188_s3 + $0x398] sm:$0xff] }
 0x591   : > { %v2326_v33 = vld [vmem:[%s9188_s3 + $0x3d8] sm:$0xff] }
 0x592   : > { %v7700_v37 = vadd.f32 %v1819_v35, %v7623_v32  ;;  %v6256_v32 = vcombine.high %v2003_v39, %v2005_v40  ;;  %v6291_v34 = vcombine.low %v2324_v52, %v2326_v33  ;;  %v6292_v35 = vcombine.high %v2324_v52, %v2326_v33  ;;  %v2327_v39 = vld [vmem:[%s9188_s3 + $0x3e0] sm:$0xff] }
 0x593   : > { %v2305_v33 = vld [vmem:[%s9188_s3 + $0x120] sm:$0xff] }
 0x594   : > { %v1822_v38 = vpack.c.bf16 %v7700_v37, %v7697_v36  ;;  %2173 = vmatprep.subr.bf16.mxu1 %v6256_v32 }
 0x595   : > { %2174 = vmatpush1.bf16.msra.mxu1 %v6255_v42 }
 0x596   : > { %1952 = vmatmul.mubr.bf16.vlgmr.msra.gmra.mxu0 %v1822_v38  ;;  %2175 = vmatprep.subr.bf16.mxu1 %v6252_v48  ;;  %v2325_v38 = vld [vmem:[%s9188_s3 + $0x3a0] sm:$0xff] }
 0x597   : > { %2215 = vmatpush1.bf16.msra.mxu0 %v6261_v8  ;;  %2246 = vmatprep.mubr.bf16.mxu0 %v6986_v4  ;;  %v1987_v8 = vld [vmem:[%s9188_s3 + $0x108] sm:$0xff]  ;;  %v6293_v40 = vcombine.low %v2325_v38, %v2327_v39  ;;  %v6294_v16 = vcombine.high %v2325_v38, %v2327_v39 }
 0x598   : > { %2216 = vmatprep.subr.bf16.mxu0 %v6258_v44  ;;  %v6240_v10 = vcombine.high %v1987_v8, %v1989_v9  ;;  %v6239_v50 = vcombine.low %v1987_v8, %v1989_v9  ;;  %v2317_v9 = vld [vmem:[%s9188_s3 + $0x2a0] sm:$0xff] }
 0x599   : > { %2176 = vmatpush1.bf16.msra.mxu1 %v6251_v28  ;;  %v6286_v11 = vcombine.high %v2317_v9, %v2319_v30 }
 0x59a   : > { %2177 = vmatprep.subr.bf16.mxu1 %v6248_v58 }
 0x59b   : > { %2217 = vmatpush1.bf16.msra.mxu0 %v6257_v43 }
 0x59c   : > { %2218 = vmatprep.subr.bf16.mxu0 %v6254_v54 }
 0x59d   : > { %2178 = vmatpush1.bf16.msra.mxu1 %v6247_v60 }
 0x59e   : > { %2179 = vmatprep.subr.bf16.mxu1 %v6244_v3 }
 0x59f   : > { %2219 = vmatpush1.bf16.msra.mxu0 %v6253_v53 }
 0x5a0   : > { %2220 = vmatprep.subr.bf16.mxu0 %v6250_v62 }
 0x5a1   : > { %2180 = vmatpush1.bf16.msra.mxu1 %v6243_v5  ;;  %v6289_v5 = vcombine.low %v2321_v63, %v2323_v0 }
 0x5a2   : > { %2181 = vmatprep.subr.bf16.mxu1 %v6240_v10 }
 0x5a3   : > { %2221 = vmatpush1.bf16.msra.mxu0 %v6249_v61 }
 0x5a4   : > { %2222 = vmatprep.subr.bf16.mxu0 %v6246_v7  ;;  %v2318_v7 = vld [vmem:[%s9188_s3 + $0x2d8] sm:$0xff] }
 0x5a5   : > { %2182 = vmatpush1.bf16.msra.mxu1 %v6239_v50  ;;  %v6285_v50 = vcombine.low %v2317_v9, %v2319_v30 }
 0x5a6   : > { %2183 = vmatprep.subr.bf16.mxu1 %v6236_v17 }
 0x5a7   : > { %2223 = vmatpush1.bf16.msra.mxu0 %v6245_v6  ;;  %v2316_v6 = vld [vmem:[%s9188_s3 + $0x298] sm:$0xff] }
 0x5a8   : > { %2224 = vmatprep.subr.bf16.mxu0 %v6242_v13  ;;  %v6284_v8 = vcombine.high %v2316_v6, %v2318_v7  ;;  %v6283_v10 = vcombine.low %v2316_v6, %v2318_v7  ;;  %v2314_v13 = vld [vmem:[%s9188_s3 + $0x258] sm:$0xff] }
 0x5a9   : > { %2184 = vmatpush1.bf16.msra.mxu1 %v6235_v22  ;;  %v6281_v22 = vcombine.low %v2313_v15, %v2315_v1 }
 0x5aa   : > { %2185 = vmatprep.subr.bf16.mxu1 %v6232_v29 }
 0x5ab   : > { %2225 = vmatpush1.bf16.msra.mxu0 %v6241_v12  ;;  %v2312_v12 = vld [vmem:[%s9188_s3 + $0x218] sm:$0xff] }
 0x5ac   : > { %2226 = vmatprep.subr.bf16.mxu0 %v6238_v31  ;;  %v6280_v14 = vcombine.high %v2312_v12, %v2314_v13  ;;  %v6279_v17 = vcombine.low %v2312_v12, %v2314_v13  ;;  %v2310_v31 = vld [vmem:[%s9188_s3 + $0x1d8] sm:$0xff] }
 0x5ad   : > { %2186 = vmatpush1.bf16.msra.mxu1 %v6231_v20  ;;  %v6277_v20 = vcombine.low %v2309_v25, %v2311_v26  ;;  %v2623_v25 = vld [vmem:[%s9188_s3 + $0x328] sm:$0xff] }
 0x5ae   : > { %2488 = vmatprep.subr.bf16.mxu1 %v6292_v35  ;;  %v2624_v26 = vld [vmem:[%s9188_s3 + $0x368] sm:$0xff] }
 0x5af   : > { %2227 = vmatpush1.bf16.msra.mxu0 %v6237_v23  ;;  %v2308_v23 = vld [vmem:[%s9188_s3 + $0x198] sm:$0xff] }
 0x5b0   : > { %2228 = vmatprep.subr.bf16.mxu0 %v6234_v18  ;;  %v6276_v24 = vcombine.high %v2308_v23, %v2310_v31  ;;  %v6275_v29 = vcombine.low %v2308_v23, %v2310_v31  ;;  %v2306_v18 = vld [vmem:[%s9188_s3 + $0x158] sm:$0xff] }
 0x5b3   : > { %2229 = vmatpush1.bf16.msra.mxu0 %v6233_v51  ;;  %v2304_v51 = vld [vmem:[%s9188_s3 + $0x118] sm:$0xff] }
 0x5b4   : > { %2531 = vmatprep.subr.bf16.mxu0 %v6294_v16  ;;  %v6272_v52 = vcombine.high %v2304_v51, %v2306_v18  ;;  %v6271_v35 = vcombine.low %v2304_v51, %v2306_v18  ;;  %v2302_v16 = vld [vmem:[%s9188_s3 + $0xd8] sm:$0xff] }
 0x656   : > { %v1953_v32 = vpop.f32.mrf.mxu0 }
 0x657   : > { %v1962_v41 = vmul.f32 0.5, %v1953_v32 }
 0x658   : > { %v1955_v42 = vpop.f32.mrf.mxu0 }
 0x659   : > { %6818 = vtanh.f32 %v1962_v41  ;;  %v2301_v41 = vld [vmem:[%s9188_s3 + $0xa0] sm:$0xff] }
 0x65a   : > { %v1957_v43 = vpop.f32.mrf.mxu0  ;;  %6820 = vtanh.f32 %v1955_v42  ;;  %v2303_v42 = vld [vmem:[%s9188_s3 + $0xe0] sm:$0xff] }
 0x65b   : > { %v1963_v44 = vmul.f32 0.5, %v1957_v43 }
 0x65c   : > { %v1959_v45 = vpop.f32.mrf.mxu0 }
 0x65d   : > { %6822 = vtanh.f32 %v1963_v44  ;;  %v6270_v44 = vcombine.high %v2301_v41, %v2303_v42 }
 0x65e   : > { %6824 = vtanh.f32 %v1959_v45  ;;  %v6269_v45 = vcombine.low %v2301_v41, %v2303_v42  ;;  %v2617_v42 = vld [vmem:[%s9188_s3 + $0x1a8] sm:$0xff] }
 0x666   : > { %v6819_v46 = vpop.eup %6818 }
 0x667   : > { %v1966_v47 = vadd.f32 1.0, %v6819_v46  ;;  %v6821_v48 = vpop.eup %6820  ;;  %v2296_v46 = vld [vmem:[%s9188_s3 + $0x18] sm:$0xff] }
 0x668   : > { %v1972_v54 = vsub.f32 %v6821_v48, %v7697_v36 }
 0x669   : > { %v1968_v27 = vmul.f32 0.5, %v1966_v47  ;;  %v2298_v47 = vld [vmem:[%s9188_s3 + $0x58] sm:$0xff] }
 0x66a   : > { %v6823_v28 = vpop.eup %6822  ;;  %v6264_v48 = vcombine.high %v2296_v46, %v2298_v47 }
 0x66b   : > { %v6825_v53 = vpop.eup %6824  ;;  %v1967_v55 = vadd.f32 1.0, %v6823_v28  ;;  %v1974_v56 = vmul.f32 %v1972_v54, %v1968_v27  ;;  %v2297_v27 = vld [vmem:[%s9188_s3 + $0x20] sm:$0xff] }
 0x66c   : > { %v1973_v58 = vsub.f32 %v6825_v53, %v7700_v37  ;;  %v2299_v28 = vld [vmem:[%s9188_s3 + $0x60] sm:$0xff]  ;;  %v6263_v53 = vcombine.low %v2296_v46, %v2298_v47 }
 0x66d   : > { %v1969_v57 = vmul.f32 0.5, %v1967_v55  ;;  %v7804_v60 = vadd.f32 %v1974_v56, %v7697_v36  ;;  %v2322_v36 = vld [vmem:[%s9188_s3 + $0x358] sm:$0xff]  ;;  %v6266_v54 = vcombine.high %v2297_v27, %v2299_v28  ;;  %v6265_v55 = vcombine.low %v2297_v27, %v2299_v28  ;;  %v2625_v56 = vld [vmem:[%s9188_s3 + $0x3a8] sm:$0xff] }
 0x66e   : > { %v6287_v3 = vcombine.low %v2320_v49, %v2322_v36  ;;  %v2616_v27 = vld [vmem:[%s9188_s3 + $0x168] sm:$0xff] }
 0x66f   : > { %v1975_v59 = vmul.f32 %v1973_v58, %v1969_v57  ;;  %v2626_v57 = vld [vmem:[%s9188_s3 + $0x3e8] sm:$0xff] }
 0x670   : > { %v6310_v58 = vcombine.high %v2625_v56, %v2626_v57 }
 0x671   : > { %v7807_v61 = vadd.f32 %v1975_v59, %v7700_v37  ;;  %v6288_v37 = vcombine.high %v2320_v49, %v2322_v36  ;;  %v6309_v59 = vcombine.low %v2625_v56, %v2626_v57  ;;  %v2782_v49 = vld [vmem:[%s9188_s3 + $0x3f0] sm:$0xff] }
 0x673   : > { %v1978_v62 = vpack.c.bf16 %v7807_v61, %v7804_v60 }
 0x675   : > { %2204 = vmatmul.mubr.bf16.vlgmr.msra.gmra.mxu1 %v1978_v62  ;;  %2247 = vmatmul.mubr.bf16.vlgmr.msra.gmra.mxu0 %v1978_v62  ;;  %v2781_v62 = vld [vmem:[%s9188_s3 + $0x3b0] sm:$0xff] }
 0x676   : > { %2489 = vmatpush1.bf16.msra.mxu1 %v6291_v34  ;;  %2532 = vmatpush1.bf16.msra.mxu0 %v6293_v40  ;;  %v2307_v34 = vld [vmem:[%s9188_s3 + $0x160] sm:$0xff]  ;;  %v2300_v40 = vld [vmem:[%s9188_s3 + $0x98] sm:$0xff]  ;;  %v6325_v36 = vcombine.low %v2781_v62, %v2782_v49 }
 0x677   : > { %2520 = vmatprep.mubr.bf16.mxu1 %v6986_v4  ;;  %2563 = vmatprep.mubr.bf16.mxu0 %v6986_v4  ;;  %v6274_v38 = vcombine.high %v2305_v33, %v2307_v34  ;;  %v6273_v39 = vcombine.low %v2305_v33, %v2307_v34  ;;  %v6268_v32 = vcombine.high %v2300_v40, %v2302_v16  ;;  %v2621_v33 = vld [vmem:[%s9188_s3 + $0x2a8] sm:$0xff] }
 0x678   : > { %2490 = vmatprep.subr.bf16.mxu1 %v6288_v37  ;;  %2533 = vmatprep.subr.bf16.mxu0 %v6290_v2  ;;  %v6267_v43 = vcombine.low %v2300_v40, %v2302_v16  ;;  %v6326_v37 = vcombine.high %v2781_v62, %v2782_v49  ;;  %v2622_v34 = vld [vmem:[%s9188_s3 + $0x2e8] sm:$0xff] }
 0x679   : > { %v2620_v40 = vld [vmem:[%s9188_s3 + $0x268] sm:$0xff]  ;;  %v6305_v16 = vcombine.low %v2621_v33, %v2622_v34 }
 0x67a   : > { %2491 = vmatpush1.bf16.msra.mxu1 %v6287_v3  ;;  %2534 = vmatpush1.bf16.msra.mxu0 %v6289_v5 }
 0x67b   : > { %2492 = vmatprep.subr.bf16.mxu1 %v6284_v8  ;;  %2535 = vmatprep.subr.bf16.mxu0 %v6286_v11 }
 0x67e   : > { %2493 = vmatpush1.bf16.msra.mxu1 %v6283_v10  ;;  %2536 = vmatpush1.bf16.msra.mxu0 %v6285_v50 }
 0x67f   : > { %2494 = vmatprep.subr.bf16.mxu1 %v6280_v14  ;;  %2537 = vmatprep.subr.bf16.mxu0 %v6282_v21 }
 0x682   : > { %2495 = vmatpush1.bf16.msra.mxu1 %v6279_v17  ;;  %2538 = vmatpush1.bf16.msra.mxu0 %v6281_v22 }
 0x683   : > { %2496 = vmatprep.subr.bf16.mxu1 %v6276_v24  ;;  %2539 = vmatprep.subr.bf16.mxu0 %v6278_v19 }
 0x686   : > { %2497 = vmatpush1.bf16.msra.mxu1 %v6275_v29  ;;  %2540 = vmatpush1.bf16.msra.mxu0 %v6277_v20 }
 0x687   : > { %2498 = vmatprep.subr.bf16.mxu1 %v6272_v52  ;;  %2541 = vmatprep.subr.bf16.mxu0 %v6274_v38  ;;  %v6308_v52 = vcombine.high %v2623_v25, %v2624_v26  ;;  %v6306_v38 = vcombine.high %v2621_v33, %v2622_v34  ;;  %v2771_v34 = vld [vmem:[%s9188_s3 + $0x130] sm:$0xff] }
 0x68a   : > { %2499 = vmatpush1.bf16.msra.mxu1 %v6271_v35  ;;  %2542 = vmatpush1.bf16.msra.mxu0 %v6273_v39  ;;  %v6307_v35 = vcombine.low %v2623_v25, %v2624_v26  ;;  %v2619_v39 = vld [vmem:[%s9188_s3 + $0x228] sm:$0xff]  ;;  %v2776_v25 = vld [vmem:[%s9188_s3 + $0x270] sm:$0xff] }
 0x68b   : > { %2500 = vmatprep.subr.bf16.mxu1 %v6268_v32  ;;  %2543 = vmatprep.subr.bf16.mxu0 %v6270_v44  ;;  %v6304_v32 = vcombine.high %v2619_v39, %v2620_v40 }
 0x68e   : > { %2501 = vmatpush1.bf16.msra.mxu1 %v6267_v43  ;;  %2544 = vmatpush1.bf16.msra.mxu0 %v6269_v45  ;;  %v2618_v43 = vld [vmem:[%s9188_s3 + $0x1e8] sm:$0xff]  ;;  %v6303_v45 = vcombine.low %v2619_v39, %v2620_v40  ;;  %v2769_v40 = vld [vmem:[%s9188_s3 + $0xb0] sm:$0xff] }
 0x68f   : > { %2502 = vmatprep.subr.bf16.mxu1 %v6264_v48  ;;  %2545 = vmatprep.subr.bf16.mxu0 %v6266_v54  ;;  %v6302_v47 = vcombine.high %v2617_v42, %v2618_v43  ;;  %v2615_v48 = vld [vmem:[%s9188_s3 + $0x128] sm:$0xff]  ;;  %v6301_v54 = vcombine.low %v2617_v42, %v2618_v43  ;;  %v2767_v42 = vld [vmem:[%s9188_s3 + $0x30] sm:$0xff] }
 0x690   : > { %v6300_v56 = vcombine.high %v2615_v48, %v2616_v27  ;;  %v2768_v43 = vld [vmem:[%s9188_s3 + $0x70] sm:$0xff] }
 0x692   : > { %2503 = vmatpush1.bf16.msra.mxu1 %v6263_v53  ;;  %2546 = vmatpush1.bf16.msra.mxu0 %v6265_v55 }
 0x693   : > { %2707 = vmatprep.subr.bf16.mxu1 %v6310_v58  ;;  %2863 = vmatprep.subr.bf16.mxu0 %v6326_v37  ;;  %v2613_v58 = vld [vmem:[%s9188_s3 + $0xa8] sm:$0xff] }
 0x735   : > { %v2205_v63 = vpop.f32.mrf.mxu1  ;;  %v2248_v6 = vpop.f32.mrf.mxu0 }
 0x736   : > { %v2257_v0 = vmul.f32 0.5, %v2205_v63  ;;  %v2273_v51 = vmul.f32 0.5, %v2248_v6 }
 0x737   : > { %v2207_v3 = vpop.f32.mrf.mxu1  ;;  %v2250_v7 = vpop.f32.mrf.mxu0 }
 0x738   : > { %6826 = vtanh.f32 %v2257_v0  ;;  %v2265_v11 = vmax.f32 %v2207_v3, 0.0  ;;  %v2281_v22 = vmul.f32 0.5, %v2250_v7  ;;  %v2611_v3 = vld [vmem:[%s9188_s3 + $0x28] sm:$0xff] }
 0x739   : > { %v2209_v2 = vpop.f32.mrf.mxu1  ;;  %v2252_v8 = vpop.f32.mrf.mxu0 }
 0x73a   : > { %v2258_v5 = vmul.f32 0.5, %v2209_v2  ;;  %v2267_v15 = vsub.f32 %v2265_v11, %v7804_v60  ;;  %v2274_v19 = vmul.f32 0.5, %v2252_v8  ;;  %v2612_v2 = vld [vmem:[%s9188_s3 + $0x68] sm:$0xff] }
 0x73b   : > { %v2211_v30 = vpop.f32.mrf.mxu1  ;;  %v2254_v50 = vpop.f32.mrf.mxu0  ;;  %v6295_v11 = vcombine.low %v2611_v3, %v2612_v2 }
 0x73c   : > { %6828 = vtanh.f32 %v2258_v5  ;;  %v2266_v13 = vmax.f32 %v2211_v30, 0.0  ;;  %v2282_v17 = vmul.f32 0.5, %v2254_v50  ;;  %v6296_v30 = vcombine.high %v2611_v3, %v2612_v2 }
 0x73e   : > { %v2268_v31 = vsub.f32 %v2266_v13, %v7807_v61  ;;  %6830 = vtanh.f32 %v2282_v17 }
 0x73f   : > { %6832 = vtanh.f32 %v2281_v22  ;;  %v2778_v22 = vld [vmem:[%s9188_s3 + $0x2f0] sm:$0xff] }
 0x740   : > { %6834 = vtanh.f32 %v2274_v19 }
 0x741   : > { %6836 = vtanh.f32 %v2273_v51  ;;  %v2773_v51 = vld [vmem:[%s9188_s3 + $0x1b0] sm:$0xff] }
 0x745   : > { %v6827_v9 = vpop.eup %6826 }
 0x746   : > { %v2261_v10 = vadd.f32 1.0, %v6827_v9 }
 0x748   : > { %v2263_v12 = vmul.f32 0.5, %v2261_v10 }
 0x749   : > { %v6829_v14 = vpop.eup %6828 }
 0x74a   : > { %v2262_v1 = vadd.f32 1.0, %v6829_v14  ;;  %v2269_v21 = vmul.f32 %v2267_v15, %v2263_v12  ;;  %v2779_v14 = vld [vmem:[%s9188_s3 + $0x330] sm:$0xff] }
 0x74b   : > { %v6831_v41 = vpop.eup %6830  ;;  %v2780_v15 = vld [vmem:[%s9188_s3 + $0x370] sm:$0xff] }
 0x74c   : > { %v2264_v23 = vmul.f32 0.5, %v2262_v1  ;;  %v7918_v29 = vadd.f32 %v2269_v21, %v7804_v60  ;;  %v6833_v44 = vpop.eup %6832  ;;  %v2286_v46 = vadd.f32 1.0, %v6831_v41  ;;  %v6324_v1 = vcombine.high %v2779_v14, %v2780_v15  ;;  %v2777_v21 = vld [vmem:[%s9188_s3 + $0x2b0] sm:$0xff] }
 0x74d   : > { %v2285_v28 = vadd.f32 1.0, %v6833_v44  ;;  %v6835_v53 = vpop.eup %6834  ;;  %v6323_v17 = vcombine.low %v2779_v14, %v2780_v15  ;;  %v6312_v44 = vcombine.high %v2767_v42, %v2768_v43  ;;  %v2924_v14 = vld [vmem:[%s9188_s3 + $0x78] sm:$0xff] }
 0x74e   : > { %v2270_v24 = vmul.f32 %v2268_v31, %v2264_v23  ;;  %v2288_v55 = vmul.f32 0.5, %v2286_v46  ;;  %v6837_v57 = vpop.eup %6836  ;;  %v2278_v49 = vadd.f32 1.0, %v6835_v53  ;;  %v6322_v23 = vcombine.high %v2777_v21, %v2778_v22  ;;  %v2937_v46 = vld [vmem:[%s9188_s3 + $0x3b8] sm:$0xff] }
 0x74f   : > { %v2287_v62 = vmul.f32 0.5, %v2285_v28  ;;  %v2277_v37 = vadd.f32 1.0, %v6837_v57  ;;  %v6321_v31 = vcombine.low %v2777_v21, %v2778_v22  ;;  %v2935_v28 = vld [vmem:[%s9188_s3 + $0x338] sm:$0xff] }
 0x750   : > { %v7921_v20 = vadd.f32 %v2270_v24, %v7807_v61  ;;  %v2290_v63 = vsub.f32 %v2288_v55, %v7807_v61  ;;  %v2280_v6 = vmul.f32 0.5, %v2278_v49  ;;  %v2775_v24 = vld [vmem:[%s9188_s3 + $0x230] sm:$0xff]  ;;  %v2936_v53 = vld [vmem:[%s9188_s3 + $0x378] sm:$0xff] }
 0x751   : > { %v2289_v5 = vsub.f32 %v2287_v62, %v7804_v60  ;;  %v2279_v8 = vmul.f32 0.5, %v2277_v37  ;;  %v6320_v26 = vcombine.high %v2775_v24, %v2776_v25  ;;  %v6319_v19 = vcombine.low %v2775_v24, %v2776_v25  ;;  %v2934_v57 = vld [vmem:[%s9188_s3 + $0x2f8] sm:$0xff] }
 0x752   : > { %v2295_v18 = vpack.c.bf16 %v7921_v20, %v7918_v29  ;;  %v2292_v9 = vmul.f32 %v2290_v63, %v2280_v6  ;;  %v6339_v55 = vcombine.low %v2935_v28, %v2936_v53  ;;  %v2931_v62 = vld [vmem:[%s9188_s3 + $0x238] sm:$0xff] }
 0x753   : > { %v2291_v10 = vmul.f32 %v2289_v5, %v2279_v8  ;;  %v2932_v49 = vld [vmem:[%s9188_s3 + $0x278] sm:$0xff] }
 0x754   : > { %2521 = vmatmul.mubr.bf16.vlgmr.msra.gmra.mxu1 %v2295_v18  ;;  %2564 = vmatmul.mubr.bf16.vlgmr.msra.gmra.mxu0 %v2295_v18  ;;  %v7966_v50 = vadd.f32 %v2292_v9, %v7807_v61  ;;  %v2774_v18 = vld [vmem:[%s9188_s3 + $0x1f0] sm:$0xff]  ;;  %v6335_v37 = vcombine.low %v2931_v62, %v2932_v49  ;;  %v2929_v63 = vld [vmem:[%s9188_s3 + $0x1b8] sm:$0xff] }
 0x755   : > { %2708 = vmatpush1.bf16.msra.mxu1 %v6309_v59  ;;  %2739 = vmatprep.mubr.bf16.mxu1 %v6986_v4  ;;  %v2614_v59 = vld [vmem:[%s9188_s3 + $0xe8] sm:$0xff]  ;;  %v7969_v12 = vadd.f32 %v2291_v10, %v7804_v60  ;;  %v6317_v33 = vcombine.low %v2773_v51, %v2774_v18  ;;  %v2927_v5 = vld [vmem:[%s9188_s3 + $0x138] sm:$0xff] }
 0x756   : > { %2709 = vmatprep.subr.bf16.mxu1 %v6308_v52  ;;  %2864 = vmatpush1.bf16.msra.mxu0 %v6325_v36  ;;  %v6299_v36 = vcombine.low %v2615_v48, %v2616_v27  ;;  %v6298_v0 = vcombine.high %v2613_v58, %v2614_v59  ;;  %v6297_v7 = vcombine.low %v2613_v58, %v2614_v59  ;;  %v2928_v6 = vld [vmem:[%s9188_s3 + $0x178] sm:$0xff] }
 0x757   : > { %2895 = vmatprep.mubr.bf16.mxu0 %v6986_v4  ;;  %v2610_v13 = vpack.c.bf16 %v7966_v50, %v7969_v12  ;;  %2865 = vmatprep.subr.bf16.mxu0 %v6324_v1  ;;  %v6318_v52 = vcombine.high %v2773_v51, %v2774_v18  ;;  %v6331_v8 = vcombine.low %v2927_v5, %v2928_v6  ;;  %v2925_v9 = vld [vmem:[%s9188_s3 + $0xb8] sm:$0xff] }
 0x759   : > { %2710 = vmatpush1.bf16.msra.mxu1 %v6307_v35  ;;  %v2772_v35 = vld [vmem:[%s9188_s3 + $0x170] sm:$0xff] }
 0x75a   : > { %2711 = vmatprep.subr.bf16.mxu1 %v6306_v38  ;;  %2866 = vmatpush1.bf16.msra.mxu0 %v6323_v17  ;;  %v6316_v38 = vcombine.high %v2771_v34, %v2772_v35  ;;  %v6315_v39 = vcombine.low %v2771_v34, %v2772_v35 }
 0x75b   : > { %2867 = vmatprep.subr.bf16.mxu0 %v6322_v23 }
 0x75d   : > { %2712 = vmatpush1.bf16.msra.mxu1 %v6305_v16  ;;  %v2770_v16 = vld [vmem:[%s9188_s3 + $0xf0] sm:$0xff] }
 0x75e   : > { %2713 = vmatprep.subr.bf16.mxu1 %v6304_v32  ;;  %2868 = vmatpush1.bf16.msra.mxu0 %v6321_v31  ;;  %v6314_v32 = vcombine.high %v2769_v40, %v2770_v16  ;;  %v6313_v41 = vcombine.low %v2769_v40, %v2770_v16 }
 0x75f   : > { %2869 = vmatprep.subr.bf16.mxu0 %v6320_v26 }
 0x761   : > { %2714 = vmatpush1.bf16.msra.mxu1 %v6303_v45  ;;  %v6311_v45 = vcombine.low %v2767_v42, %v2768_v43 }
 0x762   : > { %2715 = vmatprep.subr.bf16.mxu1 %v6302_v47  ;;  %2870 = vmatpush1.bf16.msra.mxu0 %v6319_v19  ;;  %v2938_v47 = vld [vmem:[%s9188_s3 + $0x3f8] sm:$0xff] }
 0x763   : > { %2871 = vmatprep.subr.bf16.mxu0 %v6318_v52  ;;  %v6341_v48 = vcombine.low %v2937_v46, %v2938_v47  ;;  %v6342_v27 = vcombine.high %v2937_v46, %v2938_v47 }
 0x765   : > { %2716 = vmatpush1.bf16.msra.mxu1 %v6301_v54  ;;  %v6340_v54 = vcombine.high %v2935_v28, %v2936_v53 }
 0x766   : > { %2717 = vmatprep.subr.bf16.mxu1 %v6300_v56  ;;  %2872 = vmatpush1.bf16.msra.mxu0 %v6317_v33  ;;  %v2933_v56 = vld [vmem:[%s9188_s3 + $0x2b8] sm:$0xff] }
 0x767   : > { %2873 = vmatprep.subr.bf16.mxu0 %v6316_v38  ;;  %v6338_v58 = vcombine.high %v2933_v56, %v2934_v57  ;;  %v6337_v59 = vcombine.low %v2933_v56, %v2934_v57 }
 0x769   : > { %2718 = vmatpush1.bf16.msra.mxu1 %v6299_v36  ;;  %v6336_v36 = vcombine.high %v2931_v62, %v2932_v49 }
 0x76a   : > { %2719 = vmatprep.subr.bf16.mxu1 %v6298_v0  ;;  %2874 = vmatpush1.bf16.msra.mxu0 %v6315_v39  ;;  %v2930_v0 = vld [vmem:[%s9188_s3 + $0x1f8] sm:$0xff] }
 0x76b   : > { %2875 = vmatprep.subr.bf16.mxu0 %v6314_v32  ;;  %v6334_v3 = vcombine.high %v2929_v63, %v2930_v0  ;;  %v6333_v2 = vcombine.low %v2929_v63, %v2930_v0  ;;  %v6706_v63 = vld [vmem:[%s9187_s2 + $0x70] ss:$8 sps:$4 sm:$0xff]   ;;  %v6711_v0 = vld [vmem:[%s9187_s2 + $0x64] ss:$8 sps:$4 sm:$0xff]  }
 0x76d   : > { %2720 = vmatpush1.bf16.msra.mxu1 %v6297_v7  ;;  %v6332_v7 = vcombine.high %v2927_v5, %v2928_v6  ;;  %v6712_v5 = vld [vmem:[%s9187_s2 + $0x50] ss:$8 sps:$4 sm:$0xff]   ;;  %v6717_v6 = vld [vmem:[%s9187_s2 + $0x44] ss:$8 sps:$4 sm:$0xff]  }
 0x76e   : > { %2721 = vmatprep.subr.bf16.mxu1 %v6296_v30  ;;  %2876 = vmatpush1.bf16.msra.mxu0 %v6313_v41  ;;  %v2926_v30 = vld [vmem:[%s9188_s3 + $0xf8] sm:$0xff] }
 0x76f   : > { %2877 = vmatprep.subr.bf16.mxu0 %v6312_v44  ;;  %v6330_v10 = vcombine.high %v2925_v9, %v2926_v30 }
 0x771   : > { %2722 = vmatpush1.bf16.msra.mxu1 %v6295_v11  ;;  %v6329_v11 = vcombine.low %v2925_v9, %v2926_v30  ;;  %v6718_v9 = vld [vmem:[%s9187_s2 + $0x30] ss:$8 sps:$4 sm:$0xff]   ;;  %v6723_v30 = vld [vmem:[%s9187_s2 + $0x24] ss:$8 sps:$4 sm:$0xff]  }
 0x772   : > { %2878 = vmatpush1.bf16.msra.mxu0 %v6311_v45  ;;  %3019 = vmatprep.subr.bf16.mxu1 %v6342_v27 }
 0x774   : > { %2740 = vmatmul.mubr.bf16.vlgmr.msra.gmra.mxu1 %v2610_v13  ;;  %v2923_v13 = vld [vmem:[%s9188_s3 + $0x38] sm:$0xff] }
 0x775   : > { %3051 = vmatprep.mubr.bf16.mxu1 %v6986_v4  ;;  %3020 = vmatpush1.bf16.msra.mxu1 %v6341_v48  ;;  %v6327_v15 = vcombine.low %v2923_v13, %v2924_v14  ;;  %v6328_v1 = vcombine.high %v2923_v13, %v2924_v14  ;;  %v6724_v13 = vld [vmem:[%s9187_s2 + $0x10] ss:$8 sps:$4 sm:$0xff]   ;;  %v6729_v14 = vld [vmem:[%s9187_s2 + $0x4] ss:$8 sps:$4 sm:$0xff]  }
 0x776   : > { %3021 = vmatprep.subr.bf16.mxu1 %v6340_v54 }
 0x779   : > { %3022 = vmatpush1.bf16.msra.mxu1 %v6339_v55 }
 0x77a   : > { %3023 = vmatprep.subr.bf16.mxu1 %v6338_v58 }
 0x77d   : > { %3024 = vmatpush1.bf16.msra.mxu1 %v6337_v59 }
 0x77e   : > { %3025 = vmatprep.subr.bf16.mxu1 %v6336_v36 }
 0x781   : > { %3026 = vmatpush1.bf16.msra.mxu1 %v6335_v37  ;;  %v6708_v37 = vld [vmem:[%s9187_s2 + $0x74] ss:$8 sps:$4 sm:$0xff]  }
 0x782   : > { %3027 = vmatprep.subr.bf16.mxu1 %v6334_v3  ;;  %3201 = vmatprep.subr.bf16.mxu0 %v6708_v37  ;;  %v6709_v3 = vld [vmem:[%s9187_s2 + $0x60] ss:$8 sps:$4 sm:$0xff]  }
 0x785   : > { %3028 = vmatpush1.bf16.msra.mxu1 %v6333_v2  ;;  %v6714_v2 = vld [vmem:[%s9187_s2 + $0x54] ss:$8 sps:$4 sm:$0xff]  }
 0x786   : > { %3029 = vmatprep.subr.bf16.mxu1 %v6332_v7  ;;  %v6715_v7 = vld [vmem:[%s9187_s2 + $0x40] ss:$8 sps:$4 sm:$0xff]  }
 0x789   : > { %3030 = vmatpush1.bf16.msra.mxu1 %v6331_v8  ;;  %v6720_v8 = vld [vmem:[%s9187_s2 + $0x34] ss:$8 sps:$4 sm:$0xff]  }
 0x78a   : > { %3031 = vmatprep.subr.bf16.mxu1 %v6330_v10  ;;  %v6721_v10 = vld [vmem:[%s9187_s2 + $0x20] ss:$8 sps:$4 sm:$0xff]  }
 0x78d   : > { %3032 = vmatpush1.bf16.msra.mxu1 %v6329_v11  ;;  %v6726_v11 = vld [vmem:[%s9187_s2 + $0x14] ss:$8 sps:$4 sm:$0xff]  }
 0x78e   : > { %3033 = vmatprep.subr.bf16.mxu1 %v6328_v1 }
 0x791   : > { %3034 = vmatpush1.bf16.msra.mxu1 %v6327_v15  ;;  %v6727_v15 = vld [vmem:[%s9187_s2] ss:$8 sps:$4 sm:$0xff]  }
 0x814   : > { %v2522_v17 = vpop.f32.mrf.mxu1  ;;  %v2565_v1 = vpop.f32.mrf.mxu0 }
 0x815   : > { %v2574_v21 = vmul.f32 0.5, %v2522_v17 }
 0x816   : > { %v2524_v22 = vpop.f32.mrf.mxu1  ;;  %v2567_v17 = vpop.f32.mrf.mxu0 }
 0x817   : > { %6838 = vtanh.f32 %v2574_v21  ;;  %v2582_v18 = vsub.f32 %v2524_v22, %v7918_v29 }
 0x818   : > { %v2526_v23 = vpop.f32.mrf.mxu1  ;;  %v2569_v21 = vpop.f32.mrf.mxu0 }
 0x819   : > { %v2575_v31 = vmul.f32 0.5, %v2526_v23 }
 0x81a   : > { %v2528_v51 = vpop.f32.mrf.mxu1  ;;  %v2571_v22 = vpop.f32.mrf.mxu0 }
 0x81b   : > { %6840 = vtanh.f32 %v2575_v31  ;;  %v2583_v35 = vsub.f32 %v2528_v51, %v7921_v20  ;;  %v2597_v51 = vmul.f32 0.5, %v2571_v22 }
 0x824   : > { %v6839_v24 = vpop.eup %6838 }
 0x825   : > { %v2578_v25 = vadd.f32 1.0, %v6839_v24 }
 0x827   : > { %v2580_v26 = vmul.f32 0.5, %v2578_v25  ;;  %v2596_v25 = vmul.f32 0.5, %v2567_v17 }
 0x828   : > { %v6841_v19 = vpop.eup %6840 }
 0x829   : > { %v2579_v52 = vadd.f32 1.0, %v6841_v19  ;;  %v2584_v33 = vmul.f32 %v2582_v18, %v2580_v26  ;;  %v2588_v18 = vmul.f32 0.5, %v2565_v1 }
 0x82b   : > { %v2581_v34 = vmul.f32 0.5, %v2579_v52  ;;  %v8067_v39 = vadd.f32 %v2584_v33, %v7918_v29  ;;  %v2589_v52 = vmul.f32 0.5, %v2569_v21 }
 0x82d   : > { %v2585_v38 = vmul.f32 %v2583_v35, %v2581_v34 }
 0x82f   : > { %v8070_v40 = vadd.f32 %v2585_v38, %v7921_v20 }
 0x831   : > { %v2766_v16 = vpack.c.bf16 %v8070_v40, %v8067_v39 }
 0x833   : > { %2896 = vmatmul.mubr.bf16.vlgmr.msra.gmra.mxu0 %v2766_v16 }
 0x834   : > { %v2741_v32 = vpop.f32.mrf.mxu1  ;;  %3233 = vmatprep.mubr.bf16.mxu0 %v6986_v4  ;;  %3202 = vmatpush1.bf16.msra.mxu0 %v6706_v63 }
 0x835   : > { %v2750_v41 = vmul.f32 0.5, %v2741_v32  ;;  %3203 = vmatprep.subr.bf16.mxu0 %v6711_v0 }
 0x836   : > { %v2743_v42 = vpop.f32.mrf.mxu1 }
 0x837   : > { %6842 = vtanh.f32 %v2750_v41 }
 0x838   : > { %v2745_v43 = vpop.f32.mrf.mxu1  ;;  %6844 = vtanh.f32 %v2743_v42  ;;  %3204 = vmatpush1.bf16.msra.mxu0 %v6709_v3 }
 0x839   : > { %v2751_v44 = vmul.f32 0.5, %v2745_v43  ;;  %3205 = vmatprep.subr.bf16.mxu0 %v6714_v2 }
 0x83a   : > { %v2747_v45 = vpop.f32.mrf.mxu1 }
 0x83b   : > { %6846 = vtanh.f32 %v2751_v44 }
 0x83c   : > { %6848 = vtanh.f32 %v2747_v45  ;;  %3206 = vmatpush1.bf16.msra.mxu0 %v6712_v5 }
 0x83d   : > { %3207 = vmatprep.subr.bf16.mxu0 %v6717_v6 }
 0x840   : > { %3208 = vmatpush1.bf16.msra.mxu0 %v6715_v7 }
 0x841   : > { %3209 = vmatprep.subr.bf16.mxu0 %v6720_v8 }
 0x844   : > { %v6843_v46 = vpop.eup %6842  ;;  %3210 = vmatpush1.bf16.msra.mxu0 %v6718_v9 }
 0x845   : > { %v2754_v47 = vadd.f32 1.0, %v6843_v46  ;;  %v6845_v48 = vpop.eup %6844  ;;  %3211 = vmatprep.subr.bf16.mxu0 %v6723_v30  ;;  %v3077_v30 = vadd.f32 %v7921_v20, %v7807_v61 }
 0x846   : > { %v2760_v54 = vsub.f32 %v6845_v48, %v7969_v12 }
 0x847   : > { %v2756_v27 = vmul.f32 0.5, %v2754_v47 }
 0x848   : > { %v6847_v28 = vpop.eup %6846  ;;  %3212 = vmatpush1.bf16.msra.mxu0 %v6721_v10 }
 0x849   : > { %v6849_v53 = vpop.eup %6848  ;;  %v2755_v55 = vadd.f32 1.0, %v6847_v28  ;;  %v2762_v56 = vmul.f32 %v2760_v54, %v2756_v27  ;;  %3213 = vmatprep.subr.bf16.mxu0 %v6726_v11 }
 0x84a   : > { %v2761_v58 = vsub.f32 %v6849_v53, %v7966_v50 }
 0x84b   : > { %v2757_v57 = vmul.f32 0.5, %v2755_v55  ;;  %v8078_v62 = vadd.f32 %v2762_v56, %v7969_v12 }
 0x84c   : > { %3214 = vmatpush1.bf16.msra.mxu0 %v6724_v13 }
 0x84d   : > { %v2763_v59 = vmul.f32 %v2761_v58, %v2757_v57  ;;  %3215 = vmatprep.subr.bf16.mxu0 %v6729_v14 }
 0x84f   : > { %v8081_v49 = vadd.f32 %v2763_v59, %v7966_v50  ;;  %v3076_v59 = vadd.f32 %v7918_v29, %v7804_v60 }
 0x850   : > { %3216 = vmatpush1.bf16.msra.mxu0 %v6727_v15 }
 0x851   : > { %v2922_v36 = vpack.c.bf16 %v8081_v49, %v8078_v62  ;;  %v3078_v0 = vadd.f32 %v3076_v59, %v7969_v12  ;;  %v3079_v12 = vadd.f32 %v3077_v30, %v7966_v50  ;;  %v3272_v59 = vld [vmem:[%s9188_s3 + $0x1c0] sm:$0xff] }
 0x852   : > { %v3266_v30 = vld [vmem:[%s9188_s3 + $0x40] sm:$0xff] }
 0x853   : > { %3052 = vmatmul.mubr.bf16.vlgmr.msra.gmra.mxu1 %v2922_v36  ;;  %v3080_v8 = vadd.f32 %v3078_v0, %v8067_v39  ;;  %v3081_v21 = vadd.f32 %v3079_v12, %v8070_v40  ;;  %v3270_v0 = vld [vmem:[%s9188_s3 + $0x140] sm:$0xff]  ;;  %v3450_v12 = vld [vmem:[%s9188_s3 + $0x390] sm:$0xff] }
 0x854   : > { %3393 = vmatprep.mubr.bf16.mxu1 %v6986_v4 }
 0x855   : > { %v3082_v11 = vadd.f32 %v3080_v8, %v8078_v62 }
 0x8f3   : > { %v2897_v23 = vpop.f32.mrf.mxu0 }
 0x8f4   : > { %v2906_v24 = vmul.f32 0.5, %v2897_v23 }
 0x8f5   : > { %v2899_v31 = vpop.f32.mrf.mxu0 }
 0x8f6   : > { %6850 = vtanh.f32 %v2906_v24  ;;  %v2914_v43 = vmax.f32 %v2899_v31, 0.0 }
 0x8f7   : > { %v2901_v26 = vpop.f32.mrf.mxu0  ;;  %6852 = vtanh.f32 %v2596_v25  ;;  %v3083_v25 = vadd.f32 %v3081_v21, %v8081_v49 }
 0x8f8   : > { %v2907_v19 = vmul.f32 0.5, %v2901_v26  ;;  %v2916_v54 = vsub.f32 %v2914_v43, %v8067_v39 }
 0x8f9   : > { %v2903_v48 = vpop.f32.mrf.mxu0 }
 0x8fa   : > { %6854 = vtanh.f32 %v2907_v19  ;;  %v2915_v56 = vmax.f32 %v2903_v48, 0.0  ;;  %v3275_v48 = vld [vmem:[%s9188_s3 + $0x280] sm:$0xff] }
 0x8fb   : > { %6856 = vtanh.f32 %v2597_v51 }
 0x8fc   : > { %6858 = vtanh.f32 %v2588_v18  ;;  %v2917_v2 = vsub.f32 %v2915_v56, %v8070_v40 }
 0x8fd   : > { %6860 = vtanh.f32 %v2589_v52 }
 0x903   : > { %v6851_v33 = vpop.eup %6850 }
 0x904   : > { %v6853_v35 = vpop.eup %6852  ;;  %v2910_v16 = vadd.f32 1.0, %v6851_v33 }
 0x905   : > { %v2600_v42 = vadd.f32 1.0, %v6853_v35 }
 0x906   : > { %v2912_v47 = vmul.f32 0.5, %v2910_v16 }
 0x907   : > { %v6855_v41 = vpop.eup %6854  ;;  %v2602_v53 = vmul.f32 0.5, %v2600_v42 }
 0x908   : > { %v6857_v46 = vpop.eup %6856  ;;  %v2911_v28 = vadd.f32 1.0, %v6855_v41  ;;  %v2918_v58 = vmul.f32 %v2916_v54, %v2912_v47  ;;  %v3273_v54 = vld [vmem:[%s9188_s3 + $0x200] sm:$0xff] }
 0x909   : > { %v6859_v27 = vpop.eup %6858  ;;  %v2601_v55 = vadd.f32 1.0, %v6857_v46  ;;  %v2604_v63 = vsub.f32 %v2602_v53, %v7918_v29 }
 0x90a   : > { %v2592_v57 = vadd.f32 1.0, %v6859_v27  ;;  %v6861_v36 = vpop.eup %6860  ;;  %v2913_v37 = vmul.f32 0.5, %v2911_v28  ;;  %v2920_v7 = vadd.f32 %v2918_v58, %v8067_v39  ;;  %v3276_v27 = vld [vmem:[%s9188_s3 + $0x2c0] sm:$0xff] }
 0x90b   : > { %v2603_v3 = vmul.f32 0.5, %v2601_v55  ;;  %v2593_v6 = vadd.f32 1.0, %v6861_v36  ;;  %v6376_v28 = vcombine.high %v3275_v48, %v3276_v27  ;;  %v6375_v53 = vcombine.low %v3275_v48, %v3276_v27  ;;  %v3274_v55 = vld [vmem:[%s9188_s3 + $0x240] sm:$0xff]  ;;  %v3445_v48 = vld [vmem:[%s9188_s3 + $0x308] sm:$0xff] }
 0x90c   : > { %v2594_v5 = vmul.f32 0.5, %v2592_v57  ;;  %v2919_v9 = vmul.f32 %v2917_v2, %v2913_v37  ;;  %v3084_v1 = vadd.f32 %v3082_v11, %v2920_v7  ;;  %v6374_v56 = vcombine.high %v3273_v54, %v3274_v55  ;;  %v3271_v58 = vld [vmem:[%s9188_s3 + $0x180] sm:$0xff]  ;;  %v3449_v11 = vld [vmem:[%s9188_s3 + $0x388] sm:$0xff] }
 0x90d   : > { %v2605_v13 = vsub.f32 %v2603_v3, %v7921_v20  ;;  %v2595_v15 = vmul.f32 0.5, %v2593_v6  ;;  %v6373_v57 = vcombine.low %v3273_v54, %v3274_v55  ;;  %v6372_v36 = vcombine.high %v3271_v58, %v3272_v59  ;;  %v3268_v6 = vld [vmem:[%s9188_s3 + $0xc0] sm:$0xff]  ;;  %v3447_v27 = vld [vmem:[%s9188_s3 + $0x348] sm:$0xff] }
 0x90e   : > { %v2606_v10 = vmul.f32 %v2604_v63, %v2594_v5  ;;  %v2921_v17 = vadd.f32 %v2919_v9, %v8070_v40  ;;  %v6371_v37 = vcombine.low %v3271_v58, %v3272_v59  ;;  %v3269_v63 = vld [vmem:[%s9188_s3 + $0x100] sm:$0xff]  ;;  %v3442_v58 = vld [vmem:[%s9188_s3 + $0x290] sm:$0xff] }
 0x90f   : > { %v2607_v24 = vmul.f32 %v2605_v13, %v2595_v15  ;;  %v6370_v3 = vcombine.high %v3269_v63, %v3270_v0  ;;  %v6369_v2 = vcombine.low %v3269_v63, %v3270_v0  ;;  %v3267_v5 = vld [vmem:[%s9188_s3 + $0x80] sm:$0xff]  ;;  %v3451_v13 = vld [vmem:[%s9188_s3 + $0x3c8] sm:$0xff] }
 0x910   : > { %v2608_v61 = vadd.f32 %v2606_v10, %v7918_v29  ;;  %v3085_v51 = vadd.f32 %v3083_v25, %v2921_v17  ;;  %v6368_v7 = vcombine.high %v3267_v5, %v3268_v6  ;;  %v6367_v8 = vcombine.low %v3267_v5, %v3268_v6  ;;  %v3265_v9 = vld [vmem:[%s9188_s3] sm:$0xff]  ;;  %v3438_v5 = vld [vmem:[%s9188_s3 + $0x210] sm:$0xff] }
 0x911   : > { %v6365_v10 = vcombine.low %v3265_v9, %v3266_v30  ;;  %v6410_v15 = vcombine.high %v3449_v11, %v3451_v13 }
 0x912   : > { %v3086_v19 = vadd.f32 %v3084_v1, %v2608_v61  ;;  %v3452_v1 = vld [vmem:[%s9188_s3 + $0x3d0] sm:$0xff] }
 0x913   : > { %v3053_v34 = vpop.f32.mrf.mxu1  ;;  %v6411_v17 = vcombine.low %v3450_v12, %v3452_v1  ;;  %v6412_v21 = vcombine.high %v3450_v12, %v3452_v1  ;;  %3613 = vmatprep.subr.bf16.mxu0 %v6410_v15  ;;  %v3436_v12 = vld [vmem:[%s9188_s3 + $0x1d0] sm:$0xff] }
 0x914   : > { %v3062_v38 = vmul.f32 0.5, %v3053_v34  ;;  %v2609_v34 = vadd.f32 %v2607_v24, %v7921_v20  ;;  %v3279_v20 = vld [vmem:[%s9188_s3 + $0x380] sm:$0xff]  ;;  %v6347_v24 = vld [vmem:[%s7023_s22 + $0x50] sm:$0xff] }
 0x915   : > { %v3055_v32 = vpop.f32.mrf.mxu1 }
 0x916   : > { %6862 = vtanh.f32 %v3062_v38  ;;  %v3070_v22 = vsub.f32 %v3055_v32, %v8078_v62  ;;  %v3087_v16 = vadd.f32 %v3085_v51, %v2609_v34 }
 0x917   : > { %v3057_v44 = vpop.f32.mrf.mxu1 }
 0x918   : > { %v3063_v45 = vmul.f32 0.5, %v3057_v44  ;;  %v3277_v44 = vld [vmem:[%s9188_s3 + $0x300] sm:$0xff] }
 0x919   : > { %v3059_v31 = vpop.f32.mrf.mxu1 }
 0x91a   : > { %6864 = vtanh.f32 %v3063_v45  ;;  %v3071_v40 = vsub.f32 %v3059_v31, %v8081_v49  ;;  %v3278_v45 = vld [vmem:[%s9188_s3 + $0x340] sm:$0xff] }
 0x91b   : > { %v6378_v46 = vcombine.high %v3277_v44, %v3278_v45  ;;  %v6377_v47 = vcombine.low %v3277_v44, %v3278_v45 }
 0x923   : > { %v6863_v60 = vpop.eup %6862 }
 0x924   : > { %v3066_v14 = vadd.f32 1.0, %v6863_v60  ;;  %v6366_v60 = vcombine.high %v3265_v9, %v3266_v30 }
 0x926   : > { %v3068_v39 = vmul.f32 0.5, %v3066_v14  ;;  %v6409_v14 = vcombine.low %v3449_v11, %v3451_v13  ;;  %v3434_v11 = vld [vmem:[%s9188_s3 + $0x190] sm:$0xff] }
 0x927   : > { %v6865_v23 = vpop.eup %6864  ;;  %v6395_v15 = vcombine.low %v3434_v11, %v3436_v12  ;;  %v6396_v1 = vcombine.high %v3434_v11, %v3436_v12  ;;  %v3765_v11 = vld [vmem:[%s9188_s3 + $0x360] sm:$0xff] }
 0x928   : > { %v3072_v26 = vmul.f32 %v3070_v22, %v3068_v39  ;;  %v3067_v50 = vadd.f32 1.0, %v6865_v23  ;;  %v6345_v39 = vld [vmem:[%s7023_s22 + $0x40] sm:$0xff]  ;;  %v6346_v23 = vld [vmem:[%s7023_s22 + $0x48] sm:$0xff] }
 0x92a   : > { %v3074_v18 = vadd.f32 %v3072_v26, %v8078_v62  ;;  %v3069_v52 = vmul.f32 0.5, %v3067_v50 }
 0x92c   : > { %v3088_v33 = vadd.f32 %v3086_v19, %v3074_v18  ;;  %v3073_v35 = vmul.f32 %v3071_v40, %v3069_v52  ;;  %v6348_v19 = vld [vmem:[%s7023_s22 + $0x58] sm:$0xff] }
 0x92e   : > { %v8155_v29 = vmul.f32 0.125, %v3088_v33  ;;  %v3075_v38 = vadd.f32 %v3073_v35, %v8081_v49  ;;  %v3280_v49 = vld [vmem:[%s9188_s3 + $0x3c0] sm:$0xff] }
 0x92f   : > { %v6380_v42 = vcombine.high %v3279_v20, %v3280_v49  ;;  %v6379_v43 = vcombine.low %v3279_v20, %v3280_v49 }
 0x930   : > { %6343 = vst [vmem:[%s7028_s25 + $0x10] sm:$0xff] %v8155_v29  ;;  %v3089_v32 = vadd.f32 %v3087_v16, %v3075_v38 }
 0x931   : > { %3361 = vmatprep.subr.bf16.mxu1 %v6380_v42 }
 0x932   : > { %v8160_v41 = vmul.f32 0.125, %v3089_v32  ;;  %3362 = vmatpush1.bf16.msra.mxu1 %v6379_v43 }
 0x933   : > { %3363 = vmatprep.subr.bf16.mxu1 %v6378_v46 }
 0x934   : > { %6344 = vst [vmem:[%s7028_s25 + $0x18] sm:$0xff] %v8160_v41  ;;  %v3104_v62 = vpack.c.bf16 %v8160_v41, %v8155_v29 }
 0x936   : > { %3234 = vmatmul.mubr.bf16.vlgmr.msra.gmra.mxu0 %v3104_v62  ;;  %3364 = vmatpush1.bf16.msra.mxu1 %v6377_v47 }
 0x937   : > { %3645 = vmatprep.mubr.bf16.mxu0 %v6986_v4  ;;  %3365 = vmatprep.subr.bf16.mxu1 %v6376_v28  ;;  %v3448_v28 = vld [vmem:[%s9188_s3 + $0x350] sm:$0xff] }
 0x938   : > { %3614 = vmatpush1.bf16.msra.mxu0 %v6409_v14 }
 0x93a   : > { %3366 = vmatpush1.bf16.msra.mxu1 %v6375_v53  ;;  %v6405_v53 = vcombine.low %v3445_v48, %v3447_v27 }
 0x93b   : > { %3367 = vmatprep.subr.bf16.mxu1 %v6374_v56  ;;  %v3441_v56 = vld [vmem:[%s9188_s3 + $0x288] sm:$0xff] }
 0x93e   : > { %3368 = vmatpush1.bf16.msra.mxu1 %v6373_v57  ;;  %v3443_v57 = vld [vmem:[%s9188_s3 + $0x2c8] sm:$0xff] }
 0x93f   : > { %3369 = vmatprep.subr.bf16.mxu1 %v6372_v36  ;;  %v6402_v59 = vcombine.high %v3441_v56, %v3443_v57  ;;  %v3444_v36 = vld [vmem:[%s9188_s3 + $0x2d0] sm:$0xff] }
 0x940   : > { %v6403_v63 = vcombine.low %v3442_v58, %v3444_v36  ;;  %v6404_v0 = vcombine.high %v3442_v58, %v3444_v36 }
 0x942   : > { %3370 = vmatpush1.bf16.msra.mxu1 %v6371_v37  ;;  %v6401_v37 = vcombine.low %v3441_v56, %v3443_v57 }
 0x943   : > { %3371 = vmatprep.subr.bf16.mxu1 %v6370_v3  ;;  %v3437_v3 = vld [vmem:[%s9188_s3 + $0x208] sm:$0xff] }
 0x946   : > { %3372 = vmatpush1.bf16.msra.mxu1 %v6369_v2  ;;  %v3439_v2 = vld [vmem:[%s9188_s3 + $0x248] sm:$0xff] }
 0x947   : > { %3373 = vmatprep.subr.bf16.mxu1 %v6368_v7  ;;  %v6398_v6 = vcombine.high %v3437_v3, %v3439_v2  ;;  %v3440_v7 = vld [vmem:[%s9188_s3 + $0x250] sm:$0xff] }
 0x948   : > { %v6399_v9 = vcombine.low %v3438_v5, %v3440_v7  ;;  %v6400_v30 = vcombine.high %v3438_v5, %v3440_v7 }
 0x94a   : > { %3374 = vmatpush1.bf16.msra.mxu1 %v6367_v8  ;;  %v6397_v8 = vcombine.low %v3437_v3, %v3439_v2 }
 0x94b   : > { %3375 = vmatprep.subr.bf16.mxu1 %v6366_v60  ;;  %v3433_v60 = vld [vmem:[%s9188_s3 + $0x188] sm:$0xff] }
 0x94e   : > { %3376 = vmatpush1.bf16.msra.mxu1 %v6365_v10  ;;  %v3435_v10 = vld [vmem:[%s9188_s3 + $0x1c8] sm:$0xff] }
 0x94f   : > { %3656 = vmatprep.subr.bf16.mxu1 %v6412_v21  ;;  %v6394_v13 = vcombine.high %v3433_v60, %v3435_v10  ;;  %v6393_v14 = vcombine.low %v3433_v60, %v3435_v10  ;;  %v3431_v21 = vld [vmem:[%s9188_s3 + $0x148] sm:$0xff]  ;;  %v3762_v60 = vld [vmem:[%s9188_s3 + $0x318] sm:$0xff]  ;;  %v3763_v10 = vld [vmem:[%s9188_s3 + $0x320] sm:$0xff] }
 0x950   : > { %v6440_v12 = vcombine.high %v3763_v10, %v3765_v11 }
 0x9f6   : > { %v3235_v22 = vpop.f32.mrf.mxu0 }
 0x9f7   : > { %v3244_v61 = vadd.f32 %v6345_v39, %v3235_v22  ;;  %v3430_v39 = vld [vmem:[%s9188_s3 + $0x110] sm:$0xff] }
 0x9f8   : > { %v3237_v31 = vpop.f32.mrf.mxu0 }
 0x9f9   : > { %v3248_v25 = vmul.f32 0.5, %v3244_v61  ;;  %v3245_v26 = vadd.f32 %v6346_v23, %v3237_v31  ;;  %v3432_v23 = vld [vmem:[%s9188_s3 + $0x150] sm:$0xff] }
 0x9fa   : > { %v3239_v50 = vpop.f32.mrf.mxu0  ;;  %v6391_v31 = vcombine.low %v3430_v39, %v3432_v23 }
 0x9fb   : > { %6866 = vtanh.f32 %v3248_v25  ;;  %v3246_v51 = vadd.f32 %v6347_v24, %v3239_v50  ;;  %v6392_v24 = vcombine.high %v3430_v39, %v3432_v23  ;;  %v3425_v25 = vld [vmem:[%s9188_s3 + $0x88] sm:$0xff]  ;;  %v3426_v50 = vld [vmem:[%s9188_s3 + $0x90] sm:$0xff]  ;;  %v3761_v39 = vld [vmem:[%s9188_s3 + $0x2e0] sm:$0xff] }
 0x9fc   : > { %v3241_v18 = vpop.f32.mrf.mxu0  ;;  %6868 = vtanh.f32 %v3245_v26  ;;  %v3427_v26 = vld [vmem:[%s9188_s3 + $0xc8] sm:$0xff] }
 0x9fd   : > { %v3249_v52 = vmul.f32 0.5, %v3246_v51  ;;  %v3247_v40 = vadd.f32 %v6348_v19, %v3241_v18  ;;  %v6386_v19 = vcombine.high %v3425_v25, %v3427_v26  ;;  %v3428_v51 = vld [vmem:[%s9188_s3 + $0xd0] sm:$0xff]  ;;  %v6385_v18 = vcombine.low %v3425_v25, %v3427_v26  ;;  %v3755_v26 = vld [vmem:[%s9188_s3 + $0x220] sm:$0xff] }
 0x9ff   : > { %6870 = vtanh.f32 %v3249_v52  ;;  %v6387_v52 = vcombine.low %v3426_v50, %v3428_v51 }
 0xa00   : > { %6872 = vtanh.f32 %v3247_v40  ;;  %v6388_v40 = vcombine.high %v3426_v50, %v3428_v51  ;;  %v3757_v50 = vld [vmem:[%s9188_s3 + $0x260] sm:$0xff] }
 0xa01   : > { %v6432_v51 = vcombine.high %v3755_v26, %v3757_v50 }
 0xa08   : > { %v6867_v33 = vpop.eup %6866 }
 0xa09   : > { %v3252_v34 = vadd.f32 1.0, %v6867_v33  ;;  %v6869_v35 = vpop.eup %6868  ;;  %v3421_v33 = vld [vmem:[%s9188_s3 + $0x8] sm:$0xff] }
 0xa0a   : > { %v3258_v62 = vsub.f32 %v6869_v35, %v8155_v29  ;;  %v3422_v35 = vld [vmem:[%s9188_s3 + $0x10] sm:$0xff] }
 0xa0b   : > { %v3254_v38 = vmul.f32 0.5, %v3252_v34  ;;  %v3423_v34 = vld [vmem:[%s9188_s3 + $0x48] sm:$0xff] }
 0xa0c   : > { %v6871_v16 = vpop.eup %6870 }
 0xa0d   : > { %v6873_v32 = vpop.eup %6872  ;;  %v3253_v20 = vadd.f32 1.0, %v6871_v16  ;;  %v3260_v43 = vmul.f32 %v3258_v62, %v3254_v38  ;;  %v6382_v38 = vcombine.high %v3421_v33, %v3423_v34  ;;  %v3424_v16 = vld [vmem:[%s9188_s3 + $0x50] sm:$0xff] }
 0xa0e   : > { %v3259_v42 = vsub.f32 %v6873_v32, %v8160_v41  ;;  %v6381_v32 = vcombine.low %v3421_v33, %v3423_v34  ;;  %v6383_v62 = vcombine.low %v3422_v35, %v3424_v16  ;;  %v3751_v34 = vld [vmem:[%s9188_s3 + $0x1a0] sm:$0xff] }
 0xa0f   : > { %v3255_v49 = vmul.f32 0.5, %v3253_v20  ;;  %v8234_v45 = vadd.f32 %v3260_v43, %v8155_v29  ;;  %v3446_v29 = vld [vmem:[%s9188_s3 + $0x310] sm:$0xff]  ;;  %v6384_v20 = vcombine.high %v3422_v35, %v3424_v16  ;;  %v3753_v35 = vld [vmem:[%s9188_s3 + $0x1e0] sm:$0xff] }
 0xa10   : > { %v6407_v54 = vcombine.low %v3446_v29, %v3448_v28  ;;  %v6408_v55 = vcombine.high %v3446_v29, %v3448_v28  ;;  %v6428_v16 = vcombine.high %v3751_v34, %v3753_v35 }
 0xa11   : > { %v3261_v44 = vmul.f32 %v3259_v42, %v3255_v49  ;;  %v3766_v49 = vld [vmem:[%s9188_s3 + $0x398] sm:$0xff] }
 0xa12   : > { %v3768_v42 = vld [vmem:[%s9188_s3 + $0x3d8] sm:$0xff] }
 0xa13   : > { %v8237_v46 = vadd.f32 %v3261_v44, %v8160_v41  ;;  %v6406_v41 = vcombine.high %v3445_v48, %v3447_v27  ;;  %v6441_v43 = vcombine.low %v3766_v49, %v3768_v42  ;;  %v6442_v44 = vcombine.high %v3766_v49, %v3768_v42  ;;  %v3769_v48 = vld [vmem:[%s9188_s3 + $0x3e0] sm:$0xff] }
 0xa14   : > { %v3747_v42 = vld [vmem:[%s9188_s3 + $0x120] sm:$0xff] }
 0xa15   : > { %v3264_v47 = vpack.c.bf16 %v8237_v46, %v8234_v45  ;;  %3615 = vmatprep.subr.bf16.mxu0 %v6406_v41 }
 0xa16   : > { %3616 = vmatpush1.bf16.msra.mxu0 %v6405_v53 }
 0xa17   : > { %3394 = vmatmul.mubr.bf16.vlgmr.msra.gmra.mxu1 %v3264_v47  ;;  %3617 = vmatprep.subr.bf16.mxu0 %v6402_v59  ;;  %v3767_v47 = vld [vmem:[%s9188_s3 + $0x3a0] sm:$0xff] }
 0xa18   : > { %3657 = vmatpush1.bf16.msra.mxu1 %v6411_v17  ;;  %3688 = vmatprep.mubr.bf16.mxu1 %v6986_v4  ;;  %v3429_v17 = vld [vmem:[%s9188_s3 + $0x108] sm:$0xff]  ;;  %v6443_v27 = vcombine.low %v3767_v47, %v3769_v48  ;;  %v6444_v29 = vcombine.high %v3767_v47, %v3769_v48 }
 0xa19   : > { %3658 = vmatprep.subr.bf16.mxu1 %v6408_v55  ;;  %v6390_v22 = vcombine.high %v3429_v17, %v3431_v21  ;;  %v6389_v61 = vcombine.low %v3429_v17, %v3431_v21  ;;  %v3759_v21 = vld [vmem:[%s9188_s3 + $0x2a0] sm:$0xff] }
 0xa1a   : > { %3618 = vmatpush1.bf16.msra.mxu0 %v6401_v37  ;;  %v6436_v23 = vcombine.high %v3759_v21, %v3761_v39 }
 0xa1b   : > { %3619 = vmatprep.subr.bf16.mxu0 %v6398_v6 }
 0xa1c   : > { %3659 = vmatpush1.bf16.msra.mxu1 %v6407_v54 }
 0xa1d   : > { %3660 = vmatprep.subr.bf16.mxu1 %v6404_v0 }
 0xa1e   : > { %3620 = vmatpush1.bf16.msra.mxu0 %v6397_v8 }
 0xa1f   : > { %3621 = vmatprep.subr.bf16.mxu0 %v6394_v13 }
 0xa20   : > { %3661 = vmatpush1.bf16.msra.mxu1 %v6403_v63 }
 0xa21   : > { %3662 = vmatprep.subr.bf16.mxu1 %v6400_v30 }
 0xa22   : > { %3622 = vmatpush1.bf16.msra.mxu0 %v6393_v14  ;;  %v6439_v14 = vcombine.low %v3763_v10, %v3765_v11 }
 0xa23   : > { %3623 = vmatprep.subr.bf16.mxu0 %v6390_v22 }
 0xa24   : > { %3663 = vmatpush1.bf16.msra.mxu1 %v6399_v9 }
 0xa25   : > { %3664 = vmatprep.subr.bf16.mxu1 %v6396_v1  ;;  %v3760_v1 = vld [vmem:[%s9188_s3 + $0x2d8] sm:$0xff] }
 0xa26   : > { %3624 = vmatpush1.bf16.msra.mxu0 %v6389_v61  ;;  %v6435_v61 = vcombine.low %v3759_v21, %v3761_v39 }
 0xa27   : > { %3625 = vmatprep.subr.bf16.mxu0 %v6386_v19 }
 0xa28   : > { %3665 = vmatpush1.bf16.msra.mxu1 %v6395_v15  ;;  %v3758_v15 = vld [vmem:[%s9188_s3 + $0x298] sm:$0xff] }
 0xa29   : > { %3666 = vmatprep.subr.bf16.mxu1 %v6392_v24  ;;  %v6434_v17 = vcombine.high %v3758_v15, %v3760_v1  ;;  %v6433_v22 = vcombine.low %v3758_v15, %v3760_v1  ;;  %v3756_v24 = vld [vmem:[%s9188_s3 + $0x258] sm:$0xff] }
 0xa2a   : > { %3626 = vmatpush1.bf16.msra.mxu0 %v6385_v18  ;;  %v6431_v18 = vcombine.low %v3755_v26, %v3757_v50 }
 0xa2b   : > { %3627 = vmatprep.subr.bf16.mxu0 %v6382_v38 }
 0xa2c   : > { %3667 = vmatpush1.bf16.msra.mxu1 %v6391_v31  ;;  %v3754_v31 = vld [vmem:[%s9188_s3 + $0x218] sm:$0xff] }
 0xa2d   : > { %3668 = vmatprep.subr.bf16.mxu1 %v6388_v40  ;;  %v6430_v25 = vcombine.high %v3754_v31, %v3756_v24  ;;  %v6429_v19 = vcombine.low %v3754_v31, %v3756_v24  ;;  %v3752_v40 = vld [vmem:[%s9188_s3 + $0x1d8] sm:$0xff] }
 0xa2e   : > { %3628 = vmatpush1.bf16.msra.mxu0 %v6381_v32  ;;  %v6427_v32 = vcombine.low %v3751_v34, %v3753_v35  ;;  %v4065_v34 = vld [vmem:[%s9188_s3 + $0x328] sm:$0xff] }
 0xa2f   : > { %3930 = vmatprep.subr.bf16.mxu0 %v6442_v44  ;;  %v4066_v35 = vld [vmem:[%s9188_s3 + $0x368] sm:$0xff] }
 0xa30   : > { %3669 = vmatpush1.bf16.msra.mxu1 %v6387_v52  ;;  %v3750_v52 = vld [vmem:[%s9188_s3 + $0x198] sm:$0xff] }
 0xa31   : > { %3670 = vmatprep.subr.bf16.mxu1 %v6384_v20  ;;  %v6426_v33 = vcombine.high %v3750_v52, %v3752_v40  ;;  %v6425_v38 = vcombine.low %v3750_v52, %v3752_v40  ;;  %v3748_v20 = vld [vmem:[%s9188_s3 + $0x158] sm:$0xff] }
 0xa34   : > { %3671 = vmatpush1.bf16.msra.mxu1 %v6383_v62  ;;  %v3746_v62 = vld [vmem:[%s9188_s3 + $0x118] sm:$0xff] }
 0xa35   : > { %3973 = vmatprep.subr.bf16.mxu1 %v6444_v29  ;;  %v6422_v49 = vcombine.high %v3746_v62, %v3748_v20  ;;  %v6421_v44 = vcombine.low %v3746_v62, %v3748_v20  ;;  %v3744_v29 = vld [vmem:[%s9188_s3 + $0xd8] sm:$0xff] }
 0xad7   : > { %v3395_v41 = vpop.f32.mrf.mxu1 }
 0xad8   : > { %v3404_v28 = vmul.f32 0.5, %v3395_v41 }
 0xad9   : > { %v3397_v53 = vpop.f32.mrf.mxu1 }
 0xada   : > { %6874 = vtanh.f32 %v3404_v28  ;;  %v3743_v28 = vld [vmem:[%s9188_s3 + $0xa0] sm:$0xff] }
 0xadb   : > { %v3399_v54 = vpop.f32.mrf.mxu1  ;;  %6876 = vtanh.f32 %v3397_v53  ;;  %v3745_v53 = vld [vmem:[%s9188_s3 + $0xe0] sm:$0xff] }
 0xadc   : > { %v3405_v55 = vmul.f32 0.5, %v3399_v54 }
 0xadd   : > { %v3401_v56 = vpop.f32.mrf.mxu1 }
 0xade   : > { %6878 = vtanh.f32 %v3405_v55  ;;  %v6420_v55 = vcombine.high %v3743_v28, %v3745_v53 }
 0xadf   : > { %6880 = vtanh.f32 %v3401_v56  ;;  %v6419_v56 = vcombine.low %v3743_v28, %v3745_v53  ;;  %v4059_v53 = vld [vmem:[%s9188_s3 + $0x1a8] sm:$0xff] }
 0xae7   : > { %v6875_v57 = vpop.eup %6874 }
 0xae8   : > { %v3408_v58 = vadd.f32 1.0, %v6875_v57  ;;  %v6877_v59 = vpop.eup %6876  ;;  %v3738_v57 = vld [vmem:[%s9188_s3 + $0x18] sm:$0xff] }
 0xae9   : > { %v3414_v0 = vsub.f32 %v6877_v59, %v8234_v45 }
 0xaea   : > { %v3410_v36 = vmul.f32 0.5, %v3408_v58  ;;  %v3740_v58 = vld [vmem:[%s9188_s3 + $0x58] sm:$0xff] }
 0xaeb   : > { %v6879_v37 = vpop.eup %6878  ;;  %v6414_v59 = vcombine.high %v3738_v57, %v3740_v58 }
 0xaec   : > { %v6881_v63 = vpop.eup %6880  ;;  %v3409_v3 = vadd.f32 1.0, %v6879_v37  ;;  %v3416_v2 = vmul.f32 %v3414_v0, %v3410_v36  ;;  %v3739_v36 = vld [vmem:[%s9188_s3 + $0x20] sm:$0xff] }
 0xaed   : > { %v3415_v6 = vsub.f32 %v6881_v63, %v8237_v46  ;;  %v3741_v37 = vld [vmem:[%s9188_s3 + $0x60] sm:$0xff]  ;;  %v6413_v63 = vcombine.low %v3738_v57, %v3740_v58 }
 0xaee   : > { %v3411_v5 = vmul.f32 0.5, %v3409_v3  ;;  %v8341_v8 = vadd.f32 %v3416_v2, %v8234_v45  ;;  %v3764_v45 = vld [vmem:[%s9188_s3 + $0x358] sm:$0xff]  ;;  %v6416_v0 = vcombine.high %v3739_v36, %v3741_v37  ;;  %v6415_v3 = vcombine.low %v3739_v36, %v3741_v37  ;;  %v4067_v2 = vld [vmem:[%s9188_s3 + $0x3a8] sm:$0xff] }
 0xaef   : > { %v6437_v13 = vcombine.low %v3762_v60, %v3764_v45  ;;  %v4058_v36 = vld [vmem:[%s9188_s3 + $0x168] sm:$0xff] }
 0xaf0   : > { %v3417_v7 = vmul.f32 %v3415_v6, %v3411_v5  ;;  %v4068_v5 = vld [vmem:[%s9188_s3 + $0x3e8] sm:$0xff] }
 0xaf1   : > { %v6460_v6 = vcombine.high %v4067_v2, %v4068_v5 }
 0xaf2   : > { %v8344_v9 = vadd.f32 %v3417_v7, %v8237_v46  ;;  %v6438_v46 = vcombine.high %v3762_v60, %v3764_v45  ;;  %v6459_v7 = vcombine.low %v4067_v2, %v4068_v5  ;;  %v4224_v60 = vld [vmem:[%s9188_s3 + $0x3f0] sm:$0xff] }
 0xaf4   : > { %v3420_v30 = vpack.c.bf16 %v8344_v9, %v8341_v8 }
 0xaf6   : > { %3646 = vmatmul.mubr.bf16.vlgmr.msra.gmra.mxu0 %v3420_v30  ;;  %3689 = vmatmul.mubr.bf16.vlgmr.msra.gmra.mxu1 %v3420_v30  ;;  %v4223_v30 = vld [vmem:[%s9188_s3 + $0x3b0] sm:$0xff] }
 0xaf7   : > { %3931 = vmatpush1.bf16.msra.mxu0 %v6441_v43  ;;  %3974 = vmatpush1.bf16.msra.mxu1 %v6443_v27  ;;  %v3749_v43 = vld [vmem:[%s9188_s3 + $0x160] sm:$0xff]  ;;  %v3742_v27 = vld [vmem:[%s9188_s3 + $0x98] sm:$0xff]  ;;  %v6475_v45 = vcombine.low %v4223_v30, %v4224_v60 }
 0xaf8   : > { %3962 = vmatprep.mubr.bf16.mxu0 %v6986_v4  ;;  %4005 = vmatprep.mubr.bf16.mxu1 %v6986_v4  ;;  %v6424_v47 = vcombine.high %v3747_v42, %v3749_v43  ;;  %v6423_v48 = vcombine.low %v3747_v42, %v3749_v43  ;;  %v6418_v41 = vcombine.high %v3742_v27, %v3744_v29  ;;  %v4063_v42 = vld [vmem:[%s9188_s3 + $0x2a8] sm:$0xff] }
 0xaf9   : > { %3932 = vmatprep.subr.bf16.mxu0 %v6438_v46  ;;  %3975 = vmatprep.subr.bf16.mxu1 %v6440_v12  ;;  %v6417_v54 = vcombine.low %v3742_v27, %v3744_v29  ;;  %v6476_v46 = vcombine.high %v4223_v30, %v4224_v60  ;;  %v4064_v43 = vld [vmem:[%s9188_s3 + $0x2e8] sm:$0xff] }
 0xafa   : > { %v4062_v27 = vld [vmem:[%s9188_s3 + $0x268] sm:$0xff]  ;;  %v6455_v29 = vcombine.low %v4063_v42, %v4064_v43 }
 0xafb   : > { %3933 = vmatpush1.bf16.msra.mxu0 %v6437_v13  ;;  %3976 = vmatpush1.bf16.msra.mxu1 %v6439_v14 }
 0xafc   : > { %3934 = vmatprep.subr.bf16.mxu0 %v6434_v17  ;;  %3977 = vmatprep.subr.bf16.mxu1 %v6436_v23 }
 0xaff   : > { %3935 = vmatpush1.bf16.msra.mxu0 %v6433_v22  ;;  %3978 = vmatpush1.bf16.msra.mxu1 %v6435_v61 }
 0xb00   : > { %3936 = vmatprep.subr.bf16.mxu0 %v6430_v25  ;;  %3979 = vmatprep.subr.bf16.mxu1 %v6432_v51 }
 0xb03   : > { %3937 = vmatpush1.bf16.msra.mxu0 %v6429_v19  ;;  %3980 = vmatpush1.bf16.msra.mxu1 %v6431_v18 }
 0xb04   : > { %3938 = vmatprep.subr.bf16.mxu0 %v6426_v33  ;;  %3981 = vmatprep.subr.bf16.mxu1 %v6428_v16 }
 0xb07   : > { %3939 = vmatpush1.bf16.msra.mxu0 %v6425_v38  ;;  %3982 = vmatpush1.bf16.msra.mxu1 %v6427_v32 }
 0xb08   : > { %3940 = vmatprep.subr.bf16.mxu0 %v6422_v49  ;;  %3983 = vmatprep.subr.bf16.mxu1 %v6424_v47  ;;  %v6458_v49 = vcombine.high %v4065_v34, %v4066_v35  ;;  %v6456_v47 = vcombine.high %v4063_v42, %v4064_v43  ;;  %v4213_v43 = vld [vmem:[%s9188_s3 + $0x130] sm:$0xff] }
 0xb0b   : > { %3941 = vmatpush1.bf16.msra.mxu0 %v6421_v44  ;;  %3984 = vmatpush1.bf16.msra.mxu1 %v6423_v48  ;;  %v6457_v44 = vcombine.low %v4065_v34, %v4066_v35  ;;  %v4061_v48 = vld [vmem:[%s9188_s3 + $0x228] sm:$0xff]  ;;  %v4218_v34 = vld [vmem:[%s9188_s3 + $0x270] sm:$0xff] }
 0xb0c   : > { %3942 = vmatprep.subr.bf16.mxu0 %v6418_v41  ;;  %3985 = vmatprep.subr.bf16.mxu1 %v6420_v55  ;;  %v6454_v41 = vcombine.high %v4061_v48, %v4062_v27 }
 0xb0f   : > { %3943 = vmatpush1.bf16.msra.mxu0 %v6417_v54  ;;  %3986 = vmatpush1.bf16.msra.mxu1 %v6419_v56  ;;  %v4060_v54 = vld [vmem:[%s9188_s3 + $0x1e8] sm:$0xff]  ;;  %v6453_v56 = vcombine.low %v4061_v48, %v4062_v27  ;;  %v4211_v27 = vld [vmem:[%s9188_s3 + $0xb0] sm:$0xff] }
 0xb10   : > { %3944 = vmatprep.subr.bf16.mxu0 %v6414_v59  ;;  %3987 = vmatprep.subr.bf16.mxu1 %v6416_v0  ;;  %v6452_v58 = vcombine.high %v4059_v53, %v4060_v54  ;;  %v4057_v59 = vld [vmem:[%s9188_s3 + $0x128] sm:$0xff]  ;;  %v6451_v0 = vcombine.low %v4059_v53, %v4060_v54  ;;  %v4209_v53 = vld [vmem:[%s9188_s3 + $0x30] sm:$0xff] }
 0xb11   : > { %v6450_v2 = vcombine.high %v4057_v59, %v4058_v36  ;;  %v4210_v54 = vld [vmem:[%s9188_s3 + $0x70] sm:$0xff] }
 0xb13   : > { %3945 = vmatpush1.bf16.msra.mxu0 %v6413_v63  ;;  %3988 = vmatpush1.bf16.msra.mxu1 %v6415_v3 }
 0xb14   : > { %4149 = vmatprep.subr.bf16.mxu0 %v6460_v6  ;;  %4305 = vmatprep.subr.bf16.mxu1 %v6476_v46  ;;  %v4055_v6 = vld [vmem:[%s9188_s3 + $0xa8] sm:$0xff] }
 0xbb6   : > { %v3647_v10 = vpop.f32.mrf.mxu0  ;;  %v3690_v15 = vpop.f32.mrf.mxu1 }
 0xbb7   : > { %v3699_v11 = vmul.f32 0.5, %v3647_v10  ;;  %v3715_v62 = vmul.f32 0.5, %v3690_v15 }
 0xbb8   : > { %v3649_v13 = vpop.f32.mrf.mxu0  ;;  %v3692_v1 = vpop.f32.mrf.mxu1 }
 0xbb9   : > { %6882 = vtanh.f32 %v3699_v11  ;;  %v3707_v23 = vmax.f32 %v3649_v13, 0.0  ;;  %v3723_v18 = vmul.f32 0.5, %v3692_v1  ;;  %v4053_v13 = vld [vmem:[%s9188_s3 + $0x28] sm:$0xff] }
 0xbba   : > { %v3651_v12 = vpop.f32.mrf.mxu0  ;;  %v3694_v17 = vpop.f32.mrf.mxu1 }
 0xbbb   : > { %v3700_v14 = vmul.f32 0.5, %v3651_v12  ;;  %v3709_v26 = vsub.f32 %v3707_v23, %v8341_v8  ;;  %v3716_v16 = vmul.f32 0.5, %v3694_v17  ;;  %v4054_v12 = vld [vmem:[%s9188_s3 + $0x68] sm:$0xff] }
 0xbbc   : > { %v3653_v39 = vpop.f32.mrf.mxu0  ;;  %v3696_v61 = vpop.f32.mrf.mxu1  ;;  %v6445_v23 = vcombine.low %v4053_v13, %v4054_v12 }
 0xbbd   : > { %6884 = vtanh.f32 %v3700_v14  ;;  %v3708_v24 = vmax.f32 %v3653_v39, 0.0  ;;  %v3724_v19 = vmul.f32 0.5, %v3696_v61  ;;  %v6446_v39 = vcombine.high %v4053_v13, %v4054_v12 }
 0xbbf   : > { %v3710_v40 = vsub.f32 %v3708_v24, %v8344_v9  ;;  %6886 = vtanh.f32 %v3724_v19 }
 0xbc0   : > { %6888 = vtanh.f32 %v3723_v18  ;;  %v4220_v18 = vld [vmem:[%s9188_s3 + $0x2f0] sm:$0xff] }
 0xbc1   : > { %6890 = vtanh.f32 %v3716_v16 }
 0xbc2   : > { %6892 = vtanh.f32 %v3715_v62  ;;  %v4215_v62 = vld [vmem:[%s9188_s3 + $0x1b0] sm:$0xff] }
 0xbc6   : > { %v6883_v21 = vpop.eup %6882 }
 0xbc7   : > { %v3703_v22 = vadd.f32 1.0, %v6883_v21 }
 0xbc9   : > { %v3705_v31 = vmul.f32 0.5, %v3703_v22 }
 0xbca   : > { %v6885_v25 = vpop.eup %6884 }
 0xbcb   : > { %v3704_v50 = vadd.f32 1.0, %v6885_v25  ;;  %v3711_v51 = vmul.f32 %v3709_v26, %v3705_v31  ;;  %v4221_v25 = vld [vmem:[%s9188_s3 + $0x330] sm:$0xff] }
 0xbcc   : > { %v6887_v28 = vpop.eup %6886  ;;  %v4222_v26 = vld [vmem:[%s9188_s3 + $0x370] sm:$0xff] }
 0xbcd   : > { %v3706_v52 = vmul.f32 0.5, %v3704_v50  ;;  %v8455_v38 = vadd.f32 %v3711_v51, %v8341_v8  ;;  %v6889_v55 = vpop.eup %6888  ;;  %v3728_v57 = vadd.f32 1.0, %v6887_v28  ;;  %v6474_v50 = vcombine.high %v4221_v25, %v4222_v26  ;;  %v4219_v51 = vld [vmem:[%s9188_s3 + $0x2b0] sm:$0xff] }
 0xbce   : > { %v3727_v37 = vadd.f32 1.0, %v6889_v55  ;;  %v6891_v63 = vpop.eup %6890  ;;  %v6473_v19 = vcombine.low %v4221_v25, %v4222_v26  ;;  %v6462_v55 = vcombine.high %v4209_v53, %v4210_v54  ;;  %v4366_v25 = vld [vmem:[%s9188_s3 + $0x78] sm:$0xff] }
 0xbcf   : > { %v3712_v33 = vmul.f32 %v3710_v40, %v3706_v52  ;;  %v3730_v3 = vmul.f32 0.5, %v3728_v57  ;;  %v6893_v5 = vpop.eup %6892  ;;  %v3720_v60 = vadd.f32 1.0, %v6891_v63  ;;  %v6472_v52 = vcombine.high %v4219_v51, %v4220_v18  ;;  %v4379_v57 = vld [vmem:[%s9188_s3 + $0x3b8] sm:$0xff] }
 0xbd0   : > { %v3729_v30 = vmul.f32 0.5, %v3727_v37  ;;  %v3719_v46 = vadd.f32 1.0, %v6893_v5  ;;  %v6471_v40 = vcombine.low %v4219_v51, %v4220_v18  ;;  %v4377_v37 = vld [vmem:[%s9188_s3 + $0x338] sm:$0xff] }
 0xbd1   : > { %v8458_v32 = vadd.f32 %v3712_v33, %v8344_v9  ;;  %v3732_v10 = vsub.f32 %v3730_v3, %v8344_v9  ;;  %v3722_v15 = vmul.f32 0.5, %v3720_v60  ;;  %v4217_v33 = vld [vmem:[%s9188_s3 + $0x230] sm:$0xff]  ;;  %v4378_v63 = vld [vmem:[%s9188_s3 + $0x378] sm:$0xff] }
 0xbd2   : > { %v3731_v14 = vsub.f32 %v3729_v30, %v8341_v8  ;;  %v3721_v17 = vmul.f32 0.5, %v3719_v46  ;;  %v6470_v35 = vcombine.high %v4217_v33, %v4218_v34  ;;  %v6469_v16 = vcombine.low %v4217_v33, %v4218_v34  ;;  %v4376_v5 = vld [vmem:[%s9188_s3 + $0x2f8] sm:$0xff] }
 0xbd3   : > { %v3737_v20 = vpack.c.bf16 %v8458_v32, %v8455_v38  ;;  %v3734_v21 = vmul.f32 %v3732_v10, %v3722_v15  ;;  %v6489_v3 = vcombine.low %v4377_v37, %v4378_v63  ;;  %v4373_v30 = vld [vmem:[%s9188_s3 + $0x238] sm:$0xff] }
 0xbd4   : > { %v3733_v22 = vmul.f32 %v3731_v14, %v3721_v17  ;;  %v4374_v60 = vld [vmem:[%s9188_s3 + $0x278] sm:$0xff] }
 0xbd5   : > { %3963 = vmatmul.mubr.bf16.vlgmr.msra.gmra.mxu0 %v3737_v20  ;;  %4006 = vmatmul.mubr.bf16.vlgmr.msra.gmra.mxu1 %v3737_v20  ;;  %v8503_v61 = vadd.f32 %v3734_v21, %v8344_v9  ;;  %v4216_v20 = vld [vmem:[%s9188_s3 + $0x1f0] sm:$0xff]  ;;  %v6485_v46 = vcombine.low %v4373_v30, %v4374_v60  ;;  %v4371_v10 = vld [vmem:[%s9188_s3 + $0x1b8] sm:$0xff] }
 0xbd6   : > { %4150 = vmatpush1.bf16.msra.mxu0 %v6459_v7  ;;  %4181 = vmatprep.mubr.bf16.mxu0 %v6986_v4  ;;  %v4056_v7 = vld [vmem:[%s9188_s3 + $0xe8] sm:$0xff]  ;;  %v8506_v31 = vadd.f32 %v3733_v22, %v8341_v8  ;;  %v6467_v42 = vcombine.low %v4215_v62, %v4216_v20  ;;  %v4369_v14 = vld [vmem:[%s9188_s3 + $0x138] sm:$0xff] }
 0xbd7   : > { %4151 = vmatprep.subr.bf16.mxu0 %v6458_v49  ;;  %4306 = vmatpush1.bf16.msra.mxu1 %v6475_v45  ;;  %v6449_v45 = vcombine.low %v4057_v59, %v4058_v36  ;;  %v6448_v11 = vcombine.high %v4055_v6, %v4056_v7  ;;  %v6447_v1 = vcombine.low %v4055_v6, %v4056_v7  ;;  %v4370_v15 = vld [vmem:[%s9188_s3 + $0x178] sm:$0xff] }
 0xbd8   : > { %4337 = vmatprep.mubr.bf16.mxu1 %v6986_v4  ;;  %v4052_v24 = vpack.c.bf16 %v8503_v61, %v8506_v31  ;;  %4307 = vmatprep.subr.bf16.mxu1 %v6474_v50  ;;  %v6468_v49 = vcombine.high %v4215_v62, %v4216_v20  ;;  %v6481_v17 = vcombine.low %v4369_v14, %v4370_v15  ;;  %v4367_v21 = vld [vmem:[%s9188_s3 + $0xb8] sm:$0xff] }
 0xbda   : > { %4152 = vmatpush1.bf16.msra.mxu0 %v6457_v44  ;;  %v4214_v44 = vld [vmem:[%s9188_s3 + $0x170] sm:$0xff] }
 0xbdb   : > { %4153 = vmatprep.subr.bf16.mxu0 %v6456_v47  ;;  %4308 = vmatpush1.bf16.msra.mxu1 %v6473_v19  ;;  %v6466_v47 = vcombine.high %v4213_v43, %v4214_v44  ;;  %v6465_v48 = vcombine.low %v4213_v43, %v4214_v44 }
 0xbdc   : > { %4309 = vmatprep.subr.bf16.mxu1 %v6472_v52 }
 0xbde   : > { %4154 = vmatpush1.bf16.msra.mxu0 %v6455_v29  ;;  %v4212_v29 = vld [vmem:[%s9188_s3 + $0xf0] sm:$0xff] }
 0xbdf   : > { %4155 = vmatprep.subr.bf16.mxu0 %v6454_v41  ;;  %4310 = vmatpush1.bf16.msra.mxu1 %v6471_v40  ;;  %v6464_v41 = vcombine.high %v4211_v27, %v4212_v29  ;;  %v6463_v28 = vcombine.low %v4211_v27, %v4212_v29 }
 0xbe0   : > { %4311 = vmatprep.subr.bf16.mxu1 %v6470_v35 }
 0xbe2   : > { %4156 = vmatpush1.bf16.msra.mxu0 %v6453_v56  ;;  %v6461_v56 = vcombine.low %v4209_v53, %v4210_v54 }
 0xbe3   : > { %4157 = vmatprep.subr.bf16.mxu0 %v6452_v58  ;;  %4312 = vmatpush1.bf16.msra.mxu1 %v6469_v16  ;;  %v4380_v58 = vld [vmem:[%s9188_s3 + $0x3f8] sm:$0xff] }
 0xbe4   : > { %4313 = vmatprep.subr.bf16.mxu1 %v6468_v49  ;;  %v6491_v59 = vcombine.low %v4379_v57, %v4380_v58  ;;  %v6492_v36 = vcombine.high %v4379_v57, %v4380_v58 }
 0xbe6   : > { %4158 = vmatpush1.bf16.msra.mxu0 %v6451_v0  ;;  %v6490_v0 = vcombine.high %v4377_v37, %v4378_v63 }
 0xbe7   : > { %4159 = vmatprep.subr.bf16.mxu0 %v6450_v2  ;;  %4314 = vmatpush1.bf16.msra.mxu1 %v6467_v42  ;;  %v4375_v2 = vld [vmem:[%s9188_s3 + $0x2b8] sm:$0xff] }
 0xbe8   : > { %4315 = vmatprep.subr.bf16.mxu1 %v6466_v47  ;;  %v6488_v6 = vcombine.high %v4375_v2, %v4376_v5  ;;  %v6487_v7 = vcombine.low %v4375_v2, %v4376_v5 }
 0xbea   : > { %4160 = vmatpush1.bf16.msra.mxu0 %v6449_v45  ;;  %v6486_v45 = vcombine.high %v4373_v30, %v4374_v60 }
 0xbeb   : > { %4161 = vmatprep.subr.bf16.mxu0 %v6448_v11  ;;  %4316 = vmatpush1.bf16.msra.mxu1 %v6465_v48  ;;  %v4372_v11 = vld [vmem:[%s9188_s3 + $0x1f8] sm:$0xff] }
 0xbec   : > { %4317 = vmatprep.subr.bf16.mxu1 %v6464_v41  ;;  %v6484_v13 = vcombine.high %v4371_v10, %v4372_v11  ;;  %v6483_v12 = vcombine.low %v4371_v10, %v4372_v11  ;;  %v6730_v10 = vld [vmem:[%s9187_s2 + $0x70] ss:$8 sps:$4 sm:$0xff]   ;;  %v6735_v11 = vld [vmem:[%s9187_s2 + $0x64] ss:$8 sps:$4 sm:$0xff]  }
 0xbee   : > { %4162 = vmatpush1.bf16.msra.mxu0 %v6447_v1  ;;  %v6482_v1 = vcombine.high %v4369_v14, %v4370_v15  ;;  %v6736_v14 = vld [vmem:[%s9187_s2 + $0x50] ss:$8 sps:$4 sm:$0xff]   ;;  %v6741_v15 = vld [vmem:[%s9187_s2 + $0x44] ss:$8 sps:$4 sm:$0xff]  }
 0xbef   : > { %4163 = vmatprep.subr.bf16.mxu0 %v6446_v39  ;;  %4318 = vmatpush1.bf16.msra.mxu1 %v6463_v28  ;;  %v4368_v39 = vld [vmem:[%s9188_s3 + $0xf8] sm:$0xff] }
 0xbf0   : > { %4319 = vmatprep.subr.bf16.mxu1 %v6462_v55  ;;  %v6480_v22 = vcombine.high %v4367_v21, %v4368_v39 }
 0xbf2   : > { %4164 = vmatpush1.bf16.msra.mxu0 %v6445_v23  ;;  %v6479_v23 = vcombine.low %v4367_v21, %v4368_v39  ;;  %v6742_v21 = vld [vmem:[%s9187_s2 + $0x30] ss:$8 sps:$4 sm:$0xff]   ;;  %v6747_v39 = vld [vmem:[%s9187_s2 + $0x24] ss:$8 sps:$4 sm:$0xff]  }
 0xbf3   : > { %4320 = vmatpush1.bf16.msra.mxu1 %v6461_v56  ;;  %4461 = vmatprep.subr.bf16.mxu0 %v6492_v36 }
 0xbf5   : > { %4182 = vmatmul.mubr.bf16.vlgmr.msra.gmra.mxu0 %v4052_v24  ;;  %v4365_v24 = vld [vmem:[%s9188_s3 + $0x38] sm:$0xff] }
 0xbf6   : > { %4493 = vmatprep.mubr.bf16.mxu0 %v6986_v4  ;;  %4462 = vmatpush1.bf16.msra.mxu0 %v6491_v59  ;;  %v6477_v26 = vcombine.low %v4365_v24, %v4366_v25  ;;  %v6478_v50 = vcombine.high %v4365_v24, %v4366_v25  ;;  %v6748_v24 = vld [vmem:[%s9187_s2 + $0x10] ss:$8 sps:$4 sm:$0xff]   ;;  %v6753_v25 = vld [vmem:[%s9187_s2 + $0x4] ss:$8 sps:$4 sm:$0xff]  }
 0xbf7   : > { %4463 = vmatprep.subr.bf16.mxu0 %v6490_v0 }
 0xbfa   : > { %4464 = vmatpush1.bf16.msra.mxu0 %v6489_v3 }
 0xbfb   : > { %4465 = vmatprep.subr.bf16.mxu0 %v6488_v6 }
 0xbfe   : > { %4466 = vmatpush1.bf16.msra.mxu0 %v6487_v7 }
 0xbff   : > { %4467 = vmatprep.subr.bf16.mxu0 %v6486_v45 }
 0xc02   : > { %4468 = vmatpush1.bf16.msra.mxu0 %v6485_v46  ;;  %v6732_v46 = vld [vmem:[%s9187_s2 + $0x74] ss:$8 sps:$4 sm:$0xff]  }
 0xc03   : > { %4469 = vmatprep.subr.bf16.mxu0 %v6484_v13  ;;  %4643 = vmatprep.subr.bf16.mxu1 %v6732_v46  ;;  %v6733_v13 = vld [vmem:[%s9187_s2 + $0x60] ss:$8 sps:$4 sm:$0xff]  }
 0xc06   : > { %4470 = vmatpush1.bf16.msra.mxu0 %v6483_v12  ;;  %v6738_v12 = vld [vmem:[%s9187_s2 + $0x54] ss:$8 sps:$4 sm:$0xff]  }
 0xc07   : > { %4471 = vmatprep.subr.bf16.mxu0 %v6482_v1  ;;  %v6739_v1 = vld [vmem:[%s9187_s2 + $0x40] ss:$8 sps:$4 sm:$0xff]  }
 0xc0a   : > { %4472 = vmatpush1.bf16.msra.mxu0 %v6481_v17  ;;  %v6744_v17 = vld [vmem:[%s9187_s2 + $0x34] ss:$8 sps:$4 sm:$0xff]  }
 0xc0b   : > { %4473 = vmatprep.subr.bf16.mxu0 %v6480_v22  ;;  %v6745_v22 = vld [vmem:[%s9187_s2 + $0x20] ss:$8 sps:$4 sm:$0xff]  }
 0xc0e   : > { %4474 = vmatpush1.bf16.msra.mxu0 %v6479_v23  ;;  %v6750_v23 = vld [vmem:[%s9187_s2 + $0x14] ss:$8 sps:$4 sm:$0xff]  }
 0xc0f   : > { %4475 = vmatprep.subr.bf16.mxu0 %v6478_v50 }
 0xc12   : > { %4476 = vmatpush1.bf16.msra.mxu0 %v6477_v26  ;;  %v6751_v26 = vld [vmem:[%s9187_s2] ss:$8 sps:$4 sm:$0xff]  }
 0xc95   : > { %v3964_v19 = vpop.f32.mrf.mxu0  ;;  %v4007_v50 = vpop.f32.mrf.mxu1 }
 0xc96   : > { %v4016_v51 = vmul.f32 0.5, %v3964_v19 }
 0xc97   : > { %v3966_v18 = vpop.f32.mrf.mxu0  ;;  %v4009_v19 = vpop.f32.mrf.mxu1 }
 0xc98   : > { %6894 = vtanh.f32 %v4016_v51  ;;  %v4024_v20 = vsub.f32 %v3966_v18, %v8455_v38 }
 0xc99   : > { %v3968_v52 = vpop.f32.mrf.mxu0  ;;  %v4011_v51 = vpop.f32.mrf.mxu1 }
 0xc9a   : > { %v4017_v40 = vmul.f32 0.5, %v3968_v52 }
 0xc9b   : > { %v3970_v62 = vpop.f32.mrf.mxu0  ;;  %v4013_v18 = vpop.f32.mrf.mxu1 }
 0xc9c   : > { %6896 = vtanh.f32 %v4017_v40  ;;  %v4025_v44 = vsub.f32 %v3970_v62, %v8458_v32  ;;  %v4039_v62 = vmul.f32 0.5, %v4013_v18 }
 0xca5   : > { %v6895_v33 = vpop.eup %6894 }
 0xca6   : > { %v4020_v34 = vadd.f32 1.0, %v6895_v33 }
 0xca8   : > { %v4022_v35 = vmul.f32 0.5, %v4020_v34  ;;  %v4038_v34 = vmul.f32 0.5, %v4009_v19 }
 0xca9   : > { %v6897_v16 = vpop.eup %6896 }
 0xcaa   : > { %v4021_v49 = vadd.f32 1.0, %v6897_v16  ;;  %v4026_v42 = vmul.f32 %v4024_v20, %v4022_v35  ;;  %v4030_v20 = vmul.f32 0.5, %v4007_v50 }
 0xcac   : > { %v4023_v43 = vmul.f32 0.5, %v4021_v49  ;;  %v8604_v48 = vadd.f32 %v4026_v42, %v8455_v38  ;;  %v4031_v49 = vmul.f32 0.5, %v4011_v51 }
 0xcae   : > { %v4027_v47 = vmul.f32 %v4025_v44, %v4023_v43 }
 0xcb0   : > { %v8607_v27 = vadd.f32 %v4027_v47, %v8458_v32 }
 0xcb2   : > { %v4208_v29 = vpack.c.bf16 %v8607_v27, %v8604_v48 }
 0xcb4   : > { %4338 = vmatmul.mubr.bf16.vlgmr.msra.gmra.mxu1 %v4208_v29 }
 0xcb5   : > { %v4183_v41 = vpop.f32.mrf.mxu0  ;;  %4675 = vmatprep.mubr.bf16.mxu1 %v6986_v4  ;;  %4644 = vmatpush1.bf16.msra.mxu1 %v6730_v10 }
 0xcb6   : > { %v4192_v28 = vmul.f32 0.5, %v4183_v41  ;;  %4645 = vmatprep.subr.bf16.mxu1 %v6735_v11 }
 0xcb7   : > { %v4185_v53 = vpop.f32.mrf.mxu0 }
 0xcb8   : > { %6898 = vtanh.f32 %v4192_v28 }
 0xcb9   : > { %v4187_v54 = vpop.f32.mrf.mxu0  ;;  %6900 = vtanh.f32 %v4185_v53  ;;  %4646 = vmatpush1.bf16.msra.mxu1 %v6733_v13 }
 0xcba   : > { %v4193_v55 = vmul.f32 0.5, %v4187_v54  ;;  %4647 = vmatprep.subr.bf16.mxu1 %v6738_v12 }
 0xcbb   : > { %v4189_v56 = vpop.f32.mrf.mxu0 }
 0xcbc   : > { %6902 = vtanh.f32 %v4193_v55 }
 0xcbd   : > { %6904 = vtanh.f32 %v4189_v56  ;;  %4648 = vmatpush1.bf16.msra.mxu1 %v6736_v14 }
 0xcbe   : > { %4649 = vmatprep.subr.bf16.mxu1 %v6741_v15 }
 0xcc1   : > { %4650 = vmatpush1.bf16.msra.mxu1 %v6739_v1 }
 0xcc2   : > { %4651 = vmatprep.subr.bf16.mxu1 %v6744_v17 }
 0xcc5   : > { %v6899_v57 = vpop.eup %6898  ;;  %4652 = vmatpush1.bf16.msra.mxu1 %v6742_v21 }
 0xcc6   : > { %v4196_v58 = vadd.f32 1.0, %v6899_v57  ;;  %v6901_v59 = vpop.eup %6900  ;;  %4653 = vmatprep.subr.bf16.mxu1 %v6747_v39  ;;  %v4519_v39 = vadd.f32 %v8458_v32, %v8344_v9 }
 0xcc7   : > { %v4202_v0 = vsub.f32 %v6901_v59, %v8506_v31 }
 0xcc8   : > { %v4198_v36 = vmul.f32 0.5, %v4196_v58 }
 0xcc9   : > { %v6903_v37 = vpop.eup %6902  ;;  %4654 = vmatpush1.bf16.msra.mxu1 %v6745_v22 }
 0xcca   : > { %v6905_v63 = vpop.eup %6904  ;;  %v4197_v3 = vadd.f32 1.0, %v6903_v37  ;;  %v4204_v2 = vmul.f32 %v4202_v0, %v4198_v36  ;;  %4655 = vmatprep.subr.bf16.mxu1 %v6750_v23 }
 0xccb   : > { %v4203_v6 = vsub.f32 %v6905_v63, %v8503_v61 }
 0xccc   : > { %v4199_v5 = vmul.f32 0.5, %v4197_v3  ;;  %v8615_v30 = vadd.f32 %v4204_v2, %v8506_v31 }
 0xccd   : > { %4656 = vmatpush1.bf16.msra.mxu1 %v6748_v24 }
 0xcce   : > { %v4205_v7 = vmul.f32 %v4203_v6, %v4199_v5  ;;  %4657 = vmatprep.subr.bf16.mxu1 %v6753_v25 }
 0xcd0   : > { %v8618_v60 = vadd.f32 %v4205_v7, %v8503_v61  ;;  %v4518_v7 = vadd.f32 %v8455_v38, %v8341_v8 }
 0xcd1   : > { %4658 = vmatpush1.bf16.msra.mxu1 %v6751_v26 }
 0xcd2   : > { %v4364_v45 = vpack.c.bf16 %v8618_v60, %v8615_v30  ;;  %v4520_v11 = vadd.f32 %v4518_v7, %v8506_v31  ;;  %v4521_v31 = vadd.f32 %v4519_v39, %v8503_v61  ;;  %v4714_v7 = vld [vmem:[%s9188_s3 + $0x1c0] sm:$0xff] }
 0xcd3   : > { %v4708_v39 = vld [vmem:[%s9188_s3 + $0x40] sm:$0xff] }
 0xcd4   : > { %4494 = vmatmul.mubr.bf16.vlgmr.msra.gmra.mxu0 %v4364_v45  ;;  %v4522_v17 = vadd.f32 %v4520_v11, %v8604_v48  ;;  %v4523_v51 = vadd.f32 %v4521_v31, %v8607_v27  ;;  %v4712_v11 = vld [vmem:[%s9188_s3 + $0x140] sm:$0xff]  ;;  %v4892_v31 = vld [vmem:[%s9188_s3 + $0x390] sm:$0xff] }
 0xcd5   : > { %4835 = vmatprep.mubr.bf16.mxu0 %v6986_v4 }
 0xcd6   : > { %v4524_v23 = vadd.f32 %v4522_v17, %v8615_v30 }
 0xd74   : > { %v4339_v52 = vpop.f32.mrf.mxu1 }
 0xd75   : > { %v4348_v33 = vmul.f32 0.5, %v4339_v52 }
 0xd76   : > { %v4341_v40 = vpop.f32.mrf.mxu1 }
 0xd77   : > { %6906 = vtanh.f32 %v4348_v33  ;;  %v4356_v54 = vmax.f32 %v4341_v40, 0.0 }
 0xd78   : > { %v4343_v35 = vpop.f32.mrf.mxu1  ;;  %6908 = vtanh.f32 %v4038_v34  ;;  %v4525_v34 = vadd.f32 %v4523_v51, %v8618_v60 }
 0xd79   : > { %v4349_v16 = vmul.f32 0.5, %v4343_v35  ;;  %v4358_v0 = vsub.f32 %v4356_v54, %v8604_v48 }
 0xd7a   : > { %v4345_v59 = vpop.f32.mrf.mxu1 }
 0xd7b   : > { %6910 = vtanh.f32 %v4349_v16  ;;  %v4357_v2 = vmax.f32 %v4345_v59, 0.0  ;;  %v4717_v59 = vld [vmem:[%s9188_s3 + $0x280] sm:$0xff] }
 0xd7c   : > { %6912 = vtanh.f32 %v4039_v62 }
 0xd7d   : > { %6914 = vtanh.f32 %v4030_v20  ;;  %v4359_v12 = vsub.f32 %v4357_v2, %v8607_v27 }
 0xd7e   : > { %6916 = vtanh.f32 %v4031_v49 }
 0xd84   : > { %v6907_v42 = vpop.eup %6906 }
 0xd85   : > { %v6909_v44 = vpop.eup %6908  ;;  %v4352_v29 = vadd.f32 1.0, %v6907_v42 }
 0xd86   : > { %v4042_v53 = vadd.f32 1.0, %v6909_v44 }
 0xd87   : > { %v4354_v58 = vmul.f32 0.5, %v4352_v29 }
 0xd88   : > { %v6911_v28 = vpop.eup %6910  ;;  %v4044_v63 = vmul.f32 0.5, %v4042_v53 }
 0xd89   : > { %v6913_v57 = vpop.eup %6912  ;;  %v4353_v37 = vadd.f32 1.0, %v6911_v28  ;;  %v4360_v6 = vmul.f32 %v4358_v0, %v4354_v58  ;;  %v4715_v0 = vld [vmem:[%s9188_s3 + $0x200] sm:$0xff] }
 0xd8a   : > { %v6915_v36 = vpop.eup %6914  ;;  %v4043_v3 = vadd.f32 1.0, %v6913_v57  ;;  %v4046_v10 = vsub.f32 %v4044_v63, %v8455_v38 }
 0xd8b   : > { %v4034_v5 = vadd.f32 1.0, %v6915_v36  ;;  %v6917_v45 = vpop.eup %6916  ;;  %v4355_v46 = vmul.f32 0.5, %v4353_v37  ;;  %v4362_v1 = vadd.f32 %v4360_v6, %v8604_v48  ;;  %v4718_v36 = vld [vmem:[%s9188_s3 + $0x2c0] sm:$0xff] }
 0xd8c   : > { %v4045_v13 = vmul.f32 0.5, %v4043_v3  ;;  %v4035_v15 = vadd.f32 1.0, %v6917_v45  ;;  %v6526_v37 = vcombine.high %v4717_v59, %v4718_v36  ;;  %v6525_v63 = vcombine.low %v4717_v59, %v4718_v36  ;;  %v4716_v3 = vld [vmem:[%s9188_s3 + $0x240] sm:$0xff]  ;;  %v4887_v59 = vld [vmem:[%s9188_s3 + $0x308] sm:$0xff] }
 0xd8d   : > { %v4036_v14 = vmul.f32 0.5, %v4034_v5  ;;  %v4361_v21 = vmul.f32 %v4359_v12, %v4355_v46  ;;  %v4526_v50 = vadd.f32 %v4524_v23, %v4362_v1  ;;  %v6524_v2 = vcombine.high %v4715_v0, %v4716_v3  ;;  %v4713_v6 = vld [vmem:[%s9188_s3 + $0x180] sm:$0xff]  ;;  %v4891_v23 = vld [vmem:[%s9188_s3 + $0x388] sm:$0xff] }
 0xd8e   : > { %v4047_v24 = vsub.f32 %v4045_v13, %v8458_v32  ;;  %v4037_v26 = vmul.f32 0.5, %v4035_v15  ;;  %v6523_v5 = vcombine.low %v4715_v0, %v4716_v3  ;;  %v6522_v45 = vcombine.high %v4713_v6, %v4714_v7  ;;  %v4710_v15 = vld [vmem:[%s9188_s3 + $0xc0] sm:$0xff]  ;;  %v4889_v36 = vld [vmem:[%s9188_s3 + $0x348] sm:$0xff] }
 0xd8f   : > { %v4048_v22 = vmul.f32 %v4046_v10, %v4036_v14  ;;  %v4363_v19 = vadd.f32 %v4361_v21, %v8607_v27  ;;  %v6521_v46 = vcombine.low %v4713_v6, %v4714_v7  ;;  %v4711_v10 = vld [vmem:[%s9188_s3 + $0x100] sm:$0xff]  ;;  %v4884_v6 = vld [vmem:[%s9188_s3 + $0x290] sm:$0xff] }
 0xd90   : > { %v4049_v33 = vmul.f32 %v4047_v24, %v4037_v26  ;;  %v6520_v13 = vcombine.high %v4711_v10, %v4712_v11  ;;  %v6519_v12 = vcombine.low %v4711_v10, %v4712_v11  ;;  %v4709_v14 = vld [vmem:[%s9188_s3 + $0x80] sm:$0xff]  ;;  %v4893_v24 = vld [vmem:[%s9188_s3 + $0x3c8] sm:$0xff] }
 0xd91   : > { %v4050_v9 = vadd.f32 %v4048_v22, %v8455_v38  ;;  %v4527_v62 = vadd.f32 %v4525_v34, %v4363_v19  ;;  %v6518_v1 = vcombine.high %v4709_v14, %v4710_v15  ;;  %v6517_v17 = vcombine.low %v4709_v14, %v4710_v15  ;;  %v4707_v21 = vld [vmem:[%s9188_s3] sm:$0xff]  ;;  %v4880_v14 = vld [vmem:[%s9188_s3 + $0x210] sm:$0xff] }
 0xd92   : > { %v6515_v22 = vcombine.low %v4707_v21, %v4708_v39  ;;  %v6560_v26 = vcombine.high %v4891_v23, %v4893_v24 }
 0xd93   : > { %v4528_v16 = vadd.f32 %v4526_v50, %v4050_v9  ;;  %v4894_v50 = vld [vmem:[%s9188_s3 + $0x3d0] sm:$0xff] }
 0xd94   : > { %v4495_v43 = vpop.f32.mrf.mxu0  ;;  %v6561_v19 = vcombine.low %v4892_v31, %v4894_v50  ;;  %v6562_v51 = vcombine.high %v4892_v31, %v4894_v50  ;;  %5055 = vmatprep.subr.bf16.mxu1 %v6560_v26  ;;  %v4878_v31 = vld [vmem:[%s9188_s3 + $0x1d0] sm:$0xff] }
 0xd95   : > { %v4504_v47 = vmul.f32 0.5, %v4495_v43  ;;  %v4051_v43 = vadd.f32 %v4049_v33, %v8458_v32  ;;  %v4721_v32 = vld [vmem:[%s9188_s3 + $0x380] sm:$0xff]  ;;  %v6497_v33 = vld [vmem:[%s7023_s22 + $0x70] sm:$0xff] }
 0xd96   : > { %v4497_v41 = vpop.f32.mrf.mxu0 }
 0xd97   : > { %6918 = vtanh.f32 %v4504_v47  ;;  %v4512_v18 = vsub.f32 %v4497_v41, %v8615_v30  ;;  %v4529_v29 = vadd.f32 %v4527_v62, %v4051_v43 }
 0xd98   : > { %v4499_v55 = vpop.f32.mrf.mxu0 }
 0xd99   : > { %v4505_v56 = vmul.f32 0.5, %v4499_v55  ;;  %v4719_v55 = vld [vmem:[%s9188_s3 + $0x300] sm:$0xff] }
 0xd9a   : > { %v4501_v40 = vpop.f32.mrf.mxu0 }
 0xd9b   : > { %6920 = vtanh.f32 %v4505_v56  ;;  %v4513_v27 = vsub.f32 %v4501_v40, %v8618_v60  ;;  %v4720_v56 = vld [vmem:[%s9188_s3 + $0x340] sm:$0xff] }
 0xd9c   : > { %v6528_v57 = vcombine.high %v4719_v55, %v4720_v56  ;;  %v6527_v58 = vcombine.low %v4719_v55, %v4720_v56 }
 0xda4   : > { %v6919_v8 = vpop.eup %6918 }
 0xda5   : > { %v4508_v25 = vadd.f32 1.0, %v6919_v8  ;;  %v6516_v8 = vcombine.high %v4707_v21, %v4708_v39 }
 0xda7   : > { %v4510_v48 = vmul.f32 0.5, %v4508_v25  ;;  %v6559_v25 = vcombine.low %v4891_v23, %v4893_v24  ;;  %v4876_v23 = vld [vmem:[%s9188_s3 + $0x190] sm:$0xff] }
 0xda8   : > { %v6921_v52 = vpop.eup %6920  ;;  %v6545_v26 = vcombine.low %v4876_v23, %v4878_v31  ;;  %v6546_v50 = vcombine.high %v4876_v23, %v4878_v31  ;;  %v5207_v23 = vld [vmem:[%s9188_s3 + $0x360] sm:$0xff] }
 0xda9   : > { %v4514_v35 = vmul.f32 %v4512_v18, %v4510_v48  ;;  %v4509_v61 = vadd.f32 1.0, %v6921_v52  ;;  %v6495_v48 = vld [vmem:[%s7023_s22 + $0x60] sm:$0xff]  ;;  %v6496_v52 = vld [vmem:[%s7023_s22 + $0x68] sm:$0xff] }
 0xdab   : > { %v4516_v20 = vadd.f32 %v4514_v35, %v8615_v30  ;;  %v4511_v49 = vmul.f32 0.5, %v4509_v61 }
 0xdad   : > { %v4530_v42 = vadd.f32 %v4528_v16, %v4516_v20  ;;  %v4515_v44 = vmul.f32 %v4513_v27, %v4511_v49  ;;  %v6498_v16 = vld [vmem:[%s7023_s22 + $0x78] sm:$0xff] }
 0xdaf   : > { %v8692_v38 = vmul.f32 0.125, %v4530_v42  ;;  %v4517_v47 = vadd.f32 %v4515_v44, %v8618_v60  ;;  %v4722_v60 = vld [vmem:[%s9188_s3 + $0x3c0] sm:$0xff] }
 0xdb0   : > { %v6530_v53 = vcombine.high %v4721_v32, %v4722_v60  ;;  %v6529_v54 = vcombine.low %v4721_v32, %v4722_v60 }
 0xdb1   : > { %6493 = vst [vmem:[%s7028_s25 + $0x20] sm:$0xff] %v8692_v38  ;;  %v4531_v41 = vadd.f32 %v4529_v29, %v4517_v47 }
 0xdb2   : > { %4803 = vmatprep.subr.bf16.mxu0 %v6530_v53 }
 0xdb3   : > { %v8697_v28 = vmul.f32 0.125, %v4531_v41  ;;  %4804 = vmatpush1.bf16.msra.mxu0 %v6529_v54 }
 0xdb4   : > { %4805 = vmatprep.subr.bf16.mxu0 %v6528_v57 }
 0xdb5   : > { %6494 = vst [vmem:[%s7028_s25 + $0x28] sm:$0xff] %v8697_v28  ;;  %v4546_v30 = vpack.c.bf16 %v8697_v28, %v8692_v38 }
 0xdb7   : > { %4676 = vmatmul.mubr.bf16.vlgmr.msra.gmra.mxu1 %v4546_v30  ;;  %4806 = vmatpush1.bf16.msra.mxu0 %v6527_v58 }
 0xdb8   : > { %5087 = vmatprep.mubr.bf16.mxu1 %v6986_v4  ;;  %4807 = vmatprep.subr.bf16.mxu0 %v6526_v37  ;;  %v4890_v37 = vld [vmem:[%s9188_s3 + $0x350] sm:$0xff] }
 0xdb9   : > { %5056 = vmatpush1.bf16.msra.mxu1 %v6559_v25 }
 0xdbb   : > { %4808 = vmatpush1.bf16.msra.mxu0 %v6525_v63  ;;  %v6555_v63 = vcombine.low %v4887_v59, %v4889_v36 }
 0xdbc   : > { %4809 = vmatprep.subr.bf16.mxu0 %v6524_v2  ;;  %v4883_v2 = vld [vmem:[%s9188_s3 + $0x288] sm:$0xff] }
 0xdbf   : > { %4810 = vmatpush1.bf16.msra.mxu0 %v6523_v5  ;;  %v4885_v5 = vld [vmem:[%s9188_s3 + $0x2c8] sm:$0xff] }
 0xdc0   : > { %4811 = vmatprep.subr.bf16.mxu0 %v6522_v45  ;;  %v6552_v7 = vcombine.high %v4883_v2, %v4885_v5  ;;  %v4886_v45 = vld [vmem:[%s9188_s3 + $0x2d0] sm:$0xff] }
 0xdc1   : > { %v6553_v10 = vcombine.low %v4884_v6, %v4886_v45  ;;  %v6554_v11 = vcombine.high %v4884_v6, %v4886_v45 }
 0xdc3   : > { %4812 = vmatpush1.bf16.msra.mxu0 %v6521_v46  ;;  %v6551_v46 = vcombine.low %v4883_v2, %v4885_v5 }
 0xdc4   : > { %4813 = vmatprep.subr.bf16.mxu0 %v6520_v13  ;;  %v4879_v13 = vld [vmem:[%s9188_s3 + $0x208] sm:$0xff] }
 0xdc7   : > { %4814 = vmatpush1.bf16.msra.mxu0 %v6519_v12  ;;  %v4881_v12 = vld [vmem:[%s9188_s3 + $0x248] sm:$0xff] }
 0xdc8   : > { %4815 = vmatprep.subr.bf16.mxu0 %v6518_v1  ;;  %v6548_v15 = vcombine.high %v4879_v13, %v4881_v12  ;;  %v4882_v1 = vld [vmem:[%s9188_s3 + $0x250] sm:$0xff] }
 0xdc9   : > { %v6549_v21 = vcombine.low %v4880_v14, %v4882_v1  ;;  %v6550_v39 = vcombine.high %v4880_v14, %v4882_v1 }
 0xdcb   : > { %4816 = vmatpush1.bf16.msra.mxu0 %v6517_v17  ;;  %v6547_v17 = vcombine.low %v4879_v13, %v4881_v12 }
 0xdcc   : > { %4817 = vmatprep.subr.bf16.mxu0 %v6516_v8  ;;  %v4875_v8 = vld [vmem:[%s9188_s3 + $0x188] sm:$0xff] }
 0xdcf   : > { %4818 = vmatpush1.bf16.msra.mxu0 %v6515_v22  ;;  %v4877_v22 = vld [vmem:[%s9188_s3 + $0x1c8] sm:$0xff] }
 0xdd0   : > { %5098 = vmatprep.subr.bf16.mxu0 %v6562_v51  ;;  %v6544_v24 = vcombine.high %v4875_v8, %v4877_v22  ;;  %v6543_v25 = vcombine.low %v4875_v8, %v4877_v22  ;;  %v4873_v51 = vld [vmem:[%s9188_s3 + $0x148] sm:$0xff]  ;;  %v5204_v8 = vld [vmem:[%s9188_s3 + $0x318] sm:$0xff]  ;;  %v5205_v22 = vld [vmem:[%s9188_s3 + $0x320] sm:$0xff] }
 0xdd1   : > { %v6590_v31 = vcombine.high %v5205_v22, %v5207_v23 }
 0xe77   : > { %v4677_v18 = vpop.f32.mrf.mxu1 }
 0xe78   : > { %v4686_v9 = vadd.f32 %v6495_v48, %v4677_v18  ;;  %v4872_v48 = vld [vmem:[%s9188_s3 + $0x110] sm:$0xff] }
 0xe79   : > { %v4679_v40 = vpop.f32.mrf.mxu1 }
 0xe7a   : > { %v4690_v34 = vmul.f32 0.5, %v4686_v9  ;;  %v4687_v35 = vadd.f32 %v6496_v52, %v4679_v40  ;;  %v4874_v52 = vld [vmem:[%s9188_s3 + $0x150] sm:$0xff] }
 0xe7b   : > { %v4681_v61 = vpop.f32.mrf.mxu1  ;;  %v6541_v40 = vcombine.low %v4872_v48, %v4874_v52 }
 0xe7c   : > { %6922 = vtanh.f32 %v4690_v34  ;;  %v4688_v62 = vadd.f32 %v6497_v33, %v4681_v61  ;;  %v6542_v33 = vcombine.high %v4872_v48, %v4874_v52  ;;  %v4867_v34 = vld [vmem:[%s9188_s3 + $0x88] sm:$0xff]  ;;  %v4868_v61 = vld [vmem:[%s9188_s3 + $0x90] sm:$0xff]  ;;  %v5203_v48 = vld [vmem:[%s9188_s3 + $0x2e0] sm:$0xff] }
 0xe7d   : > { %v4683_v20 = vpop.f32.mrf.mxu1  ;;  %6924 = vtanh.f32 %v4687_v35  ;;  %v4869_v35 = vld [vmem:[%s9188_s3 + $0xc8] sm:$0xff] }
 0xe7e   : > { %v4691_v49 = vmul.f32 0.5, %v4688_v62  ;;  %v4689_v27 = vadd.f32 %v6498_v16, %v4683_v20  ;;  %v6536_v16 = vcombine.high %v4867_v34, %v4869_v35  ;;  %v4870_v62 = vld [vmem:[%s9188_s3 + $0xd0] sm:$0xff]  ;;  %v6535_v20 = vcombine.low %v4867_v34, %v4869_v35  ;;  %v5197_v35 = vld [vmem:[%s9188_s3 + $0x220] sm:$0xff] }
 0xe80   : > { %6926 = vtanh.f32 %v4691_v49  ;;  %v6537_v49 = vcombine.low %v4868_v61, %v4870_v62 }
 0xe81   : > { %6928 = vtanh.f32 %v4689_v27  ;;  %v6538_v27 = vcombine.high %v4868_v61, %v4870_v62  ;;  %v5199_v61 = vld [vmem:[%s9188_s3 + $0x260] sm:$0xff] }
 0xe82   : > { %v6582_v62 = vcombine.high %v5197_v35, %v5199_v61 }
 0xe89   : > { %v6923_v42 = vpop.eup %6922 }
 0xe8a   : > { %v4694_v43 = vadd.f32 1.0, %v6923_v42  ;;  %v6925_v44 = vpop.eup %6924  ;;  %v4863_v42 = vld [vmem:[%s9188_s3 + $0x8] sm:$0xff] }
 0xe8b   : > { %v4700_v30 = vsub.f32 %v6925_v44, %v8692_v38  ;;  %v4864_v44 = vld [vmem:[%s9188_s3 + $0x10] sm:$0xff] }
 0xe8c   : > { %v4696_v47 = vmul.f32 0.5, %v4694_v43  ;;  %v4865_v43 = vld [vmem:[%s9188_s3 + $0x48] sm:$0xff] }
 0xe8d   : > { %v6927_v29 = vpop.eup %6926 }
 0xe8e   : > { %v6929_v41 = vpop.eup %6928  ;;  %v4695_v32 = vadd.f32 1.0, %v6927_v29  ;;  %v4702_v54 = vmul.f32 %v4700_v30, %v4696_v47  ;;  %v6532_v47 = vcombine.high %v4863_v42, %v4865_v43  ;;  %v4866_v29 = vld [vmem:[%s9188_s3 + $0x50] sm:$0xff] }
 0xe8f   : > { %v4701_v53 = vsub.f32 %v6929_v41, %v8697_v28  ;;  %v6531_v41 = vcombine.low %v4863_v42, %v4865_v43  ;;  %v6533_v30 = vcombine.low %v4864_v44, %v4866_v29  ;;  %v5193_v43 = vld [vmem:[%s9188_s3 + $0x1a0] sm:$0xff] }
 0xe90   : > { %v4697_v60 = vmul.f32 0.5, %v4695_v32  ;;  %v8771_v56 = vadd.f32 %v4702_v54, %v8692_v38  ;;  %v4888_v38 = vld [vmem:[%s9188_s3 + $0x310] sm:$0xff]  ;;  %v6534_v32 = vcombine.high %v4864_v44, %v4866_v29  ;;  %v5195_v44 = vld [vmem:[%s9188_s3 + $0x1e0] sm:$0xff] }
 0xe91   : > { %v6557_v0 = vcombine.low %v4888_v38, %v4890_v37  ;;  %v6558_v3 = vcombine.high %v4888_v38, %v4890_v37  ;;  %v6578_v29 = vcombine.high %v5193_v43, %v5195_v44 }
 0xe92   : > { %v4703_v55 = vmul.f32 %v4701_v53, %v4697_v60  ;;  %v5208_v60 = vld [vmem:[%s9188_s3 + $0x398] sm:$0xff] }
 0xe93   : > { %v5210_v53 = vld [vmem:[%s9188_s3 + $0x3d8] sm:$0xff] }
 0xe94   : > { %v8774_v57 = vadd.f32 %v4703_v55, %v8697_v28  ;;  %v6556_v28 = vcombine.high %v4887_v59, %v4889_v36  ;;  %v6591_v54 = vcombine.low %v5208_v60, %v5210_v53  ;;  %v6592_v55 = vcombine.high %v5208_v60, %v5210_v53  ;;  %v5211_v59 = vld [vmem:[%s9188_s3 + $0x3e0] sm:$0xff] }
 0xe95   : > { %v5189_v53 = vld [vmem:[%s9188_s3 + $0x120] sm:$0xff] }
 0xe96   : > { %v4706_v58 = vpack.c.bf16 %v8774_v57, %v8771_v56  ;;  %5057 = vmatprep.subr.bf16.mxu1 %v6556_v28 }
 0xe97   : > { %5058 = vmatpush1.bf16.msra.mxu1 %v6555_v63 }
 0xe98   : > { %4836 = vmatmul.mubr.bf16.vlgmr.msra.gmra.mxu0 %v4706_v58  ;;  %5059 = vmatprep.subr.bf16.mxu1 %v6552_v7  ;;  %v5209_v58 = vld [vmem:[%s9188_s3 + $0x3a0] sm:$0xff] }
 0xe99   : > { %5099 = vmatpush1.bf16.msra.mxu0 %v6561_v19  ;;  %5130 = vmatprep.mubr.bf16.mxu0 %v6986_v4  ;;  %v4871_v19 = vld [vmem:[%s9188_s3 + $0x108] sm:$0xff]  ;;  %v6593_v36 = vcombine.low %v5209_v58, %v5211_v59  ;;  %v6594_v38 = vcombine.high %v5209_v58, %v5211_v59 }
 0xe9a   : > { %5100 = vmatprep.subr.bf16.mxu0 %v6558_v3  ;;  %v6540_v18 = vcombine.high %v4871_v19, %v4873_v51  ;;  %v6539_v9 = vcombine.low %v4871_v19, %v4873_v51  ;;  %v5201_v51 = vld [vmem:[%s9188_s3 + $0x2a0] sm:$0xff] }
 0xe9b   : > { %5060 = vmatpush1.bf16.msra.mxu1 %v6551_v46  ;;  %v6586_v52 = vcombine.high %v5201_v51, %v5203_v48 }
 0xe9c   : > { %5061 = vmatprep.subr.bf16.mxu1 %v6548_v15 }
 0xe9d   : > { %5101 = vmatpush1.bf16.msra.mxu0 %v6557_v0 }
 0xe9e   : > { %5102 = vmatprep.subr.bf16.mxu0 %v6554_v11 }
 0xe9f   : > { %5062 = vmatpush1.bf16.msra.mxu1 %v6547_v17 }
 0xea0   : > { %5063 = vmatprep.subr.bf16.mxu1 %v6544_v24 }
 0xea1   : > { %5103 = vmatpush1.bf16.msra.mxu0 %v6553_v10 }
 0xea2   : > { %5104 = vmatprep.subr.bf16.mxu0 %v6550_v39 }
 0xea3   : > { %5064 = vmatpush1.bf16.msra.mxu1 %v6543_v25  ;;  %v6589_v25 = vcombine.low %v5205_v22, %v5207_v23 }
 0xea4   : > { %5065 = vmatprep.subr.bf16.mxu1 %v6540_v18 }
 0xea5   : > { %5105 = vmatpush1.bf16.msra.mxu0 %v6549_v21 }
 0xea6   : > { %5106 = vmatprep.subr.bf16.mxu0 %v6546_v50  ;;  %v5202_v50 = vld [vmem:[%s9188_s3 + $0x2d8] sm:$0xff] }
 0xea7   : > { %5066 = vmatpush1.bf16.msra.mxu1 %v6539_v9  ;;  %v6585_v9 = vcombine.low %v5201_v51, %v5203_v48 }
 0xea8   : > { %5067 = vmatprep.subr.bf16.mxu1 %v6536_v16 }
 0xea9   : > { %5107 = vmatpush1.bf16.msra.mxu0 %v6545_v26  ;;  %v5200_v26 = vld [vmem:[%s9188_s3 + $0x298] sm:$0xff] }
 0xeaa   : > { %5108 = vmatprep.subr.bf16.mxu0 %v6542_v33  ;;  %v6584_v19 = vcombine.high %v5200_v26, %v5202_v50  ;;  %v6583_v18 = vcombine.low %v5200_v26, %v5202_v50  ;;  %v5198_v33 = vld [vmem:[%s9188_s3 + $0x258] sm:$0xff] }
 0xeab   : > { %5068 = vmatpush1.bf16.msra.mxu1 %v6535_v20  ;;  %v6581_v20 = vcombine.low %v5197_v35, %v5199_v61 }
 0xeac   : > { %5069 = vmatprep.subr.bf16.mxu1 %v6532_v47 }
 0xead   : > { %5109 = vmatpush1.bf16.msra.mxu0 %v6541_v40  ;;  %v5196_v40 = vld [vmem:[%s9188_s3 + $0x218] sm:$0xff] }
 0xeae   : > { %5110 = vmatprep.subr.bf16.mxu0 %v6538_v27  ;;  %v6580_v34 = vcombine.high %v5196_v40, %v5198_v33  ;;  %v6579_v16 = vcombine.low %v5196_v40, %v5198_v33  ;;  %v5194_v27 = vld [vmem:[%s9188_s3 + $0x1d8] sm:$0xff] }
 0xeaf   : > { %5070 = vmatpush1.bf16.msra.mxu1 %v6531_v41  ;;  %v6577_v41 = vcombine.low %v5193_v43, %v5195_v44  ;;  %v5507_v43 = vld [vmem:[%s9188_s3 + $0x328] sm:$0xff] }
 0xeb0   : > { %5372 = vmatprep.subr.bf16.mxu1 %v6592_v55  ;;  %v5508_v44 = vld [vmem:[%s9188_s3 + $0x368] sm:$0xff] }
 0xeb1   : > { %5111 = vmatpush1.bf16.msra.mxu0 %v6537_v49  ;;  %v5192_v49 = vld [vmem:[%s9188_s3 + $0x198] sm:$0xff] }
 0xeb2   : > { %5112 = vmatprep.subr.bf16.mxu0 %v6534_v32  ;;  %v6576_v42 = vcombine.high %v5192_v49, %v5194_v27  ;;  %v6575_v47 = vcombine.low %v5192_v49, %v5194_v27  ;;  %v5190_v32 = vld [vmem:[%s9188_s3 + $0x158] sm:$0xff] }
 0xeb5   : > { %5113 = vmatpush1.bf16.msra.mxu0 %v6533_v30  ;;  %v5188_v30 = vld [vmem:[%s9188_s3 + $0x118] sm:$0xff] }
 0xeb6   : > { %5415 = vmatprep.subr.bf16.mxu0 %v6594_v38  ;;  %v6572_v60 = vcombine.high %v5188_v30, %v5190_v32  ;;  %v6571_v55 = vcombine.low %v5188_v30, %v5190_v32  ;;  %v5186_v38 = vld [vmem:[%s9188_s3 + $0xd8] sm:$0xff] }
 0xf58   : > { %v4837_v28 = vpop.f32.mrf.mxu0 }
 0xf59   : > { %v4846_v37 = vmul.f32 0.5, %v4837_v28 }
 0xf5a   : > { %v4839_v63 = vpop.f32.mrf.mxu0 }
 0xf5b   : > { %6930 = vtanh.f32 %v4846_v37  ;;  %v5185_v37 = vld [vmem:[%s9188_s3 + $0xa0] sm:$0xff] }
 0xf5c   : > { %v4841_v0 = vpop.f32.mrf.mxu0  ;;  %6932 = vtanh.f32 %v4839_v63  ;;  %v5187_v63 = vld [vmem:[%s9188_s3 + $0xe0] sm:$0xff] }
 0xf5d   : > { %v4847_v3 = vmul.f32 0.5, %v4841_v0 }
 0xf5e   : > { %v4843_v2 = vpop.f32.mrf.mxu0 }
 0xf5f   : > { %6934 = vtanh.f32 %v4847_v3  ;;  %v6570_v3 = vcombine.high %v5185_v37, %v5187_v63 }
 0xf60   : > { %6936 = vtanh.f32 %v4843_v2  ;;  %v6569_v2 = vcombine.low %v5185_v37, %v5187_v63  ;;  %v5501_v63 = vld [vmem:[%s9188_s3 + $0x1a8] sm:$0xff] }
 0xf68   : > { %v6931_v5 = vpop.eup %6930 }
 0xf69   : > { %v4850_v6 = vadd.f32 1.0, %v6931_v5  ;;  %v6933_v7 = vpop.eup %6932  ;;  %v5180_v5 = vld [vmem:[%s9188_s3 + $0x18] sm:$0xff] }
 0xf6a   : > { %v4856_v11 = vsub.f32 %v6933_v7, %v8771_v56 }
 0xf6b   : > { %v4852_v45 = vmul.f32 0.5, %v4850_v6  ;;  %v5182_v6 = vld [vmem:[%s9188_s3 + $0x58] sm:$0xff] }
 0xf6c   : > { %v6935_v46 = vpop.eup %6934  ;;  %v6564_v7 = vcombine.high %v5180_v5, %v5182_v6 }
 0xf6d   : > { %v6937_v10 = vpop.eup %6936  ;;  %v4851_v13 = vadd.f32 1.0, %v6935_v46  ;;  %v4858_v12 = vmul.f32 %v4856_v11, %v4852_v45  ;;  %v5181_v45 = vld [vmem:[%s9188_s3 + $0x20] sm:$0xff] }
 0xf6e   : > { %v4857_v15 = vsub.f32 %v6937_v10, %v8774_v57  ;;  %v5183_v46 = vld [vmem:[%s9188_s3 + $0x60] sm:$0xff]  ;;  %v6563_v10 = vcombine.low %v5180_v5, %v5182_v6 }
 0xf6f   : > { %v4853_v14 = vmul.f32 0.5, %v4851_v13  ;;  %v8878_v17 = vadd.f32 %v4858_v12, %v8771_v56  ;;  %v5206_v56 = vld [vmem:[%s9188_s3 + $0x358] sm:$0xff]  ;;  %v6566_v11 = vcombine.high %v5181_v45, %v5183_v46  ;;  %v6565_v13 = vcombine.low %v5181_v45, %v5183_v46  ;;  %v5509_v12 = vld [vmem:[%s9188_s3 + $0x3a8] sm:$0xff] }
 0xf70   : > { %v6587_v24 = vcombine.low %v5204_v8, %v5206_v56  ;;  %v5500_v45 = vld [vmem:[%s9188_s3 + $0x168] sm:$0xff] }
 0xf71   : > { %v4859_v1 = vmul.f32 %v4857_v15, %v4853_v14  ;;  %v5510_v14 = vld [vmem:[%s9188_s3 + $0x3e8] sm:$0xff] }
 0xf72   : > { %v6610_v15 = vcombine.high %v5509_v12, %v5510_v14 }
 0xf73   : > { %v8881_v21 = vadd.f32 %v4859_v1, %v8774_v57  ;;  %v6588_v57 = vcombine.high %v5204_v8, %v5206_v56  ;;  %v6609_v1 = vcombine.low %v5509_v12, %v5510_v14  ;;  %v5666_v8 = vld [vmem:[%s9188_s3 + $0x3f0] sm:$0xff] }
 0xf75   : > { %v4862_v39 = vpack.c.bf16 %v8881_v21, %v8878_v17 }
 0xf77   : > { %5088 = vmatmul.mubr.bf16.vlgmr.msra.gmra.mxu1 %v4862_v39  ;;  %5131 = vmatmul.mubr.bf16.vlgmr.msra.gmra.mxu0 %v4862_v39  ;;  %v5665_v39 = vld [vmem:[%s9188_s3 + $0x3b0] sm:$0xff] }
 0xf78   : > { %5373 = vmatpush1.bf16.msra.mxu1 %v6591_v54  ;;  %5416 = vmatpush1.bf16.msra.mxu0 %v6593_v36  ;;  %v5191_v54 = vld [vmem:[%s9188_s3 + $0x160] sm:$0xff]  ;;  %v5184_v36 = vld [vmem:[%s9188_s3 + $0x98] sm:$0xff]  ;;  %v6625_v56 = vcombine.low %v5665_v39, %v5666_v8 }
 0xf79   : > { %5404 = vmatprep.mubr.bf16.mxu1 %v6986_v4  ;;  %5447 = vmatprep.mubr.bf16.mxu0 %v6986_v4  ;;  %v6574_v58 = vcombine.high %v5189_v53, %v5191_v54  ;;  %v6573_v59 = vcombine.low %v5189_v53, %v5191_v54  ;;  %v6568_v28 = vcombine.high %v5184_v36, %v5186_v38  ;;  %v5505_v53 = vld [vmem:[%s9188_s3 + $0x2a8] sm:$0xff] }
 0xf7a   : > { %5374 = vmatprep.subr.bf16.mxu1 %v6588_v57  ;;  %5417 = vmatprep.subr.bf16.mxu0 %v6590_v31  ;;  %v6567_v0 = vcombine.low %v5184_v36, %v5186_v38  ;;  %v6626_v57 = vcombine.high %v5665_v39, %v5666_v8  ;;  %v5506_v54 = vld [vmem:[%s9188_s3 + $0x2e8] sm:$0xff] }
 0xf7b   : > { %v5504_v36 = vld [vmem:[%s9188_s3 + $0x268] sm:$0xff]  ;;  %v6605_v38 = vcombine.low %v5505_v53, %v5506_v54 }
 0xf7c   : > { %5375 = vmatpush1.bf16.msra.mxu1 %v6587_v24  ;;  %5418 = vmatpush1.bf16.msra.mxu0 %v6589_v25 }
 0xf7d   : > { %5376 = vmatprep.subr.bf16.mxu1 %v6584_v19  ;;  %5419 = vmatprep.subr.bf16.mxu0 %v6586_v52 }
 0xf80   : > { %5377 = vmatpush1.bf16.msra.mxu1 %v6583_v18  ;;  %5420 = vmatpush1.bf16.msra.mxu0 %v6585_v9 }
 0xf81   : > { %5378 = vmatprep.subr.bf16.mxu1 %v6580_v34  ;;  %5421 = vmatprep.subr.bf16.mxu0 %v6582_v62 }
 0xf84   : > { %5379 = vmatpush1.bf16.msra.mxu1 %v6579_v16  ;;  %5422 = vmatpush1.bf16.msra.mxu0 %v6581_v20 }
 0xf85   : > { %5380 = vmatprep.subr.bf16.mxu1 %v6576_v42  ;;  %5423 = vmatprep.subr.bf16.mxu0 %v6578_v29 }
 0xf88   : > { %5381 = vmatpush1.bf16.msra.mxu1 %v6575_v47  ;;  %5424 = vmatpush1.bf16.msra.mxu0 %v6577_v41 }
 0xf89   : > { %5382 = vmatprep.subr.bf16.mxu1 %v6572_v60  ;;  %5425 = vmatprep.subr.bf16.mxu0 %v6574_v58  ;;  %v6608_v60 = vcombine.high %v5507_v43, %v5508_v44  ;;  %v6606_v58 = vcombine.high %v5505_v53, %v5506_v54  ;;  %v5655_v53 = vld [vmem:[%s9188_s3 + $0x130] sm:$0xff] }
 0xf8a   : > { %v5656_v54 = vld [vmem:[%s9188_s3 + $0x170] sm:$0xff] }
 0xf8c   : > { %5383 = vmatpush1.bf16.msra.mxu1 %v6571_v55  ;;  %5426 = vmatpush1.bf16.msra.mxu0 %v6573_v59  ;;  %v6607_v55 = vcombine.low %v5507_v43, %v5508_v44  ;;  %v5503_v59 = vld [vmem:[%s9188_s3 + $0x228] sm:$0xff] }
 0xf8d   : > { %5384 = vmatprep.subr.bf16.mxu1 %v6568_v28  ;;  %5427 = vmatprep.subr.bf16.mxu0 %v6570_v3  ;;  %v6604_v28 = vcombine.high %v5503_v59, %v5504_v36 }
 0xf90   : > { %5385 = vmatpush1.bf16.msra.mxu1 %v6567_v0  ;;  %5428 = vmatpush1.bf16.msra.mxu0 %v6569_v2  ;;  %v5502_v0 = vld [vmem:[%s9188_s3 + $0x1e8] sm:$0xff]  ;;  %v6603_v2 = vcombine.low %v5503_v59, %v5504_v36  ;;  %v5653_v59 = vld [vmem:[%s9188_s3 + $0xb0] sm:$0xff] }
 0xf91   : > { %5386 = vmatprep.subr.bf16.mxu1 %v6564_v7  ;;  %5429 = vmatprep.subr.bf16.mxu0 %v6566_v11  ;;  %v6602_v6 = vcombine.high %v5501_v63, %v5502_v0  ;;  %v5499_v7 = vld [vmem:[%s9188_s3 + $0x128] sm:$0xff]  ;;  %v6601_v11 = vcombine.low %v5501_v63, %v5502_v0  ;;  %v5654_v36 = vld [vmem:[%s9188_s3 + $0xf0] sm:$0xff] }
 0xf92   : > { %v6600_v12 = vcombine.high %v5499_v7, %v5500_v45  ;;  %v5652_v63 = vld [vmem:[%s9188_s3 + $0x70] sm:$0xff] }
 0xf94   : > { %5387 = vmatpush1.bf16.msra.mxu1 %v6563_v10  ;;  %5430 = vmatpush1.bf16.msra.mxu0 %v6565_v13 }
 0xf95   : > { %5591 = vmatprep.subr.bf16.mxu1 %v6610_v15  ;;  %5747 = vmatprep.subr.bf16.mxu0 %v6626_v57  ;;  %v5497_v15 = vld [vmem:[%s9188_s3 + $0xa8] sm:$0xff] }
0x1037   : > { %v5089_v22 = vpop.f32.mrf.mxu1  ;;  %v5132_v26 = vpop.f32.mrf.mxu0 }
0x1038   : > { %v5141_v23 = vmul.f32 0.5, %v5089_v22  ;;  %v5157_v30 = vmul.f32 0.5, %v5132_v26 }
0x1039   : > { %v5091_v24 = vpop.f32.mrf.mxu1  ;;  %v5134_v50 = vpop.f32.mrf.mxu0 }
0x103a   : > { %6938 = vtanh.f32 %v5141_v23  ;;  %v5149_v52 = vmax.f32 %v5091_v24, 0.0  ;;  %v5165_v20 = vmul.f32 0.5, %v5134_v50  ;;  %v5495_v24 = vld [vmem:[%s9188_s3 + $0x28] sm:$0xff] }
0x103b   : > { %v5093_v31 = vpop.f32.mrf.mxu1  ;;  %v5136_v19 = vpop.f32.mrf.mxu0 }
0x103c   : > { %v5142_v25 = vmul.f32 0.5, %v5093_v31  ;;  %v5151_v35 = vsub.f32 %v5149_v52, %v8878_v17  ;;  %v5158_v29 = vmul.f32 0.5, %v5136_v19  ;;  %v5496_v31 = vld [vmem:[%s9188_s3 + $0x68] sm:$0xff] }
0x103d   : > { %v5095_v48 = vpop.f32.mrf.mxu1  ;;  %v5138_v9 = vpop.f32.mrf.mxu0  ;;  %v6595_v52 = vcombine.low %v5495_v24, %v5496_v31 }
0x103e   : > { %6940 = vtanh.f32 %v5142_v25  ;;  %v5150_v33 = vmax.f32 %v5095_v48, 0.0  ;;  %v5166_v16 = vmul.f32 0.5, %v5138_v9  ;;  %v6596_v48 = vcombine.high %v5495_v24, %v5496_v31  ;;  %v5811_v31 = vld [vmem:[%s9188_s3 + $0x138] sm:$0xff] }
0x1040   : > { %v5152_v27 = vsub.f32 %v5150_v33, %v8881_v21  ;;  %6942 = vtanh.f32 %v5166_v16 }
0x1041   : > { %6944 = vtanh.f32 %v5165_v20 }
0x1042   : > { %6946 = vtanh.f32 %v5158_v29  ;;  %v5657_v29 = vld [vmem:[%s9188_s3 + $0x1b0] sm:$0xff] }
0x1043   : > { %6948 = vtanh.f32 %v5157_v30  ;;  %v5658_v30 = vld [vmem:[%s9188_s3 + $0x1f0] sm:$0xff] }
0x1047   : > { %v6939_v51 = vpop.eup %6938 }
0x1048   : > { %v5145_v18 = vadd.f32 1.0, %v6939_v51 }
0x104a   : > { %v5147_v40 = vmul.f32 0.5, %v5145_v18 }
0x104b   : > { %v6941_v34 = vpop.eup %6940 }
0x104c   : > { %v5146_v61 = vadd.f32 1.0, %v6941_v34  ;;  %v5153_v62 = vmul.f32 %v5151_v35, %v5147_v40  ;;  %v5663_v34 = vld [vmem:[%s9188_s3 + $0x330] sm:$0xff] }
0x104d   : > { %v6943_v37 = vpop.eup %6942  ;;  %v5664_v35 = vld [vmem:[%s9188_s3 + $0x370] sm:$0xff] }
0x104e   : > { %v5148_v49 = vmul.f32 0.5, %v5146_v61  ;;  %v8992_v47 = vadd.f32 %v5153_v62, %v8878_v17  ;;  %v6945_v3 = vpop.eup %6944  ;;  %v5170_v5 = vadd.f32 1.0, %v6943_v37  ;;  %v6624_v61 = vcombine.high %v5663_v34, %v5664_v35  ;;  %v5661_v62 = vld [vmem:[%s9188_s3 + $0x2b0] sm:$0xff] }
0x104f   : > { %v5169_v46 = vadd.f32 1.0, %v6945_v3  ;;  %v6947_v10 = vpop.eup %6946  ;;  %v6623_v16 = vcombine.low %v5663_v34, %v5664_v35  ;;  %v5651_v37 = vld [vmem:[%s9188_s3 + $0x30] sm:$0xff] }
0x1050   : > { %v5154_v42 = vmul.f32 %v5152_v27, %v5148_v49  ;;  %v5172_v13 = vmul.f32 0.5, %v5170_v5  ;;  %v6949_v14 = vpop.eup %6948  ;;  %v5162_v8 = vadd.f32 1.0, %v6947_v10  ;;  %v5659_v27 = vld [vmem:[%s9188_s3 + $0x230] sm:$0xff]  ;;  %v6612_v0 = vcombine.high %v5651_v37, %v5652_v63  ;;  %v5822_v5 = vld [vmem:[%s9188_s3 + $0x3f8] sm:$0xff] }
0x1051   : > { %v5171_v39 = vmul.f32 0.5, %v5169_v46  ;;  %v5161_v57 = vadd.f32 1.0, %v6949_v14  ;;  %v6611_v3 = vcombine.low %v5651_v37, %v5652_v63  ;;  %v5820_v46 = vld [vmem:[%s9188_s3 + $0x378] sm:$0xff] }
0x1052   : > { %v8995_v41 = vadd.f32 %v5154_v42, %v8881_v21  ;;  %v5174_v22 = vsub.f32 %v5172_v13, %v8881_v21  ;;  %v5164_v26 = vmul.f32 0.5, %v5162_v8  ;;  %v5660_v42 = vld [vmem:[%s9188_s3 + $0x270] sm:$0xff]  ;;  %v5817_v13 = vld [vmem:[%s9188_s3 + $0x2b8] sm:$0xff] }
0x1053   : > { %v5173_v25 = vsub.f32 %v5171_v39, %v8878_v17  ;;  %v5163_v19 = vmul.f32 0.5, %v5161_v57  ;;  %v6620_v43 = vcombine.high %v5659_v27, %v5660_v42  ;;  %v6619_v44 = vcombine.low %v5659_v27, %v5660_v42  ;;  %v5816_v39 = vld [vmem:[%s9188_s3 + $0x278] sm:$0xff] }
0x1054   : > { %v5179_v32 = vpack.c.bf16 %v8995_v41, %v8992_v47  ;;  %v5176_v51 = vmul.f32 %v5174_v22, %v5164_v26  ;;  %v5813_v57 = vld [vmem:[%s9188_s3 + $0x1b8] sm:$0xff] }
0x1055   : > { %v5175_v18 = vmul.f32 %v5173_v25, %v5163_v19  ;;  %v5814_v22 = vld [vmem:[%s9188_s3 + $0x1f8] sm:$0xff] }
0x1056   : > { %5405 = vmatmul.mubr.bf16.vlgmr.msra.gmra.mxu1 %v5179_v32  ;;  %5448 = vmatmul.mubr.bf16.vlgmr.msra.gmra.mxu0 %v5179_v32  ;;  %v9040_v9 = vadd.f32 %v5176_v51, %v8881_v21  ;;  %v6618_v32 = vcombine.high %v5657_v29, %v5658_v30  ;;  %v6633_v24 = vcombine.low %v5813_v57, %v5814_v22  ;;  %v5812_v25 = vld [vmem:[%s9188_s3 + $0x178] sm:$0xff] }
0x1057   : > { %5592 = vmatpush1.bf16.msra.mxu1 %v6609_v1  ;;  %5623 = vmatprep.mubr.bf16.mxu1 %v6986_v4  ;;  %v5498_v1 = vld [vmem:[%s9188_s3 + $0xe8] sm:$0xff]  ;;  %v9043_v40 = vadd.f32 %v5175_v18, %v8878_v17  ;;  %v6632_v26 = vcombine.high %v5811_v31, %v5812_v25  ;;  %v5809_v19 = vld [vmem:[%s9188_s3 + $0xb8] sm:$0xff] }
0x1058   : > { %5593 = vmatprep.subr.bf16.mxu1 %v6608_v60  ;;  %5748 = vmatpush1.bf16.msra.mxu0 %v6625_v56  ;;  %v6599_v56 = vcombine.low %v5499_v7, %v5500_v45  ;;  %v6598_v23 = vcombine.high %v5497_v15, %v5498_v1  ;;  %v6597_v50 = vcombine.low %v5497_v15, %v5498_v1  ;;  %v5819_v45 = vld [vmem:[%s9188_s3 + $0x338] sm:$0xff] }
0x1059   : > { %5779 = vmatprep.mubr.bf16.mxu0 %v6986_v4  ;;  %v5494_v33 = vpack.c.bf16 %v9040_v9, %v9043_v40  ;;  %5749 = vmatprep.subr.bf16.mxu0 %v6624_v61  ;;  %v6617_v60 = vcombine.low %v5657_v29, %v5658_v30  ;;  %v6640_v10 = vcombine.high %v5819_v45, %v5820_v46  ;;  %v5815_v1 = vld [vmem:[%s9188_s3 + $0x238] sm:$0xff] }
0x105a   : > { %v6636_v8 = vcombine.high %v5815_v1, %v5816_v39  ;;  %v5810_v51 = vld [vmem:[%s9188_s3 + $0xf8] sm:$0xff] }
0x105b   : > { %5594 = vmatpush1.bf16.msra.mxu1 %v6607_v55  ;;  %v6616_v55 = vcombine.high %v5655_v53, %v5656_v54  ;;  %v6629_v18 = vcombine.low %v5809_v19, %v5810_v51 }
0x105c   : > { %5595 = vmatprep.subr.bf16.mxu1 %v6606_v58  ;;  %5750 = vmatpush1.bf16.msra.mxu0 %v6623_v16  ;;  %v6615_v58 = vcombine.low %v5655_v53, %v5656_v54 }
0x105f   : > { %5596 = vmatpush1.bf16.msra.mxu1 %v6605_v38  ;;  %v6614_v38 = vcombine.high %v5653_v59, %v5654_v36 }
0x1060   : > { %5597 = vmatprep.subr.bf16.mxu1 %v6604_v28  ;;  %v6613_v28 = vcombine.low %v5653_v59, %v5654_v36 }
0x1063   : > { %5598 = vmatpush1.bf16.msra.mxu1 %v6603_v2  ;;  %v5821_v2 = vld [vmem:[%s9188_s3 + $0x3b8] sm:$0xff] }
0x1064   : > { %5599 = vmatprep.subr.bf16.mxu1 %v6602_v6  ;;  %v6641_v6 = vcombine.low %v5821_v2, %v5822_v5  ;;  %v6642_v7 = vcombine.high %v5821_v2, %v5822_v5 }
0x1067   : > { %5600 = vmatpush1.bf16.msra.mxu1 %v6601_v11  ;;  %v6639_v11 = vcombine.low %v5819_v45, %v5820_v46 }
0x1068   : > { %5601 = vmatprep.subr.bf16.mxu1 %v6600_v12  ;;  %v5818_v12 = vld [vmem:[%s9188_s3 + $0x2f8] sm:$0xff] }
0x1069   : > { %v6638_v14 = vcombine.high %v5817_v13, %v5818_v12  ;;  %v6637_v15 = vcombine.low %v5817_v13, %v5818_v12 }
0x106b   : > { %5602 = vmatpush1.bf16.msra.mxu1 %v6599_v56  ;;  %v6635_v56 = vcombine.low %v5815_v1, %v5816_v39 }
0x106c   : > { %5603 = vmatprep.subr.bf16.mxu1 %v6598_v23  ;;  %v6634_v23 = vcombine.high %v5813_v57, %v5814_v22 }
0x106f   : > { %5604 = vmatpush1.bf16.msra.mxu1 %v6597_v50  ;;  %v6631_v50 = vcombine.low %v5811_v31, %v5812_v25 }
0x1070   : > { %5605 = vmatprep.subr.bf16.mxu1 %v6596_v48  ;;  %v6630_v48 = vcombine.high %v5809_v19, %v5810_v51 }
0x1073   : > { %5606 = vmatpush1.bf16.msra.mxu1 %v6595_v52  ;;  %v5807_v52 = vld [vmem:[%s9188_s3 + $0x38] sm:$0xff] }
0x1074   : > { %5903 = vmatprep.subr.bf16.mxu1 %v6642_v7 }
0x1076   : > { %5624 = vmatmul.mubr.bf16.vlgmr.msra.gmra.mxu1 %v5494_v33  ;;  %v5808_v33 = vld [vmem:[%s9188_s3 + $0x78] sm:$0xff] }
0x1077   : > { %5935 = vmatprep.mubr.bf16.mxu1 %v6986_v4  ;;  %v5662_v4 = vld [vmem:[%s9188_s3 + $0x2f0] sm:$0xff]  ;;  %5904 = vmatpush1.bf16.msra.mxu1 %v6641_v6  ;;  %v6627_v34 = vcombine.low %v5807_v52, %v5808_v33  ;;  %v6628_v35 = vcombine.high %v5807_v52, %v5808_v33 }
0x1078   : > { %v6622_v20 = vcombine.high %v5661_v62, %v5662_v4  ;;  %v6621_v49 = vcombine.low %v5661_v62, %v5662_v4  ;;  %5905 = vmatprep.subr.bf16.mxu1 %v6640_v10 }
0x107a   : > { %5751 = vmatprep.subr.bf16.mxu0 %v6622_v20 }
0x107b   : > { %5752 = vmatpush1.bf16.msra.mxu0 %v6621_v49  ;;  %5906 = vmatpush1.bf16.msra.mxu1 %v6639_v11 }
0x107c   : > { %5753 = vmatprep.subr.bf16.mxu0 %v6620_v43  ;;  %5907 = vmatprep.subr.bf16.mxu1 %v6638_v14 }
0x107f   : > { %5754 = vmatpush1.bf16.msra.mxu0 %v6619_v44  ;;  %5908 = vmatpush1.bf16.msra.mxu1 %v6637_v15 }
0x1080   : > { %5755 = vmatprep.subr.bf16.mxu0 %v6618_v32  ;;  %5909 = vmatprep.subr.bf16.mxu1 %v6636_v8 }
0x1083   : > { %5756 = vmatpush1.bf16.msra.mxu0 %v6617_v60  ;;  %5910 = vmatpush1.bf16.msra.mxu1 %v6635_v56 }
0x1084   : > { %5757 = vmatprep.subr.bf16.mxu0 %v6616_v55  ;;  %5911 = vmatprep.subr.bf16.mxu1 %v6634_v23 }
0x1087   : > { %5758 = vmatpush1.bf16.msra.mxu0 %v6615_v58  ;;  %5912 = vmatpush1.bf16.msra.mxu1 %v6633_v24 }
0x1088   : > { %5759 = vmatprep.subr.bf16.mxu0 %v6614_v38  ;;  %5913 = vmatprep.subr.bf16.mxu1 %v6632_v26 }
0x108b   : > { %5760 = vmatpush1.bf16.msra.mxu0 %v6613_v28  ;;  %5914 = vmatpush1.bf16.msra.mxu1 %v6631_v50 }
0x108c   : > { %5761 = vmatprep.subr.bf16.mxu0 %v6612_v0  ;;  %5915 = vmatprep.subr.bf16.mxu1 %v6630_v48 }
0x108f   : > { %5762 = vmatpush1.bf16.msra.mxu0 %v6611_v3  ;;  %5916 = vmatpush1.bf16.msra.mxu1 %v6629_v18 }
0x1090   : > { %5917 = vmatprep.subr.bf16.mxu1 %v6628_v35 }
0x1093   : > { %5918 = vmatpush1.bf16.msra.mxu1 %v6627_v34 }
0x1116   : > { %v5406_v61 = vpop.f32.mrf.mxu1  ;;  %v5449_v8 = vpop.f32.mrf.mxu0 }
0x1117   : > { %v5458_v16 = vmul.f32 0.5, %v5406_v61  ;;  %v5472_v51 = vmul.f32 0.5, %v5449_v8 }
0x1118   : > { %v5408_v62 = vpop.f32.mrf.mxu1  ;;  %v5451_v56 = vpop.f32.mrf.mxu0 }
0x1119   : > { %6950 = vtanh.f32 %v5458_v16  ;;  %v5466_v29 = vsub.f32 %v5408_v62, %v8992_v47  ;;  %v5480_v25 = vmul.f32 0.5, %v5451_v56 }
0x111a   : > { %v5410_v4 = vpop.f32.mrf.mxu1  ;;  %v5453_v57 = vpop.f32.mrf.mxu0 }
0x111b   : > { %v5459_v20 = vmul.f32 0.5, %v5410_v4  ;;  %v5473_v48 = vmul.f32 0.5, %v5453_v57 }
0x111c   : > { %v5412_v44 = vpop.f32.mrf.mxu1  ;;  %v5455_v22 = vpop.f32.mrf.mxu0 }
0x111d   : > { %6952 = vtanh.f32 %v5459_v20  ;;  %v5467_v53 = vsub.f32 %v5412_v44, %v8995_v41  ;;  %v5481_v19 = vmul.f32 0.5, %v5455_v22 }
0x1126   : > { %v6951_v49 = vpop.eup %6950 }
0x1127   : > { %v5462_v27 = vadd.f32 1.0, %v6951_v49 }
0x1129   : > { %v5464_v42 = vmul.f32 0.5, %v5462_v27 }
0x112a   : > { %v6953_v43 = vpop.eup %6952 }
0x112b   : > { %v5463_v30 = vadd.f32 1.0, %v6953_v43  ;;  %v5468_v32 = vmul.f32 %v5466_v29, %v5464_v42 }
0x112d   : > { %v5465_v60 = vmul.f32 0.5, %v5463_v30  ;;  %v9141_v55 = vadd.f32 %v5468_v32, %v8992_v47 }
0x112f   : > { %v5469_v54 = vmul.f32 %v5467_v53, %v5465_v60 }
0x1131   : > { %v9144_v58 = vadd.f32 %v5469_v54, %v8995_v41 }
0x1133   : > { %v5650_v59 = vpack.c.bf16 %v9144_v58, %v9141_v55 }
0x1135   : > { %5780 = vmatmul.mubr.bf16.vlgmr.msra.gmra.mxu0 %v5650_v59 }
0x1136   : > { %v5625_v36 = vpop.f32.mrf.mxu1 }
0x1137   : > { %v5634_v38 = vmul.f32 0.5, %v5625_v36  ;;  %v5960_v36 = vadd.f32 %v8992_v47, %v8878_v17 }
0x1138   : > { %v5627_v28 = vpop.f32.mrf.mxu1 }
0x1139   : > { %6954 = vtanh.f32 %v5634_v38 }
0x113a   : > { %v5629_v37 = vpop.f32.mrf.mxu1  ;;  %6956 = vtanh.f32 %v5627_v28 }
0x113b   : > { %v5635_v63 = vmul.f32 0.5, %v5629_v37 }
0x113c   : > { %v5631_v0 = vpop.f32.mrf.mxu1 }
0x113d   : > { %6958 = vtanh.f32 %v5635_v63  ;;  %v5962_v63 = vadd.f32 %v5960_v36, %v9043_v40 }
0x113e   : > { %6960 = vtanh.f32 %v5631_v0 }
0x1146   : > { %v6955_v3 = vpop.eup %6954 }
0x1147   : > { %v5638_v2 = vadd.f32 1.0, %v6955_v3  ;;  %v6957_v5 = vpop.eup %6956 }
0x1148   : > { %v5644_v46 = vsub.f32 %v6957_v5, %v9043_v40 }
0x1149   : > { %v5640_v6 = vmul.f32 0.5, %v5638_v2 }
0x114a   : > { %v6959_v7 = vpop.eup %6958 }
0x114b   : > { %v6961_v45 = vpop.eup %6960  ;;  %v5639_v10 = vadd.f32 1.0, %v6959_v7  ;;  %v5646_v11 = vmul.f32 %v5644_v46, %v5640_v6  ;;  %v5964_v7 = vadd.f32 %v5962_v63, %v9141_v55  ;;  %v5961_v46 = vadd.f32 %v8995_v41, %v8881_v21 }
0x114c   : > { %v5645_v12 = vsub.f32 %v6961_v45, %v9040_v9 }
0x114d   : > { %v5641_v13 = vmul.f32 0.5, %v5639_v10  ;;  %v9151_v15 = vadd.f32 %v5646_v11, %v9043_v40  ;;  %v5963_v40 = vadd.f32 %v5961_v46, %v9040_v9 }
0x114f   : > { %v5647_v14 = vmul.f32 %v5645_v12, %v5641_v13  ;;  %v5966_v11 = vadd.f32 %v5964_v7, %v9151_v15  ;;  %v5965_v56 = vadd.f32 %v5963_v40, %v9144_v58 }
0x1151   : > { %v9154_v1 = vadd.f32 %v5647_v14, %v9040_v9 }
0x1153   : > { %v5806_v39 = vpack.c.bf16 %v9154_v1, %v9151_v15 }
0x1155   : > { %5936 = vmatmul.mubr.bf16.vlgmr.msra.gmra.mxu1 %v5806_v39 }
0x11f5   : > { %v5781_v23 = vpop.f32.mrf.mxu0 }
0x11f6   : > { %v5790_v31 = vmul.f32 0.5, %v5781_v23 }
0x11f7   : > { %v5783_v24 = vpop.f32.mrf.mxu0 }
0x11f8   : > { %6962 = vtanh.f32 %v5790_v31  ;;  %v5798_v4 = vmax.f32 %v5783_v24, 0.0  ;;  %v5967_v31 = vadd.f32 %v5965_v56, %v9154_v1 }
0x11f9   : > { %v5785_v26 = vpop.f32.mrf.mxu0  ;;  %6964 = vtanh.f32 %v5480_v25 }
0x11fa   : > { %v5791_v50 = vmul.f32 0.5, %v5785_v26  ;;  %v5800_v32 = vsub.f32 %v5798_v4, %v9141_v55 }
0x11fb   : > { %v5787_v43 = vpop.f32.mrf.mxu0 }
0x11fc   : > { %6966 = vtanh.f32 %v5791_v50  ;;  %v5799_v53 = vmax.f32 %v5787_v43, 0.0 }
0x11fd   : > { %6968 = vtanh.f32 %v5481_v19 }
0x11fe   : > { %6970 = vtanh.f32 %v5472_v51  ;;  %v5801_v3 = vsub.f32 %v5799_v53, %v9144_v58 }
0x11ff   : > { %6972 = vtanh.f32 %v5473_v48 }
0x1205   : > { %v6963_v18 = vpop.eup %6962 }
0x1206   : > { %v6965_v33 = vpop.eup %6964  ;;  %v5794_v35 = vadd.f32 1.0, %v6963_v18 }
0x1207   : > { %v5484_v62 = vadd.f32 1.0, %v6965_v33 }
0x1208   : > { %v5796_v42 = vmul.f32 0.5, %v5794_v35 }
0x1209   : > { %v6967_v16 = vpop.eup %6966  ;;  %v5486_v30 = vmul.f32 0.5, %v5484_v62 }
0x120a   : > { %v6969_v27 = vpop.eup %6968  ;;  %v5795_v29 = vadd.f32 1.0, %v6967_v16  ;;  %v5802_v59 = vmul.f32 %v5800_v32, %v5796_v42 }
0x120b   : > { %v6971_v44 = vpop.eup %6970  ;;  %v5485_v60 = vadd.f32 1.0, %v6969_v27  ;;  %v5488_v37 = vsub.f32 %v5486_v30, %v8992_v47 }
0x120c   : > { %v5476_v54 = vadd.f32 1.0, %v6971_v44  ;;  %v6973_v38 = vpop.eup %6972  ;;  %v5797_v28 = vmul.f32 0.5, %v5795_v29  ;;  %v5804_v6 = vadd.f32 %v5802_v59, %v9141_v55 }
0x120d   : > { %v5487_v0 = vmul.f32 0.5, %v5485_v60  ;;  %v5477_v5 = vadd.f32 1.0, %v6973_v38 }
0x120e   : > { %v5478_v2 = vmul.f32 0.5, %v5476_v54  ;;  %v5803_v45 = vmul.f32 %v5801_v3, %v5797_v28  ;;  %v5968_v39 = vadd.f32 %v5966_v11, %v5804_v6 }
0x120f   : > { %v5489_v13 = vsub.f32 %v5487_v0, %v8995_v41  ;;  %v5479_v14 = vmul.f32 0.5, %v5477_v5 }
0x1210   : > { %v5490_v10 = vmul.f32 %v5488_v37, %v5478_v2  ;;  %v5805_v8 = vadd.f32 %v5803_v45, %v9144_v58 }
0x1211   : > { %v5491_v24 = vmul.f32 %v5489_v13, %v5479_v14 }
0x1212   : > { %v5492_v21 = vadd.f32 %v5490_v10, %v8992_v47  ;;  %v5969_v50 = vadd.f32 %v5967_v31, %v5805_v8 }
0x1213   : > { %v5493_v18 = vadd.f32 %v5491_v24, %v8995_v41 }
0x1214   : > { %v5970_v26 = vadd.f32 %v5968_v39, %v5492_v21 }
0x1215   : > { %v5937_v52 = vpop.f32.mrf.mxu1 }
0x1216   : > { %v5946_v34 = vmul.f32 0.5, %v5937_v52 }
0x1217   : > { %v5939_v61 = vpop.f32.mrf.mxu1 }
0x1218   : > { %6974 = vtanh.f32 %v5946_v34  ;;  %v5954_v57 = vsub.f32 %v5939_v61, %v9151_v15  ;;  %v5971_v34 = vadd.f32 %v5969_v50, %v5493_v18 }
0x1219   : > { %v5941_v20 = vpop.f32.mrf.mxu1 }
0x121a   : > { %v5947_v49 = vmul.f32 0.5, %v5941_v20 }
0x121b   : > { %v5943_v23 = vpop.f32.mrf.mxu1 }
0x121c   : > { %6976 = vtanh.f32 %v5947_v49  ;;  %v5955_v58 = vsub.f32 %v5943_v23, %v9154_v1 }
0x1225   : > { %v6975_v17 = vpop.eup %6974 }
0x1226   : > { %v5950_v12 = vadd.f32 1.0, %v6975_v17 }
0x1228   : > { %v5952_v55 = vmul.f32 0.5, %v5950_v12 }
0x1229   : > { %v6977_v22 = vpop.eup %6976 }
0x122a   : > { %v5956_v25 = vmul.f32 %v5954_v57, %v5952_v55  ;;  %v5951_v9 = vadd.f32 1.0, %v6977_v22 }
0x122c   : > { %v5958_v19 = vadd.f32 %v5956_v25, %v9151_v15  ;;  %v5953_v51 = vmul.f32 0.5, %v5951_v9 }
0x122e   : > { %v5972_v48 = vadd.f32 %v5970_v26, %v5958_v19  ;;  %v5957_v52 = vmul.f32 %v5955_v58, %v5953_v51 }
0x1230   : > { %v5974_v47 = vmul.f32 0.125, %v5972_v48  ;;  %v5959_v33 = vadd.f32 %v5957_v52, %v9154_v1 }
0x1232   : > { %5976 = vst [vmem:[#allocation2] sm:$0xff] %v5974_v47  ;;  %6643 = vst [vmem:[%s7028_s25 + $0x30] sm:$0xff] %v5974_v47  ;;  %v5973_v35 = vadd.f32 %v5971_v34, %v5959_v33 }
0x1234   : > { %v5975_v61 = vmul.f32 0.125, %v5973_v35 }
0x1236   : > { %5977 = vst [vmem:[#allocation2 + $0x8] sm:$0xff] %v5975_v61  ;;  %6644 = vst [vmem:[%s7028_s25 + $0x38] sm:$0xff] %v5975_v61 }
0x1237 PF: > { %s14_s15 = sadd.s32 1, %s6984_s15  }
0x1238   : > { %p11_p5 = scmp.ge.s32.totalorder %s14_s15, 4  }
0x123a   :  { %13 = sbr.rel (!%p11_p5) target bundleno = 1 (0x1), region = 76 }

</bundles_post_ra>
